<compile_context>
chip_gen: v7x
topology: tpu7x:2x2x1
jax: 0.10.0
libtpu: 0.0.40
codegen_flags: <defaults>
</compile_context>

<pallas_src>
import jax
import jax.numpy as jnp
from jax import lax
from jax.experimental import pallas as pl
from jax.experimental.pallas import tpu as pltpu


# Tap enumeration shared by the wrapper (weight/mask prep) and the kernel.
# t = (dy + 1) * 3 + (dx + 1) == kh * 3 + kw  (matches PyTorch OIHW tap order).
_TAPS = tuple((dy, dx) for dy in (-1, 0, 1) for dx in (-1, 0, 1))


# ------------------------------ fused kernel -------------------------------

def _make_rdb_kernel(nc, gc, H, W, L):
    """L = B_blk * H * W lanes per grid step."""
    rows1 = 1 + 9 * nc                 # shifted-slab rows read by conv1
    rows2 = 1 + 9 * (nc + gc)          # ... by conv2
    # conv3 reads the whole shifted slab (1 + 9*(nc+2gc) rows).

    def kernel(m_ref, x_ref, w1_ref, w2_ref, w3_ref, w4_ref, o_ref,
               ss_ref, slab_ref):
        # Constant ones row: pairs with the bias column of every weight matrix
        # so bias lands inside the MXU accumulation. (Rewritten every step so
        # correctness does not depend on scratch persistence / core split.)
        ones = jnp.ones((1, L), jnp.float32)
        ss_ref[0:1, :] = ones
        slab_ref[0:1, :] = ones

        x0 = x_ref[0]                                    # (nc, L), lane-dense

        def append_shifts(val, base, C):
            # Write the 9 shifted (+boundary-masked) copies of `val` (C, L)
            # into ss_ref[base + t*C : base + (t+1)*C, :]  (tap-major).
            for t, (dy, dx) in enumerate(_TAPS):
                off = dy * W + dx
                if off == 0:
                    tap = val
                else:
                    # tap[:, p] = val[:, p + off] on valid pixels, else 0.
                    tap = (pltpu.roll(val, shift=(-off) % L, axis=1)
                           * m_ref[pl.ds(t, 1), :])
                ss_ref[pl.ds(base + t * C, C), :] = tap

        # --- conv1: nc -> gc (single large-K MXU dot) -----------------------
        slab_ref[pl.ds(1, nc), :] = x0
        append_shifts(x0, 1, nc)
        x1 = jnp.maximum(
            jnp.dot(w1_ref[...], ss_ref[pl.ds(0, rows1), :],
                    preferred_element_type=jnp.float32), 0.0)

        # --- conv2: nc+gc -> gc (reuses x's shifts, appends x1's) -----------
        slab_ref[pl.ds(1 + nc, gc), :] = x1
        append_shifts(x1, rows1, gc)
        x2 = jnp.maximum(
            jnp.dot(w2_ref[...], ss_ref[pl.ds(0, rows2), :],
                    preferred_element_type=jnp.float32), 0.0)

        # --- conv3: nc+2gc -> gc (reuses x/x1 shifts, appends x2's) ---------
        slab_ref[pl.ds(1 + nc + gc, gc), :] = x2
        append_shifts(x2, rows2, gc)
        x3 = jnp.maximum(
            jnp.dot(w3_ref[...], ss_ref[...],
                    preferred_element_type=jnp.float32), 0.0)

        # --- conv4 (1x1) + ReLU + residual, all fused ------------------------
        slab_ref[pl.ds(1 + nc + 2 * gc, gc), :] = x3
        x4 = jnp.maximum(
            jnp.dot(w4_ref[...], slab_ref[...],
                    preferred_element_type=jnp.float32), 0.0)
        o_ref[0] = x4 + x0

    return kernel


# --------------------------- weight / mask prep -----------------------------

def _w3x3_to_2d(w, groups):
    """PyTorch (O, I, 3, 3) conv weight -> (O, 9*I) matching the tap-major
    shifted-slab layout: per group, column index = t*Cg + c, t = kh*3 + kw."""
    O = w.shape[0]
    cols = []
    start = 0
    for Cg in groups:
        wg = w[:, start:start + Cg]                  # (O, Cg, 3, 3)
        wg = jnp.transpose(wg, (0, 2, 3, 1))         # (O, kh, kw, Cg)
        cols.append(wg.reshape(O, 9 * Cg))
        start += Cg
    return jnp.concatenate(cols, axis=1)


# ------------------------------- RDB forward --------------------------------

def rdb_forward(x_nchw, params, nc=4, gc=16, max_lane_imgs=8):
    """x_nchw: (N, nc, H, W) float32 (PyTorch layout). Returns (N, nc, H, W)."""
    N, C, H, W = x_nchw.shape
    assert C == nc
    HW = H * W

    # Lane batching: pack b_blk images side by side on the lane axis.
    b_blk = 1
    for d in range(min(N, max_lane_imgs), 0, -1):
        if N % d == 0:
            b_blk = d
            break
    nb = N // b_blk
    L = b_blk * HW

    # (N, nc, H, W) -> (nb, nc, b_blk*HW); image b occupies lanes [b*HW,(b+1)*HW).
    x = (x_nchw.reshape(nb, b_blk, nc, HW)
         .transpose(0, 2, 1, 3)
         .reshape(nb, nc, L))

    # Per-tap boundary masks (per-image coordinates, replicated per image in
    # the block); center tap row is unused but keeps indexing simple.
    pix = jnp.arange(HW, dtype=jnp.int32)
    hh, ww = pix // W, pix % W
    mrows = []
    for dy, dx in _TAPS:
        m = ((hh + dy >= 0) & (hh + dy < H) &
             (ww + dx >= 0) & (ww + dx < W)).astype(jnp.float32)
        mrows.append(jnp.tile(m, b_blk))
    masks = jnp.stack(mrows)                         # (9, L)

    # Weights reshaped to lane-dense matrices; bias folded in as column 0
    # (pairs with the constant ones row of the slabs).
    w1 = jnp.concatenate([params["b1"][:, None],
                          _w3x3_to_2d(params["w1"], [nc])], axis=1)
    w2 = jnp.concatenate([params["b2"][:, None],
                          _w3x3_to_2d(params["w2"], [nc, gc])], axis=1)
    w3 = jnp.concatenate([params["b3"][:, None],
                          _w3x3_to_2d(params["w3"], [nc, gc, gc])], axis=1)
    w4 = jnp.concatenate([params["b4"][:, None],
                          params["w4"][:, :, 0, 0]], axis=1)

    kernel = _make_rdb_kernel(nc, gc, H, W, L)
    ss_rows = 1 + 9 * (nc + 2 * gc)
    slab_rows = 1 + nc + 3 * gc

    out = pl.pallas_call(
        kernel,
        out_shape=jax.ShapeDtypeStruct((nb, nc, L), jnp.float32),
        grid=(nb,),
        in_specs=[
            pl.BlockSpec(masks.shape, lambda n: (0, 0)),
            pl.BlockSpec((1, nc, L), lambda n: (n, 0, 0)),
            pl.BlockSpec(w1.shape, lambda n: (0, 0)),
            pl.BlockSpec(w2.shape, lambda n: (0, 0)),
            pl.BlockSpec(w3.shape, lambda n: (0, 0)),
            pl.BlockSpec(w4.shape, lambda n: (0, 0)),
        ],
        out_specs=pl.BlockSpec((1, nc, L), lambda n: (n, 0, 0)),
        scratch_shapes=[pltpu.VMEM((ss_rows, L), jnp.float32),
                        pltpu.VMEM((slab_rows, L), jnp.float32)],
        compiler_params=pltpu.CompilerParams(
            dimension_semantics=("parallel",)),
    )(masks, x, w1, w2, w3, w4)

    # Undo lane batching.
    return (out.reshape(nb, nc, b_blk, HW)
            .transpose(0, 2, 1, 3)
            .reshape(N, nc, H, W))


# ---------------------------- pure-JAX reference ----------------------------

def _ref_forward(x, params):
    dn = ("NCHW", "OIHW", "NCHW")

    def conv(a, w, b, pad):
        y = lax.conv_general_dilated(a, w, (1, 1), pad, dimension_numbers=dn)
        return jnp.maximum(y + b.reshape(1, -1, 1, 1), 0.0)

    p3 = [(1, 1), (1, 1)]
    p1 = [(0, 0), (0, 0)]
    x1 = conv(x, params["w1"], params["b1"], p3)
    x2 = conv(jnp.concatenate([x, x1], 1), params["w2"], params["b2"], p3)
    x3 = conv(jnp.concatenate([x, x1, x2], 1), params["w3"], params["b3"], p3)
    x4 = conv(jnp.concatenate([x, x1, x2, x3], 1), params["w4"], params["b4"], p1)
    return x4 + x


# ---------------------------------- main ------------------------------------

if __name__ == "__main__":
    nc, gc = 4, 16
    N, H, W = 2, 16, 16

    key = jax.random.PRNGKey(0)
    keys = jax.random.split(key, 9)

    def winit(k, cout, cin, kh, kw):
        return (jax.random.normal(k, (cout, cin, kh, kw), jnp.float32)
                * (0.1 / (kh * kw * cin) ** 0.5))

    params = {
        "w1": winit(keys[0], gc, nc, 3, 3),
        "b1": jax.random.normal(keys[1], (gc,), jnp.float32) * 0.01,
        "w2": winit(keys[2], gc, nc + gc, 3, 3),
        "b2": jax.random.normal(keys[3], (gc,), jnp.float32) * 0.01,
        "w3": winit(keys[4], gc, nc + 2 * gc, 3, 3),
        "b3": jax.random.normal(keys[5], (gc,), jnp.float32) * 0.01,
        "w4": winit(keys[6], nc, nc + 3 * gc, 1, 1),
        "b4": jax.random.normal(keys[7], (nc,), jnp.float32) * 0.01,
    }

    x = jax.random.normal(keys[8], (N, nc, H, W), jnp.float32)

    fwd = jax.jit(lambda a, p: rdb_forward(a, p, nc=nc, gc=gc))
    out = jax.block_until_ready(fwd(x, params))
    ref = jax.block_until_ready(_ref_forward(x, params))

    assert out.shape == (N, nc, H, W)
    assert jnp.allclose(out, ref, atol=1e-4, rtol=1e-4)

    print("KERNEL_OK")
</pallas_src>

<mosaic_0001>
module attributes {stable_mosaic.version = 11 : i64} {
  func.func @kernel(%arg0: i32, %arg1: memref<9x512xf32, #tpu.memory_space<vmem>>, %arg2: memref<1x4x512xf32, #tpu.memory_space<vmem>>, %arg3: memref<16x37xf32, #tpu.memory_space<vmem>>, %arg4: memref<16x181xf32, #tpu.memory_space<vmem>>, %arg5: memref<16x325xf32, #tpu.memory_space<vmem>>, %arg6: memref<4x53xf32, #tpu.memory_space<vmem>>, %arg7: memref<1x4x512xf32, #tpu.memory_space<vmem>>, %arg8: memref<325x512xf32, #tpu.memory_space<vmem>>, %arg9: memref<53x512xf32, #tpu.memory_space<vmem>>) attributes {dimension_semantics = [#tpu.dimension_semantics<parallel>], iteration_bounds = array<i64: 1>, scalar_prefetch = 0 : i64, scratch_operands = 2 : i64, tpu.core_type = #tpu.core_type<tc>, window_params = [{pipeline_mode = #tpu.pipeline_mode<synchronous>, transform_indices = @transform_0, window_bounds = array<i64: 9, 512>}, {transform_indices = @transform_1, window_bounds = array<i64: 1, 4, 512>}, {pipeline_mode = #tpu.pipeline_mode<synchronous>, transform_indices = @transform_2, window_bounds = array<i64: 16, 37>}, {pipeline_mode = #tpu.pipeline_mode<synchronous>, transform_indices = @transform_3, window_bounds = array<i64: 16, 181>}, {pipeline_mode = #tpu.pipeline_mode<synchronous>, transform_indices = @transform_4, window_bounds = array<i64: 16, 325>}, {pipeline_mode = #tpu.pipeline_mode<synchronous>, transform_indices = @transform_5, window_bounds = array<i64: 4, 53>}, {transform_indices = @transform_6, window_bounds = array<i64: 1, 4, 512>}]} {
    %cst = arith.constant 1.000000e+00 : f32
    %0 = vector.broadcast %cst : f32 to vector<1x512xf32>
    %c0 = arith.constant 0 : index
    %c0_0 = arith.constant 0 : index
    %1 = vector.load %arg8[%c0, %c0_0] : memref<325x512xf32, #tpu.memory_space<vmem>>, vector<1x512xf32>
    tpu.vector_store %arg8[%c0, %c0_0], %0 {strides = array<i32>} : memref<325x512xf32, #tpu.memory_space<vmem>>, vector<1x512xf32>,
    %c0_1 = arith.constant 0 : index
    %c0_2 = arith.constant 0 : index
    %2 = vector.load %arg9[%c0_1, %c0_2] : memref<53x512xf32, #tpu.memory_space<vmem>>, vector<1x512xf32>
    tpu.vector_store %arg9[%c0_1, %c0_2], %0 {strides = array<i32>} : memref<53x512xf32, #tpu.memory_space<vmem>>, vector<1x512xf32>,
    %c0_3 = arith.constant 0 : index
    %c0_4 = arith.constant 0 : index
    %c0_5 = arith.constant 0 : index
    %3 = vector.load %arg2[%c0_3, %c0_4, %c0_5] : memref<1x4x512xf32, #tpu.memory_space<vmem>>, vector<1x4x512xf32>
    %4 = vector.shape_cast %3 : vector<1x4x512xf32> to vector<4x512xf32>
    %c1 = arith.constant 1 : index
    %c0_6 = arith.constant 0 : index
    %5 = vector.load %arg9[%c1, %c0_6] : memref<53x512xf32, #tpu.memory_space<vmem>>, vector<4x512xf32>
    tpu.vector_store %arg9[%c1, %c0_6], %4 {strides = array<i32>} : memref<53x512xf32, #tpu.memory_space<vmem>>, vector<4x512xf32>,
    %c17_i32 = arith.constant 17 : i32
    %6 = tpu.dynamic_rotate %4 by %c17_i32 dim 1 : vector<4x512xf32>, i32 -> vector<4x512xf32>
    %c0_7 = arith.constant 0 : index
    %c0_8 = arith.constant 0 : index
    %7 = vector.load %arg1[%c0_7, %c0_8] : memref<9x512xf32, #tpu.memory_space<vmem>>, vector<1x512xf32>
    %8 = vector.broadcast %7 : vector<1x512xf32> to vector<4x512xf32>
    %9 = arith.mulf %6, %8 : vector<4x512xf32>
    %c1_9 = arith.constant 1 : index
    %c0_10 = arith.constant 0 : index
    %10 = vector.load %arg8[%c1_9, %c0_10] : memref<325x512xf32, #tpu.memory_space<vmem>>, vector<4x512xf32>
    tpu.vector_store %arg8[%c1_9, %c0_10], %9 {strides = array<i32>} : memref<325x512xf32, #tpu.memory_space<vmem>>, vector<4x512xf32>,
    %c16_i32 = arith.constant 16 : i32
    %11 = tpu.dynamic_rotate %4 by %c16_i32 dim 1 : vector<4x512xf32>, i32 -> vector<4x512xf32>
    %c1_11 = arith.constant 1 : index
    %c0_12 = arith.constant 0 : index
    %12 = vector.load %arg1[%c1_11, %c0_12] : memref<9x512xf32, #tpu.memory_space<vmem>>, vector<1x512xf32>
    %13 = vector.broadcast %12 : vector<1x512xf32> to vector<4x512xf32>
    %14 = arith.mulf %11, %13 : vector<4x512xf32>
    %c5 = arith.constant 5 : index
    %c0_13 = arith.constant 0 : index
    %15 = vector.load %arg8[%c5, %c0_13] : memref<325x512xf32, #tpu.memory_space<vmem>>, vector<4x512xf32>
    tpu.vector_store %arg8[%c5, %c0_13], %14 {strides = array<i32>} : memref<325x512xf32, #tpu.memory_space<vmem>>, vector<4x512xf32>,
    %c15_i32 = arith.constant 15 : i32
    %16 = tpu.dynamic_rotate %4 by %c15_i32 dim 1 : vector<4x512xf32>, i32 -> vector<4x512xf32>
    %c2 = arith.constant 2 : index
    %c0_14 = arith.constant 0 : index
    %17 = vector.load %arg1[%c2, %c0_14] : memref<9x512xf32, #tpu.memory_space<vmem>>, vector<1x512xf32>
    %18 = vector.broadcast %17 : vector<1x512xf32> to vector<4x512xf32>
    %19 = arith.mulf %16, %18 : vector<4x512xf32>
    %c9 = arith.constant 9 : index
    %c0_15 = arith.constant 0 : index
    %20 = vector.load %arg8[%c9, %c0_15] : memref<325x512xf32, #tpu.memory_space<vmem>>, vector<4x512xf32>
    tpu.vector_store %arg8[%c9, %c0_15], %19 {strides = array<i32>} : memref<325x512xf32, #tpu.memory_space<vmem>>, vector<4x512xf32>,
    %c1_i32 = arith.constant 1 : i32
    %21 = tpu.dynamic_rotate %4 by %c1_i32 dim 1 : vector<4x512xf32>, i32 -> vector<4x512xf32>
    %c3 = arith.constant 3 : index
    %c0_16 = arith.constant 0 : index
    %22 = vector.load %arg1[%c3, %c0_16] : memref<9x512xf32, #tpu.memory_space<vmem>>, vector<1x512xf32>
    %23 = vector.broadcast %22 : vector<1x512xf32> to vector<4x512xf32>
    %24 = arith.mulf %21, %23 : vector<4x512xf32>
    %c13 = arith.constant 13 : index
    %c0_17 = arith.constant 0 : index
    %25 = vector.load %arg8[%c13, %c0_17] : memref<325x512xf32, #tpu.memory_space<vmem>>, vector<4x512xf32>
    tpu.vector_store %arg8[%c13, %c0_17], %24 {strides = array<i32>} : memref<325x512xf32, #tpu.memory_space<vmem>>, vector<4x512xf32>,
    %c17 = arith.constant 17 : index
    %c0_18 = arith.constant 0 : index
    %26 = vector.load %arg8[%c17, %c0_18] : memref<325x512xf32, #tpu.memory_space<vmem>>, vector<4x512xf32>
    tpu.vector_store %arg8[%c17, %c0_18], %4 {strides = array<i32>} : memref<325x512xf32, #tpu.memory_space<vmem>>, vector<4x512xf32>,
    %c511_i32 = arith.constant 511 : i32
    %27 = tpu.dynamic_rotate %4 by %c511_i32 dim 1 : vector<4x512xf32>, i32 -> vector<4x512xf32>
    %c5_19 = arith.constant 5 : index
    %c0_20 = arith.constant 0 : index
    %28 = vector.load %arg1[%c5_19, %c0_20] : memref<9x512xf32, #tpu.memory_space<vmem>>, vector<1x512xf32>
    %29 = vector.broadcast %28 : vector<1x512xf32> to vector<4x512xf32>
    %30 = arith.mulf %27, %29 : vector<4x512xf32>
    %c21 = arith.constant 21 : index
    %c0_21 = arith.constant 0 : index
    %31 = vector.load %arg8[%c21, %c0_21] : memref<325x512xf32, #tpu.memory_space<vmem>>, vector<4x512xf32>
    tpu.vector_store %arg8[%c21, %c0_21], %30 {strides = array<i32>} : memref<325x512xf32, #tpu.memory_space<vmem>>, vector<4x512xf32>,
    %c497_i32 = arith.constant 497 : i32
    %32 = tpu.dynamic_rotate %4 by %c497_i32 dim 1 : vector<4x512xf32>, i32 -> vector<4x512xf32>
    %c6 = arith.constant 6 : index
    %c0_22 = arith.constant 0 : index
    %33 = vector.load %arg1[%c6, %c0_22] : memref<9x512xf32, #tpu.memory_space<vmem>>, vector<1x512xf32>
    %34 = vector.broadcast %33 : vector<1x512xf32> to vector<4x512xf32>
    %35 = arith.mulf %32, %34 : vector<4x512xf32>
    %c25 = arith.constant 25 : index
    %c0_23 = arith.constant 0 : index
    %36 = vector.load %arg8[%c25, %c0_23] : memref<325x512xf32, #tpu.memory_space<vmem>>, vector<4x512xf32>
    tpu.vector_store %arg8[%c25, %c0_23], %35 {strides = array<i32>} : memref<325x512xf32, #tpu.memory_space<vmem>>, vector<4x512xf32>,
    %c496_i32 = arith.constant 496 : i32
    %37 = tpu.dynamic_rotate %4 by %c496_i32 dim 1 : vector<4x512xf32>, i32 -> vector<4x512xf32>
    %c7 = arith.constant 7 : index
    %c0_24 = arith.constant 0 : index
    %38 = vector.load %arg1[%c7, %c0_24] : memref<9x512xf32, #tpu.memory_space<vmem>>, vector<1x512xf32>
    %39 = vector.broadcast %38 : vector<1x512xf32> to vector<4x512xf32>
    %40 = arith.mulf %37, %39 : vector<4x512xf32>
    %c29 = arith.constant 29 : index
    %c0_25 = arith.constant 0 : index
    %41 = vector.load %arg8[%c29, %c0_25] : memref<325x512xf32, #tpu.memory_space<vmem>>, vector<4x512xf32>
    tpu.vector_store %arg8[%c29, %c0_25], %40 {strides = array<i32>} : memref<325x512xf32, #tpu.memory_space<vmem>>, vector<4x512xf32>,
    %c495_i32 = arith.constant 495 : i32
    %42 = tpu.dynamic_rotate %4 by %c495_i32 dim 1 : vector<4x512xf32>, i32 -> vector<4x512xf32>
    %c8 = arith.constant 8 : index
    %c0_26 = arith.constant 0 : index
    %43 = vector.load %arg1[%c8, %c0_26] : memref<9x512xf32, #tpu.memory_space<vmem>>, vector<1x512xf32>
    %44 = vector.broadcast %43 : vector<1x512xf32> to vector<4x512xf32>
    %45 = arith.mulf %42, %44 : vector<4x512xf32>
    %c33 = arith.constant 33 : index
    %c0_27 = arith.constant 0 : index
    %46 = vector.load %arg8[%c33, %c0_27] : memref<325x512xf32, #tpu.memory_space<vmem>>, vector<4x512xf32>
    tpu.vector_store %arg8[%c33, %c0_27], %45 {strides = array<i32>} : memref<325x512xf32, #tpu.memory_space<vmem>>, vector<4x512xf32>,
    %c0_28 = arith.constant 0 : index
    %c0_29 = arith.constant 0 : index
    %47 = vector.load %arg3[%c0_28, %c0_29] : memref<16x37xf32, #tpu.memory_space<vmem>>, vector<16x37xf32>
    %c0_30 = arith.constant 0 : index
    %c0_31 = arith.constant 0 : index
    %48 = vector.load %arg8[%c0_30, %c0_31] : memref<325x512xf32, #tpu.memory_space<vmem>>, vector<37x512xf32>
    %cst_32 = arith.constant dense<0.000000e+00> : vector<16x512xf32>
    %49 = tpu.matmul %47, %48, %cst_32 {dimension_numbers = #tpu.dot_dimension_numbers<[1], [0], [0], [1], [0, 0, 1, 1], [], []>} : vector<16x37xf32>, vector<37x512xf32>, vector<16x512xf32> -> vector<16x512xf32>
    %cst_33 = arith.constant 0.000000e+00 : f32
    %50 = vector.broadcast %cst_33 : f32 to vector<16x512xf32>
    %51 = arith.maximumf %49, %50 : vector<16x512xf32>
    %c5_34 = arith.constant 5 : index
    %c0_35 = arith.constant 0 : index
    %52 = vector.load %arg9[%c5_34, %c0_35] : memref<53x512xf32, #tpu.memory_space<vmem>>, vector<16x512xf32>
    tpu.vector_store %arg9[%c5_34, %c0_35], %51 {strides = array<i32>} : memref<53x512xf32, #tpu.memory_space<vmem>>, vector<16x512xf32>,
    %c17_i32_36 = arith.constant 17 : i32
    %53 = tpu.dynamic_rotate %51 by %c17_i32_36 dim 1 : vector<16x512xf32>, i32 -> vector<16x512xf32>
    %c0_37 = arith.constant 0 : index
    %c0_38 = arith.constant 0 : index
    %54 = vector.load %arg1[%c0_37, %c0_38] : memref<9x512xf32, #tpu.memory_space<vmem>>, vector<1x512xf32>
    %55 = vector.broadcast %54 : vector<1x512xf32> to vector<16x512xf32>
    %56 = arith.mulf %53, %55 : vector<16x512xf32>
    %c37 = arith.constant 37 : index
    %c0_39 = arith.constant 0 : index
    %57 = vector.load %arg8[%c37, %c0_39] : memref<325x512xf32, #tpu.memory_space<vmem>>, vector<16x512xf32>
    tpu.vector_store %arg8[%c37, %c0_39], %56 {strides = array<i32>} : memref<325x512xf32, #tpu.memory_space<vmem>>, vector<16x512xf32>,
    %c16_i32_40 = arith.constant 16 : i32
    %58 = tpu.dynamic_rotate %51 by %c16_i32_40 dim 1 : vector<16x512xf32>, i32 -> vector<16x512xf32>
    %c1_41 = arith.constant 1 : index
    %c0_42 = arith.constant 0 : index
    %59 = vector.load %arg1[%c1_41, %c0_42] : memref<9x512xf32, #tpu.memory_space<vmem>>, vector<1x512xf32>
    %60 = vector.broadcast %59 : vector<1x512xf32> to vector<16x512xf32>
    %61 = arith.mulf %58, %60 : vector<16x512xf32>
    %c53 = arith.constant 53 : index
    %c0_43 = arith.constant 0 : index
    %62 = vector.load %arg8[%c53, %c0_43] : memref<325x512xf32, #tpu.memory_space<vmem>>, vector<16x512xf32>
    tpu.vector_store %arg8[%c53, %c0_43], %61 {strides = array<i32>} : memref<325x512xf32, #tpu.memory_space<vmem>>, vector<16x512xf32>,
    %c15_i32_44 = arith.constant 15 : i32
    %63 = tpu.dynamic_rotate %51 by %c15_i32_44 dim 1 : vector<16x512xf32>, i32 -> vector<16x512xf32>
    %c2_45 = arith.constant 2 : index
    %c0_46 = arith.constant 0 : index
    %64 = vector.load %arg1[%c2_45, %c0_46] : memref<9x512xf32, #tpu.memory_space<vmem>>, vector<1x512xf32>
    %65 = vector.broadcast %64 : vector<1x512xf32> to vector<16x512xf32>
    %66 = arith.mulf %63, %65 : vector<16x512xf32>
    %c69 = arith.constant 69 : index
    %c0_47 = arith.constant 0 : index
    %67 = vector.load %arg8[%c69, %c0_47] : memref<325x512xf32, #tpu.memory_space<vmem>>, vector<16x512xf32>
    tpu.vector_store %arg8[%c69, %c0_47], %66 {strides = array<i32>} : memref<325x512xf32, #tpu.memory_space<vmem>>, vector<16x512xf32>,
    %c1_i32_48 = arith.constant 1 : i32
    %68 = tpu.dynamic_rotate %51 by %c1_i32_48 dim 1 : vector<16x512xf32>, i32 -> vector<16x512xf32>
    %c3_49 = arith.constant 3 : index
    %c0_50 = arith.constant 0 : index
    %69 = vector.load %arg1[%c3_49, %c0_50] : memref<9x512xf32, #tpu.memory_space<vmem>>, vector<1x512xf32>
    %70 = vector.broadcast %69 : vector<1x512xf32> to vector<16x512xf32>
    %71 = arith.mulf %68, %70 : vector<16x512xf32>
    %c85 = arith.constant 85 : index
    %c0_51 = arith.constant 0 : index
    %72 = vector.load %arg8[%c85, %c0_51] : memref<325x512xf32, #tpu.memory_space<vmem>>, vector<16x512xf32>
    tpu.vector_store %arg8[%c85, %c0_51], %71 {strides = array<i32>} : memref<325x512xf32, #tpu.memory_space<vmem>>, vector<16x512xf32>,
    %c101 = arith.constant 101 : index
    %c0_52 = arith.constant 0 : index
    %73 = vector.load %arg8[%c101, %c0_52] : memref<325x512xf32, #tpu.memory_space<vmem>>, vector<16x512xf32>
    tpu.vector_store %arg8[%c101, %c0_52], %51 {strides = array<i32>} : memref<325x512xf32, #tpu.memory_space<vmem>>, vector<16x512xf32>,
    %c511_i32_53 = arith.constant 511 : i32
    %74 = tpu.dynamic_rotate %51 by %c511_i32_53 dim 1 : vector<16x512xf32>, i32 -> vector<16x512xf32>
    %c5_54 = arith.constant 5 : index
    %c0_55 = arith.constant 0 : index
    %75 = vector.load %arg1[%c5_54, %c0_55] : memref<9x512xf32, #tpu.memory_space<vmem>>, vector<1x512xf32>
    %76 = vector.broadcast %75 : vector<1x512xf32> to vector<16x512xf32>
    %77 = arith.mulf %74, %76 : vector<16x512xf32>
    %c117 = arith.constant 117 : index
    %c0_56 = arith.constant 0 : index
    %78 = vector.load %arg8[%c117, %c0_56] : memref<325x512xf32, #tpu.memory_space<vmem>>, vector<16x512xf32>
    tpu.vector_store %arg8[%c117, %c0_56], %77 {strides = array<i32>} : memref<325x512xf32, #tpu.memory_space<vmem>>, vector<16x512xf32>,
    %c497_i32_57 = arith.constant 497 : i32
    %79 = tpu.dynamic_rotate %51 by %c497_i32_57 dim 1 : vector<16x512xf32>, i32 -> vector<16x512xf32>
    %c6_58 = arith.constant 6 : index
    %c0_59 = arith.constant 0 : index
    %80 = vector.load %arg1[%c6_58, %c0_59] : memref<9x512xf32, #tpu.memory_space<vmem>>, vector<1x512xf32>
    %81 = vector.broadcast %80 : vector<1x512xf32> to vector<16x512xf32>
    %82 = arith.mulf %79, %81 : vector<16x512xf32>
    %c133 = arith.constant 133 : index
    %c0_60 = arith.constant 0 : index
    %83 = vector.load %arg8[%c133, %c0_60] : memref<325x512xf32, #tpu.memory_space<vmem>>, vector<16x512xf32>
    tpu.vector_store %arg8[%c133, %c0_60], %82 {strides = array<i32>} : memref<325x512xf32, #tpu.memory_space<vmem>>, vector<16x512xf32>,
    %c496_i32_61 = arith.constant 496 : i32
    %84 = tpu.dynamic_rotate %51 by %c496_i32_61 dim 1 : vector<16x512xf32>, i32 -> vector<16x512xf32>
    %c7_62 = arith.constant 7 : index
    %c0_63 = arith.constant 0 : index
    %85 = vector.load %arg1[%c7_62, %c0_63] : memref<9x512xf32, #tpu.memory_space<vmem>>, vector<1x512xf32>
    %86 = vector.broadcast %85 : vector<1x512xf32> to vector<16x512xf32>
    %87 = arith.mulf %84, %86 : vector<16x512xf32>
    %c149 = arith.constant 149 : index
    %c0_64 = arith.constant 0 : index
    %88 = vector.load %arg8[%c149, %c0_64] : memref<325x512xf32, #tpu.memory_space<vmem>>, vector<16x512xf32>
    tpu.vector_store %arg8[%c149, %c0_64], %87 {strides = array<i32>} : memref<325x512xf32, #tpu.memory_space<vmem>>, vector<16x512xf32>,
    %c495_i32_65 = arith.constant 495 : i32
    %89 = tpu.dynamic_rotate %51 by %c495_i32_65 dim 1 : vector<16x512xf32>, i32 -> vector<16x512xf32>
    %c8_66 = arith.constant 8 : index
    %c0_67 = arith.constant 0 : index
    %90 = vector.load %arg1[%c8_66, %c0_67] : memref<9x512xf32, #tpu.memory_space<vmem>>, vector<1x512xf32>
    %91 = vector.broadcast %90 : vector<1x512xf32> to vector<16x512xf32>
    %92 = arith.mulf %89, %91 : vector<16x512xf32>
    %c165 = arith.constant 165 : index
    %c0_68 = arith.constant 0 : index
    %93 = vector.load %arg8[%c165, %c0_68] : memref<325x512xf32, #tpu.memory_space<vmem>>, vector<16x512xf32>
    tpu.vector_store %arg8[%c165, %c0_68], %92 {strides = array<i32>} : memref<325x512xf32, #tpu.memory_space<vmem>>, vector<16x512xf32>,
    %c0_69 = arith.constant 0 : index
    %c0_70 = arith.constant 0 : index
    %94 = vector.load %arg4[%c0_69, %c0_70] : memref<16x181xf32, #tpu.memory_space<vmem>>, vector<16x181xf32>
    %c0_71 = arith.constant 0 : index
    %c0_72 = arith.constant 0 : index
    %95 = vector.load %arg8[%c0_71, %c0_72] : memref<325x512xf32, #tpu.memory_space<vmem>>, vector<181x512xf32>
    %cst_73 = arith.constant dense<0.000000e+00> : vector<16x512xf32>
    %96 = tpu.matmul %94, %95, %cst_73 {dimension_numbers = #tpu.dot_dimension_numbers<[1], [0], [0], [1], [0, 0, 1, 1], [], []>} : vector<16x181xf32>, vector<181x512xf32>, vector<16x512xf32> -> vector<16x512xf32>
    %cst_74 = arith.constant 0.000000e+00 : f32
    %97 = vector.broadcast %cst_74 : f32 to vector<16x512xf32>
    %98 = arith.maximumf %96, %97 : vector<16x512xf32>
    %c21_75 = arith.constant 21 : index
    %c0_76 = arith.constant 0 : index
    %99 = vector.load %arg9[%c21_75, %c0_76] : memref<53x512xf32, #tpu.memory_space<vmem>>, vector<16x512xf32>
    tpu.vector_store %arg9[%c21_75, %c0_76], %98 {strides = array<i32>} : memref<53x512xf32, #tpu.memory_space<vmem>>, vector<16x512xf32>,
    %c17_i32_77 = arith.constant 17 : i32
    %100 = tpu.dynamic_rotate %98 by %c17_i32_77 dim 1 : vector<16x512xf32>, i32 -> vector<16x512xf32>
    %c0_78 = arith.constant 0 : index
    %c0_79 = arith.constant 0 : index
    %101 = vector.load %arg1[%c0_78, %c0_79] : memref<9x512xf32, #tpu.memory_space<vmem>>, vector<1x512xf32>
    %102 = vector.broadcast %101 : vector<1x512xf32> to vector<16x512xf32>
    %103 = arith.mulf %100, %102 : vector<16x512xf32>
    %c181 = arith.constant 181 : index
    %c0_80 = arith.constant 0 : index
    %104 = vector.load %arg8[%c181, %c0_80] : memref<325x512xf32, #tpu.memory_space<vmem>>, vector<16x512xf32>
    tpu.vector_store %arg8[%c181, %c0_80], %103 {strides = array<i32>} : memref<325x512xf32, #tpu.memory_space<vmem>>, vector<16x512xf32>,
    %c16_i32_81 = arith.constant 16 : i32
    %105 = tpu.dynamic_rotate %98 by %c16_i32_81 dim 1 : vector<16x512xf32>, i32 -> vector<16x512xf32>
    %c1_82 = arith.constant 1 : index
    %c0_83 = arith.constant 0 : index
    %106 = vector.load %arg1[%c1_82, %c0_83] : memref<9x512xf32, #tpu.memory_space<vmem>>, vector<1x512xf32>
    %107 = vector.broadcast %106 : vector<1x512xf32> to vector<16x512xf32>
    %108 = arith.mulf %105, %107 : vector<16x512xf32>
    %c197 = arith.constant 197 : index
    %c0_84 = arith.constant 0 : index
    %109 = vector.load %arg8[%c197, %c0_84] : memref<325x512xf32, #tpu.memory_space<vmem>>, vector<16x512xf32>
    tpu.vector_store %arg8[%c197, %c0_84], %108 {strides = array<i32>} : memref<325x512xf32, #tpu.memory_space<vmem>>, vector<16x512xf32>,
    %c15_i32_85 = arith.constant 15 : i32
    %110 = tpu.dynamic_rotate %98 by %c15_i32_85 dim 1 : vector<16x512xf32>, i32 -> vector<16x512xf32>
    %c2_86 = arith.constant 2 : index
    %c0_87 = arith.constant 0 : index
    %111 = vector.load %arg1[%c2_86, %c0_87] : memref<9x512xf32, #tpu.memory_space<vmem>>, vector<1x512xf32>
    %112 = vector.broadcast %111 : vector<1x512xf32> to vector<16x512xf32>
    %113 = arith.mulf %110, %112 : vector<16x512xf32>
    %c213 = arith.constant 213 : index
    %c0_88 = arith.constant 0 : index
    %114 = vector.load %arg8[%c213, %c0_88] : memref<325x512xf32, #tpu.memory_space<vmem>>, vector<16x512xf32>
    tpu.vector_store %arg8[%c213, %c0_88], %113 {strides = array<i32>} : memref<325x512xf32, #tpu.memory_space<vmem>>, vector<16x512xf32>,
    %c1_i32_89 = arith.constant 1 : i32
    %115 = tpu.dynamic_rotate %98 by %c1_i32_89 dim 1 : vector<16x512xf32>, i32 -> vector<16x512xf32>
    %c3_90 = arith.constant 3 : index
    %c0_91 = arith.constant 0 : index
    %116 = vector.load %arg1[%c3_90, %c0_91] : memref<9x512xf32, #tpu.memory_space<vmem>>, vector<1x512xf32>
    %117 = vector.broadcast %116 : vector<1x512xf32> to vector<16x512xf32>
    %118 = arith.mulf %115, %117 : vector<16x512xf32>
    %c229 = arith.constant 229 : index
    %c0_92 = arith.constant 0 : index
    %119 = vector.load %arg8[%c229, %c0_92] : memref<325x512xf32, #tpu.memory_space<vmem>>, vector<16x512xf32>
    tpu.vector_store %arg8[%c229, %c0_92], %118 {strides = array<i32>} : memref<325x512xf32, #tpu.memory_space<vmem>>, vector<16x512xf32>,
    %c245 = arith.constant 245 : index
    %c0_93 = arith.constant 0 : index
    %120 = vector.load %arg8[%c245, %c0_93] : memref<325x512xf32, #tpu.memory_space<vmem>>, vector<16x512xf32>
    tpu.vector_store %arg8[%c245, %c0_93], %98 {strides = array<i32>} : memref<325x512xf32, #tpu.memory_space<vmem>>, vector<16x512xf32>,
    %c511_i32_94 = arith.constant 511 : i32
    %121 = tpu.dynamic_rotate %98 by %c511_i32_94 dim 1 : vector<16x512xf32>, i32 -> vector<16x512xf32>
    %c5_95 = arith.constant 5 : index
    %c0_96 = arith.constant 0 : index
    %122 = vector.load %arg1[%c5_95, %c0_96] : memref<9x512xf32, #tpu.memory_space<vmem>>, vector<1x512xf32>
    %123 = vector.broadcast %122 : vector<1x512xf32> to vector<16x512xf32>
    %124 = arith.mulf %121, %123 : vector<16x512xf32>
    %c261 = arith.constant 261 : index
    %c0_97 = arith.constant 0 : index
    %125 = vector.load %arg8[%c261, %c0_97] : memref<325x512xf32, #tpu.memory_space<vmem>>, vector<16x512xf32>
    tpu.vector_store %arg8[%c261, %c0_97], %124 {strides = array<i32>} : memref<325x512xf32, #tpu.memory_space<vmem>>, vector<16x512xf32>,
    %c497_i32_98 = arith.constant 497 : i32
    %126 = tpu.dynamic_rotate %98 by %c497_i32_98 dim 1 : vector<16x512xf32>, i32 -> vector<16x512xf32>
    %c6_99 = arith.constant 6 : index
    %c0_100 = arith.constant 0 : index
    %127 = vector.load %arg1[%c6_99, %c0_100] : memref<9x512xf32, #tpu.memory_space<vmem>>, vector<1x512xf32>
    %128 = vector.broadcast %127 : vector<1x512xf32> to vector<16x512xf32>
    %129 = arith.mulf %126, %128 : vector<16x512xf32>
    %c277 = arith.constant 277 : index
    %c0_101 = arith.constant 0 : index
    %130 = vector.load %arg8[%c277, %c0_101] : memref<325x512xf32, #tpu.memory_space<vmem>>, vector<16x512xf32>
    tpu.vector_store %arg8[%c277, %c0_101], %129 {strides = array<i32>} : memref<325x512xf32, #tpu.memory_space<vmem>>, vector<16x512xf32>,
    %c496_i32_102 = arith.constant 496 : i32
    %131 = tpu.dynamic_rotate %98 by %c496_i32_102 dim 1 : vector<16x512xf32>, i32 -> vector<16x512xf32>
    %c7_103 = arith.constant 7 : index
    %c0_104 = arith.constant 0 : index
    %132 = vector.load %arg1[%c7_103, %c0_104] : memref<9x512xf32, #tpu.memory_space<vmem>>, vector<1x512xf32>
    %133 = vector.broadcast %132 : vector<1x512xf32> to vector<16x512xf32>
    %134 = arith.mulf %131, %133 : vector<16x512xf32>
    %c293 = arith.constant 293 : index
    %c0_105 = arith.constant 0 : index
    %135 = vector.load %arg8[%c293, %c0_105] : memref<325x512xf32, #tpu.memory_space<vmem>>, vector<16x512xf32>
    tpu.vector_store %arg8[%c293, %c0_105], %134 {strides = array<i32>} : memref<325x512xf32, #tpu.memory_space<vmem>>, vector<16x512xf32>,
    %c495_i32_106 = arith.constant 495 : i32
    %136 = tpu.dynamic_rotate %98 by %c495_i32_106 dim 1 : vector<16x512xf32>, i32 -> vector<16x512xf32>
    %c8_107 = arith.constant 8 : index
    %c0_108 = arith.constant 0 : index
    %137 = vector.load %arg1[%c8_107, %c0_108] : memref<9x512xf32, #tpu.memory_space<vmem>>, vector<1x512xf32>
    %138 = vector.broadcast %137 : vector<1x512xf32> to vector<16x512xf32>
    %139 = arith.mulf %136, %138 : vector<16x512xf32>
    %c309 = arith.constant 309 : index
    %c0_109 = arith.constant 0 : index
    %140 = vector.load %arg8[%c309, %c0_109] : memref<325x512xf32, #tpu.memory_space<vmem>>, vector<16x512xf32>
    tpu.vector_store %arg8[%c309, %c0_109], %139 {strides = array<i32>} : memref<325x512xf32, #tpu.memory_space<vmem>>, vector<16x512xf32>,
    %c0_110 = arith.constant 0 : index
    %c0_111 = arith.constant 0 : index
    %141 = vector.load %arg5[%c0_110, %c0_111] : memref<16x325xf32, #tpu.memory_space<vmem>>, vector<16x325xf32>
    %c0_112 = arith.constant 0 : index
    %c0_113 = arith.constant 0 : index
    %142 = vector.load %arg8[%c0_112, %c0_113] : memref<325x512xf32, #tpu.memory_space<vmem>>, vector<325x512xf32>
    %cst_114 = arith.constant dense<0.000000e+00> : vector<16x512xf32>
    %143 = tpu.matmul %141, %142, %cst_114 {dimension_numbers = #tpu.dot_dimension_numbers<[1], [0], [0], [1], [0, 0, 1, 1], [], []>} : vector<16x325xf32>, vector<325x512xf32>, vector<16x512xf32> -> vector<16x512xf32>
    %cst_115 = arith.constant 0.000000e+00 : f32
    %144 = vector.broadcast %cst_115 : f32 to vector<16x512xf32>
    %145 = arith.maximumf %143, %144 : vector<16x512xf32>
    %c37_116 = arith.constant 37 : index
    %c0_117 = arith.constant 0 : index
    %146 = vector.load %arg9[%c37_116, %c0_117] : memref<53x512xf32, #tpu.memory_space<vmem>>, vector<16x512xf32>
    tpu.vector_store %arg9[%c37_116, %c0_117], %145 {strides = array<i32>} : memref<53x512xf32, #tpu.memory_space<vmem>>, vector<16x512xf32>,
    %c0_118 = arith.constant 0 : index
    %c0_119 = arith.constant 0 : index
    %147 = vector.load %arg6[%c0_118, %c0_119] : memref<4x53xf32, #tpu.memory_space<vmem>>, vector<4x53xf32>
    %c0_120 = arith.constant 0 : index
    %c0_121 = arith.constant 0 : index
    %148 = vector.load %arg9[%c0_120, %c0_121] : memref<53x512xf32, #tpu.memory_space<vmem>>, vector<53x512xf32>
    %cst_122 = arith.constant dense<0.000000e+00> : vector<4x512xf32>
    %149 = tpu.matmul %147, %148, %cst_122 {dimension_numbers = #tpu.dot_dimension_numbers<[1], [0], [0], [1], [0, 0, 1, 1], [], []>} : vector<4x53xf32>, vector<53x512xf32>, vector<4x512xf32> -> vector<4x512xf32>
    %cst_123 = arith.constant 0.000000e+00 : f32
    %150 = vector.broadcast %cst_123 : f32 to vector<4x512xf32>
    %151 = arith.maximumf %149, %150 : vector<4x512xf32>
    %152 = arith.addf %151, %4 : vector<4x512xf32>
    %c0_124 = arith.constant 0 : index
    %c0_125 = arith.constant 0 : index
    %c0_126 = arith.constant 0 : index
    %153 = vector.load %arg7[%c0_124, %c0_125, %c0_126] : memref<1x4x512xf32, #tpu.memory_space<vmem>>, vector<1x4x512xf32>
    %154 = vector.shape_cast %153 : vector<1x4x512xf32> to vector<4x512xf32>
    %155 = vector.shape_cast %152 : vector<4x512xf32> to vector<1x4x512xf32>
    tpu.vector_store %arg7[%c0_124, %c0_125, %c0_126], %155 {strides = array<i32>} : memref<1x4x512xf32, #tpu.memory_space<vmem>>, vector<1x4x512xf32>,
    return
  }
  func.func @transform_0(%arg0: i32) -> (i32, i32) {
    %c0_i32 = arith.constant 0 : i32
    %c0_i32_0 = arith.constant 0 : i32
    %c0_i32_1 = arith.constant 0 : i32
    return %c0_i32, %c0_i32_0 : i32, i32
  }
  func.func @transform_1(%arg0: i32) -> (i32, i32, i32) {
    %c0_i32 = arith.constant 0 : i32
    %c0_i32_0 = arith.constant 0 : i32
    %c0_i32_1 = arith.constant 0 : i32
    return %arg0, %c0_i32, %c0_i32_0 : i32, i32, i32
  }
  func.func @transform_2(%arg0: i32) -> (i32, i32) {
    %c0_i32 = arith.constant 0 : i32
    %c0_i32_0 = arith.constant 0 : i32
    %c0_i32_1 = arith.constant 0 : i32
    return %c0_i32, %c0_i32_0 : i32, i32
  }
  func.func @transform_3(%arg0: i32) -> (i32, i32) {
    %c0_i32 = arith.constant 0 : i32
    %c0_i32_0 = arith.constant 0 : i32
    %c0_i32_1 = arith.constant 0 : i32
    return %c0_i32, %c0_i32_0 : i32, i32
  }
  func.func @transform_4(%arg0: i32) -> (i32, i32) {
    %c0_i32 = arith.constant 0 : i32
    %c0_i32_0 = arith.constant 0 : i32
    %c0_i32_1 = arith.constant 0 : i32
    return %c0_i32, %c0_i32_0 : i32, i32
  }
  func.func @transform_5(%arg0: i32) -> (i32, i32) {
    %c0_i32 = arith.constant 0 : i32
    %c0_i32_0 = arith.constant 0 : i32
    %c0_i32_1 = arith.constant 0 : i32
    return %c0_i32, %c0_i32_0 : i32, i32
  }
  func.func @transform_6(%arg0: i32) -> (i32, i32, i32) {
    %c0_i32 = arith.constant 0 : i32
    %c0_i32_0 = arith.constant 0 : i32
    %c0_i32_1 = arith.constant 0 : i32
    return %arg0, %c0_i32, %c0_i32_0 : i32, i32, i32
  }
}

</mosaic_0001>

<bundles_post_ra>
// kernel: _lambda_.1
= control target key start
LH: loop header
LB: loop body
LE: loop exit
PB: predicated region body
PF: predicated region fallthrough
CT: control target
= control target key end

     0   :  { %v23_v2 = vlaneseq  ;;  %s3803_s25 = smov 17   ;;  %v3804_v5 = vmov 1.0   ;;  %s3805_s26 = smov 16   ;;  %v5663_v10 = vmov 0.0   ;;  %vm549_vm9 = vcmask 1044480   ;;  %s5656_s1 = inlined_call_operand.vmem [shape: f32[1,4,512], index: 1, kind: input, shape index: {}]   ;;  %s5657_s0 = inlined_call_operand.vmem [shape: f32[9,512], index: 0, kind: input, shape index: {}]   ;;  %s5658_s2 = inlined_call_operand.vmem [shape: f32[16,37], index: 2, kind: input, shape index: {}]   ;;  %s5659_s3 = inlined_call_operand.vmem [shape: f32[16,181], index: 3, kind: input, shape index: {}]   ;;  %s5660_s4 = inlined_call_operand.vmem [shape: f32[16,325], index: 4, kind: input, shape index: {}]   ;;  %s5661_s5 = inlined_call_operand.vmem [shape: f32[4,53], index: 5, kind: input, shape index: {}]   ;;  %s5662_s6 = inlined_call_operand.vmem [shape: f32[1,4,512], index: 6, kind: output, shape index: {}]  }
   0x1   :  { %v32_v0 = vld [vmem:[%s5656_s1 + $0x8] sm:$0xff]  ;;  %v31_v1 = vld [vmem:[%s5656_s1] sm:$0xff]  ;;  %s3806_s27 = smov 15   ;;  %s3807_s28 = smov 1   ;;  %626 = vmatprep.mubr.f32.mxu0 %v5663_v10  ;;  %703 = vmatprep.mubr.f32.mxu1 %v5663_v10  ;;  %vm542_vm10 = vcmask 302080   ;;  %vm1660_vm11 = vcmask 433152  }
   0x2   :  { %55 = vrot.lane.b32.xlu1 %v32_v0, %s3803_s25  ;;  %51 = vrot.lane.b32.xlu0 %v31_v1, %s3803_s25  ;;  %v3856_v3 = vcombine.high %v32_v0, %v32_v0  ;;  %v3858_v4 = vcombine.high %v31_v1, %v31_v1  ;;  %vm25_vm0 = vcmp.lt.s32.totalorder %v23_v2, 512  ;;  %v37_v6 = vrot.slane %v31_v1, 7  ;;  %s3808_s29 = smov 127   ;;  %s3809_s30 = smov 113  }
   0x3   :  { %27 = vst.msk [vmem:[#allocation2] ss:$8 sm:$0xf] %vm25_vm0, %v3804_v5  ;;  %29 = vst.msk [vmem:[#allocation3] ss:$8 sm:$0xf] %vm25_vm0, %v3804_v5 }
   0x4   :  { %5713 = vst [vmem:[#allocation4_spill] sm:$0xff] %v3856_v3  ;;  %5714 = vst [vmem:[#allocation5_spill] sm:$0xff] %v3858_v4  ;;  %v38_v7 = vrot.slane %v3858_v4, 7  ;;  %v40_v8 = vrot.slane %v3856_v3, 7  ;;  %v39_v9 = vrot.slane %v32_v0, 7  ;;  %s3810_s7 = smov 112  }
   0x5   :  { %284 = vst [vmem:[#allocation2 + $0x40] sm:$0x1e] %v37_v6  ;;  %45 = vst [vmem:[#allocation3] sm:$0x1e] %v37_v6  ;;  %s3811_s8 = smov 111   ;;  %v69_v11 = vshrl.u32 %v23_v2, 7 }
   0x6   :  { %57 = vrot.lane.b32.xlu1 %v3856_v3, %s3803_s25  ;;  %53 = vrot.lane.b32.xlu0 %v3858_v4, %s3803_s25  ;;  %285 = vst [vmem:[#allocation2 + $0x48] sm:$0x1e] %v38_v7  ;;  %46 = vst [vmem:[#allocation3 + $0x8] sm:$0x1e] %v38_v7  ;;  %v3913_v12 = vand.u32 127, %v23_v2  ;;  %vm2851_vm12 = vcmask 564224  }
   0x7   :  { %287 = vst [vmem:[#allocation2 + $0x58] sm:$0x1e] %v40_v8  ;;  %48 = vst [vmem:[#allocation3 + $0x18] sm:$0x1e] %v40_v8  ;;  %v3915_v13 = vsub.s32 0, %v69_v11  ;;  %v3917_v14 = vsub.s32 3, %v69_v11 }
   0x8   :  { %286 = vst [vmem:[#allocation2 + $0x50] sm:$0x1e] %v39_v9  ;;  %47 = vst [vmem:[#allocation3 + $0x10] sm:$0x1e] %v39_v9  ;;  %v3919_v15 = vsub.s32 1, %v69_v11  ;;  %v3921_v16 = vsub.s32 2, %v69_v11 }
   0x9   :  { %5715 = vst [vmem:[#allocation6_spill] sm:$0xff] %v3915_v13  ;;  %5716 = vst [vmem:[#allocation7_spill] sm:$0xff] %v3917_v14  ;;  %v66_v17 = vld [vmem:[%s5657_s0] ss:$8 sm:$0xf]  ;;  %vm61_vm1 = vcmp.lt.s32.totalorder %v3913_v12, 17 }
   0xa   :  { %110 = vrot.lane.b32.xlu1 %v3858_v4, %s3805_s26  ;;  %108 = vrot.lane.b32.xlu0 %v31_v1, %s3805_s26  ;;  %v3438_v20 = vld [vmem:[%s5657_s0 + $0x1] ss:$8 sm:$0xf]  ;;  %v71_v21 = vrot.slane %v66_v17, %v3915_v13  ;;  %v83_v22 = vrot.slane %v66_v17, %v3917_v14  ;;  %v75_v23 = vrot.slane %v66_v17, %v3919_v15  ;;  %vm116_vm2 = vcmp.lt.s32.totalorder %v3913_v12, 16 }
   0xb   :  { %v79_v24 = vrot.slane %v66_v17, %v3921_v16  ;;  %v131_v27 = vrot.slane %v3438_v20, %v3919_v15  ;;  %v127_v44 = vrot.slane %v3438_v20, %v3915_v13  ;;  %v135_v45 = vrot.slane %v3438_v20, %v3921_v16  ;;  %v3439_v47 = vld [vmem:[%s5657_s0 + $0x2] ss:$8 sm:$0xf]  ;;  %v3440_v6 = vld [vmem:[%s5657_s0 + $0x3] ss:$8 sm:$0xf] }
   0xc   :  { %v139_v46 = vrot.slane %v3438_v20, %v3917_v14  ;;  %vm176_vm3 = vcmp.lt.s32.totalorder %v3913_v12, 15  ;;  %v191_v57 = vrot.slane %v3439_v47, %v3919_v15  ;;  %v195_v2 = vrot.slane %v3439_v47, %v3921_v16 }
   0xd   :  { %v199_v5 = vrot.slane %v3439_v47, %v3917_v14  ;;  %vm232_vm4 = vcmp.lt.s32.totalorder %v3913_v12, 1  ;;  %vm296_vm5 = vcmp.lt.s32.totalorder %v3913_v12, 127  ;;  %vm356_vm6 = vcmp.lt.s32.totalorder %v3913_v12, 113 }
   0xe   :  { %114 = vrot.lane.b32.xlu1 %v3856_v3, %s3805_s26  ;;  %112 = vrot.lane.b32.xlu0 %v32_v0, %s3805_s26  ;;  %vm412_vm7 = vcmp.lt.s32.totalorder %v3913_v12, 112  ;;  %vm472_vm8 = vcmp.lt.s32.totalorder %v3913_v12, 111 }
  0x12   :  { %170 = vrot.lane.b32.xlu1 %v3858_v4, %s3806_s27  ;;  %168 = vrot.lane.b32.xlu0 %v31_v1, %s3806_s27 }
  0x16   :  { %174 = vrot.lane.b32.xlu1 %v3856_v3, %s3806_s27  ;;  %172 = vrot.lane.b32.xlu0 %v32_v0, %s3806_s27 }
  0x1a   :  { %226 = vrot.lane.b32.xlu1 %v3858_v4, %s3807_s28  ;;  %224 = vrot.lane.b32.xlu0 %v31_v1, %s3807_s28 }
  0x1e   :  { %230 = vrot.lane.b32.xlu1 %v3856_v3, %s3807_s28  ;;  %228 = vrot.lane.b32.xlu0 %v32_v0, %s3807_s28 }
  0x22   :  { %290 = vrot.lane.b32.xlu1 %v3858_v4, %s3808_s29  ;;  %288 = vrot.lane.b32.xlu0 %v31_v1, %s3808_s29 }
  0x26   :  { %294 = vrot.lane.b32.xlu1 %v3856_v3, %s3808_s29  ;;  %292 = vrot.lane.b32.xlu0 %v32_v0, %s3808_s29 }
  0x2a   :  { %350 = vrot.lane.b32.xlu1 %v3858_v4, %s3809_s30  ;;  %348 = vrot.lane.b32.xlu0 %v31_v1, %s3809_s30 }
  0x2e   :  { %354 = vrot.lane.b32.xlu1 %v3856_v3, %s3809_s30  ;;  %352 = vrot.lane.b32.xlu0 %v32_v0, %s3809_s30 }
  0x32   :  { %406 = vrot.lane.b32.xlu1 %v3858_v4, %s3810_s7  ;;  %404 = vrot.lane.b32.xlu0 %v31_v1, %s3810_s7 }
  0x36   :  { %410 = vrot.lane.b32.xlu1 %v3856_v3, %s3810_s7  ;;  %408 = vrot.lane.b32.xlu0 %v32_v0, %s3810_s7 }
  0x3a   :  { %466 = vrot.lane.b32.xlu1 %v3858_v4, %s3811_s8  ;;  %464 = vrot.lane.b32.xlu0 %v31_v1, %s3811_s8  ;;  %v187_v1 = vrot.slane %v3439_v47, %v3915_v13 }
  0x3e   :  { %470 = vrot.lane.b32.xlu1 %v3856_v3, %s3811_s8  ;;  %468 = vrot.lane.b32.xlu0 %v32_v0, %s3811_s8 }
  0x74   :  { %v56_v18 = vpop.permute.xlu1 %55  ;;  %v52_v19 = vpop.permute.xlu0 %51 }
  0x78   :  { %v58_v25 = vpop.permute.xlu1 %57  ;;  %v54_v26 = vpop.permute.xlu0 %53 }
  0x79   :  { %v62_v28 = vsel %vm61_vm1, %v56_v18, %v58_v25  ;;  %v65_v29 = vsel %vm61_vm1, %v58_v25, %v52_v19  ;;  %v63_v30 = vsel %vm61_vm1, %v54_v26, %v56_v18  ;;  %v64_v31 = vsel %vm61_vm1, %v52_v19, %v54_v26 }
  0x7a   :  { %v88_v32 = vmul.f32 %v71_v21, %v65_v29  ;;  %v91_v33 = vmul.f32 %v83_v22, %v62_v28  ;;  %v89_v34 = vmul.f32 %v75_v23, %v64_v31  ;;  %v90_v35 = vmul.f32 %v79_v24, %v63_v30 }
  0x7b   :  { %v247_v22 = vrot.slane %v3440_v6, %v3919_v15  ;;  %v243_v30 = vrot.slane %v3440_v6, %v3915_v13  ;;  %v251_v31 = vrot.slane %v3440_v6, %v3921_v16 }
  0x7c   :  { %v96_v36 = vrot.slane %v88_v32, 7  ;;  %v99_v37 = vrot.slane %v91_v33, 7  ;;  %v97_v38 = vrot.slane %v89_v34, 7  ;;  %v98_v39 = vrot.slane %v90_v35, 7  ;;  %v111_v40 = vpop.permute.xlu1 %110  ;;  %v109_v41 = vpop.permute.xlu0 %108 }
  0x7d   :  { %v119_v42 = vsel %vm116_vm2, %v109_v41, %v111_v40  ;;  %v255_v32 = vrot.slane %v3440_v6, %v3917_v14  ;;  %v3441_v33 = vld [vmem:[%s5657_s0 + $0x5] ss:$8 sm:$0xf] }
  0x7e   :  { %104 = vst [vmem:[#allocation2] sm:$0x1e] %v96_v36  ;;  %107 = vst [vmem:[#allocation2 + $0x18] sm:$0x1e] %v99_v37  ;;  %v145_v43 = vmul.f32 %v131_v27, %v119_v42 }
  0x7f   :  { %105 = vst [vmem:[#allocation2 + $0x8] sm:$0x1e] %v97_v38  ;;  %106 = vst [vmem:[#allocation2 + $0x10] sm:$0x1e] %v98_v39 }
  0x80   :  { %v153_v48 = vrot.slane %v145_v43, 3  ;;  %v115_v49 = vpop.permute.xlu1 %114  ;;  %v113_v50 = vpop.permute.xlu0 %112  ;;  %v307_v43 = vrot.slane %v3441_v33, %v3915_v13 }
  0x81   :  { %v120_v51 = vsel %vm116_vm2, %v115_v49, %v109_v41  ;;  %v117_v52 = vsel %vm116_vm2, %v113_v50, %v115_v49  ;;  %v118_v53 = vsel %vm116_vm2, %v111_v40, %v113_v50 }
  0x82   :  { %161 = vst [vmem:[#allocation2 + $0x28] ss:$-28 sps:$4 sm:$0xe1] %v153_v48   ;;  %v144_v54 = vmul.f32 %v127_v44, %v120_v51  ;;  %v146_v55 = vmul.f32 %v135_v45, %v118_v53  ;;  %v147_v56 = vmul.f32 %v139_v46, %v117_v52  ;;  %v319_v51 = vrot.slane %v3441_v33, %v3917_v14 }
  0x83   :  { %v311_v52 = vrot.slane %v3441_v33, %v3919_v15  ;;  %v315_v53 = vrot.slane %v3441_v33, %v3921_v16 }
  0x84   :  { %v152_v58 = vrot.slane %v144_v54, 3  ;;  %v154_v59 = vrot.slane %v146_v55, 3  ;;  %v155_v60 = vrot.slane %v147_v56, 3  ;;  %v171_v61 = vpop.permute.xlu1 %170  ;;  %v169_v62 = vpop.permute.xlu0 %168  ;;  %v3442_v54 = vld [vmem:[%s5657_s0 + $0x6] ss:$8 sm:$0xf] }
  0x85   :  { %v179_v63 = vsel %vm176_vm3, %v169_v62, %v171_v61 }
  0x86   :  { %160 = vst [vmem:[#allocation2 + $0x20] ss:$-28 sps:$4 sm:$0xe1] %v152_v58   ;;  %162 = vst [vmem:[#allocation2 + $0x30] ss:$-28 sps:$4 sm:$0xe1] %v154_v59   ;;  %v205_v0 = vmul.f32 %v191_v57, %v179_v63 }
  0x87   :  { %163 = vst [vmem:[#allocation2 + $0x38] ss:$-28 sps:$4 sm:$0xe1] %v155_v60  }
  0x88   :  { %v213_v7 = vrot.slane %v205_v0, 7  ;;  %v175_v8 = vpop.permute.xlu1 %174  ;;  %v173_v9 = vpop.permute.xlu0 %172 }
  0x89   :  { %v180_v11 = vsel %vm176_vm3, %v175_v8, %v169_v62  ;;  %v177_v17 = vsel %vm176_vm3, %v173_v9, %v175_v8  ;;  %v178_v18 = vsel %vm176_vm3, %v171_v61, %v173_v9  ;;  %v367_v61 = vrot.slane %v3442_v54, %v3915_v13  ;;  %v523_v62 = vld [vmem:[#allocation2 + $0x8] sm:$0xff] }
  0x8a   :  { %221 = vst [vmem:[#allocation2 + $0x28] sm:$0x1e] %v213_v7  ;;  %v204_v19 = vmul.f32 %v187_v1, %v180_v11  ;;  %v206_v20 = vmul.f32 %v195_v2, %v178_v18  ;;  %v207_v21 = vmul.f32 %v199_v5, %v177_v17 }
  0x8c   :  { %v212_v23 = vrot.slane %v204_v19, 7  ;;  %v214_v24 = vrot.slane %v206_v20, 7  ;;  %v215_v25 = vrot.slane %v207_v21, 7  ;;  %v227_v26 = vpop.permute.xlu1 %226  ;;  %v225_v27 = vpop.permute.xlu0 %224  ;;  %v379_v21 = vrot.slane %v3442_v54, %v3917_v14 }
  0x8d   :  { %v235_v28 = vsel %vm232_vm4, %v225_v27, %v227_v26  ;;  %v522_v17 = vld [vmem:[#allocation2] sm:$0xff]  ;;  %v524_v19 = vld [vmem:[#allocation2 + $0x10] sm:$0xff] }
  0x8e   :  { %220 = vst [vmem:[#allocation2 + $0x20] sm:$0x1e] %v212_v23  ;;  %222 = vst [vmem:[#allocation2 + $0x30] sm:$0x1e] %v214_v24  ;;  %v261_v29 = vmul.f32 %v247_v22, %v235_v28  ;;  %v525_v18 = vld [vmem:[#allocation2 + $0x18] sm:$0xff]  ;;  %v371_v22 = vrot.slane %v3442_v54, %v3919_v15  ;;  %v375_v23 = vrot.slane %v3442_v54, %v3921_v16 }
  0x8f   :  { %223 = vst [vmem:[#allocation2 + $0x38] sm:$0x1e] %v215_v25 }
  0x90   :  { %v269_v34 = vrot.slane %v261_v29, 3  ;;  %v231_v35 = vpop.permute.xlu1 %230  ;;  %v229_v36 = vpop.permute.xlu0 %228 }
  0x91   :  { %v236_v37 = vsel %vm232_vm4, %v231_v35, %v225_v27  ;;  %v233_v38 = vsel %vm232_vm4, %v229_v36, %v231_v35  ;;  %v234_v39 = vsel %vm232_vm4, %v227_v26, %v229_v36 }
  0x92   :  { %277 = vst [vmem:[#allocation2 + $0x48] ss:$-28 sps:$4 sm:$0xe1] %v269_v34   ;;  %v260_v40 = vmul.f32 %v243_v30, %v236_v37  ;;  %v262_v41 = vmul.f32 %v251_v31, %v234_v39  ;;  %v263_v42 = vmul.f32 %v255_v32, %v233_v38  ;;  %v3443_v31 = vld [vmem:[%s5657_s0 + $0x7] ss:$8 sm:$0xf] }
  0x94   :  { %v268_v44 = vrot.slane %v260_v40, 3  ;;  %v270_v45 = vrot.slane %v262_v41, 3  ;;  %v271_v46 = vrot.slane %v263_v42, 3  ;;  %v291_v47 = vpop.permute.xlu1 %290  ;;  %v289_v48 = vpop.permute.xlu0 %288  ;;  %v423_v41 = vrot.slane %v3443_v31, %v3915_v13 }
  0x95   :  { %v299_v49 = vsel %vm296_vm5, %v289_v48, %v291_v47 }
  0x96   :  { %276 = vst [vmem:[#allocation2 + $0x40] ss:$-28 sps:$4 sm:$0xe1] %v268_v44   ;;  %278 = vst [vmem:[#allocation2 + $0x50] ss:$-28 sps:$4 sm:$0xe1] %v270_v45   ;;  %v324_v50 = vmul.f32 %v307_v43, %v299_v49  ;;  %v435_v49 = vrot.slane %v3443_v31, %v3917_v14 }
  0x97   :  { %279 = vst [vmem:[#allocation2 + $0x58] ss:$-28 sps:$4 sm:$0xe1] %v271_v46  }
  0x98   :  { %v332_v55 = vrot.slane %v324_v50, 3  ;;  %v295_v56 = vpop.permute.xlu1 %294  ;;  %v293_v57 = vpop.permute.xlu0 %292  ;;  %v427_v50 = vrot.slane %v3443_v31, %v3919_v15 }
  0x99   :  { %v300_v58 = vsel %vm296_vm5, %v295_v56, %v289_v48  ;;  %v297_v59 = vsel %vm296_vm5, %v293_v57, %v295_v56  ;;  %v298_v60 = vsel %vm296_vm5, %v291_v47, %v293_v57  ;;  %v527_v63 = vld [vmem:[#allocation2 + $0x28] sm:$0xff] }
  0x9a   :  { %340 = vst [vmem:[#allocation2 + $0x60] ss:$-28 sps:$4 sm:$0xe1] %v332_v55   ;;  %v327_v0 = vmul.f32 %v319_v51, %v300_v58  ;;  %v325_v1 = vmul.f32 %v311_v52, %v298_v60  ;;  %v326_v2 = vmul.f32 %v315_v53, %v297_v59  ;;  %v4008_v5 = vpack.c.bf16 %v527_v63, %v523_v62  ;;  %v3444_v52 = vld [vmem:[%s5657_s0 + $0x20] ss:$8 sm:$0xf] }
  0x9b   :  { %v431_v51 = vrot.slane %v3443_v31, %v3921_v16  ;;  %v483_v62 = vrot.slane %v3444_v52, %v3915_v13 }
  0x9c   :  { %v335_v6 = vrot.slane %v327_v0, 3  ;;  %v333_v7 = vrot.slane %v325_v1, 3  ;;  %v334_v8 = vrot.slane %v326_v2, 3  ;;  %v351_v9 = vpop.permute.xlu1 %350  ;;  %v349_v11 = vpop.permute.xlu0 %348  ;;  %3490 = vmatprep.subr.bf16.mxu0 %v4008_v5 }
  0x9d   :  { %v359_v20 = vsel %vm356_vm6, %v349_v11, %v351_v9  ;;  %v526_v24 = vld [vmem:[#allocation2 + $0x20] sm:$0xff]  ;;  %v528_v26 = vld [vmem:[#allocation2 + $0x30] sm:$0xff] }
  0x9e   :  { %v529_v25 = vld [vmem:[#allocation2 + $0x38] sm:$0xff]  ;;  %343 = vst [vmem:[#allocation2 + $0x78] ss:$-28 sps:$4 sm:$0xe1] %v335_v6   ;;  %v384_v27 = vmul.f32 %v367_v61, %v359_v20  ;;  %v4016_v28 = vpack.c.bf16 %v526_v24, %v522_v17  ;;  %v4020_v30 = vpack.c.bf16 %v528_v26, %v524_v19  ;;  %v491_v17 = vrot.slane %v3444_v52, %v3921_v16 }
  0x9f   :  { %341 = vst [vmem:[#allocation2 + $0x68] ss:$-28 sps:$4 sm:$0xe1] %v333_v7   ;;  %342 = vst [vmem:[#allocation2 + $0x70] ss:$-28 sps:$4 sm:$0xe1] %v334_v8   ;;  %v4018_v29 = vpack.c.bf16 %v529_v25, %v525_v18 }
  0xa0   :  { %v392_v32 = vrot.slane %v384_v27, 7  ;;  %v355_v33 = vpop.permute.xlu1 %354  ;;  %v353_v34 = vpop.permute.xlu0 %352  ;;  %3492 = vmatpush1.bf16.msra.mxu0 %v4016_v28 }
  0xa1   :  { %3498 = vmatprep.subr.bf16.mxu1 %v4018_v29  ;;  %v360_v35 = vsel %vm356_vm6, %v355_v33, %v349_v11  ;;  %v357_v36 = vsel %vm356_vm6, %v353_v34, %v355_v33  ;;  %v358_v37 = vsel %vm356_vm6, %v351_v9, %v353_v34  ;;  %v495_v9 = vrot.slane %v3444_v52, %v3917_v14 }
  0xa2   :  { %3500 = vmatpush1.bf16.msra.mxu1 %v4020_v30  ;;  %400 = vst [vmem:[#allocation2 + $0x60] sm:$0x1e] %v392_v32  ;;  %v387_v38 = vmul.f32 %v379_v21, %v360_v35  ;;  %v385_v39 = vmul.f32 %v371_v22, %v358_v37  ;;  %v386_v40 = vmul.f32 %v375_v23, %v357_v36 }
  0xa3   :  { %v487_v11 = vrot.slane %v3444_v52, %v3919_v15 }
  0xa4   :  { %v395_v42 = vrot.slane %v387_v38, 7  ;;  %v393_v43 = vrot.slane %v385_v39, 7  ;;  %v394_v44 = vrot.slane %v386_v40, 7  ;;  %v407_v45 = vpop.permute.xlu1 %406  ;;  %v405_v46 = vpop.permute.xlu0 %404 }
  0xa5   :  { %v415_v47 = vsel %vm412_vm7, %v405_v46, %v407_v45  ;;  %v533_v34 = vld [vmem:[#allocation2 + $0x58] sm:$0xff] }
  0xa6   :  { %403 = vst [vmem:[#allocation2 + $0x78] sm:$0x1e] %v395_v42  ;;  %401 = vst [vmem:[#allocation2 + $0x68] sm:$0x1e] %v393_v43  ;;  %v440_v48 = vmul.f32 %v423_v41, %v415_v47  ;;  %v531_v27 = vld [vmem:[#allocation2 + $0x48] sm:$0xff]  ;;  %v532_v36 = vld [vmem:[#allocation2 + $0x50] sm:$0xff] }
  0xa7   :  { %402 = vst [vmem:[#allocation2 + $0x70] sm:$0x1e] %v394_v44  ;;  %v530_v42 = vld [vmem:[#allocation2 + $0x40] sm:$0xff] }
  0xa8   :  { %v448_v53 = vrot.slane %v440_v48, 3  ;;  %v411_v54 = vpop.permute.xlu1 %410  ;;  %v409_v55 = vpop.permute.xlu0 %408 }
  0xa9   :  { %v416_v56 = vsel %vm412_vm7, %v411_v54, %v405_v46  ;;  %v413_v57 = vsel %vm412_vm7, %v409_v55, %v411_v54  ;;  %v414_v58 = vsel %vm412_vm7, %v407_v45, %v409_v55  ;;  %v520_v45 = vld [vmem:[%s5658_s2] sm:$0xff] }
  0xaa   :  { %456 = vst [vmem:[#allocation2 + $0x80] ss:$-28 sps:$4 sm:$0xe1] %v448_v53   ;;  %v443_v59 = vmul.f32 %v435_v49, %v416_v56  ;;  %v441_v60 = vmul.f32 %v427_v50, %v414_v58  ;;  %v442_v61 = vmul.f32 %v431_v51, %v413_v57  ;;  %v521_v50 = vld [vmem:[%s5658_s2 + $0x8] sm:$0xff] }
  0xac   :  { %v451_v63 = vrot.slane %v443_v59, 3  ;;  %v449_v0 = vrot.slane %v441_v60, 3  ;;  %v450_v1 = vrot.slane %v442_v61, 3  ;;  %v467_v2 = vpop.permute.xlu1 %466  ;;  %v465_v6 = vpop.permute.xlu0 %464 }
  0xad   :  { %v475_v7 = vsel %vm472_vm8, %v465_v6, %v467_v2 }
  0xae   :  { %459 = vst [vmem:[#allocation2 + $0x98] ss:$-28 sps:$4 sm:$0xe1] %v451_v63   ;;  %457 = vst [vmem:[#allocation2 + $0x88] ss:$-28 sps:$4 sm:$0xe1] %v449_v0   ;;  %v500_v8 = vmul.f32 %v483_v62, %v475_v7 }
  0xaf   :  { %458 = vst [vmem:[#allocation2 + $0x90] ss:$-28 sps:$4 sm:$0xe1] %v450_v1  }
  0xb0   :  { %v508_v18 = vrot.slane %v500_v8, 7  ;;  %v471_v19 = vpop.permute.xlu1 %470  ;;  %v469_v20 = vpop.permute.xlu0 %468 }
  0xb1   :  { %v476_v21 = vsel %vm472_vm8, %v471_v19, %v465_v6  ;;  %v473_v22 = vsel %vm472_vm8, %v469_v20, %v471_v19  ;;  %v474_v23 = vsel %vm472_vm8, %v467_v2, %v469_v20  ;;  %v534_v35 = vld [vmem:[#allocation2 + $0x60] sm:$0xff] }
  0xb2   :  { %516 = vst [vmem:[#allocation2 + $0x80] sm:$0x1e] %v508_v18  ;;  %v503_v24 = vmul.f32 %v495_v9, %v476_v21  ;;  %v501_v25 = vmul.f32 %v487_v11, %v474_v23  ;;  %v502_v26 = vmul.f32 %v491_v17, %v473_v22  ;;  %v3495_v44 = vpack.c.bf16 %v534_v35, %v530_v42 }
  0xb4   :  { %v511_v31 = vrot.slane %v503_v24, 7  ;;  %v509_v32 = vrot.slane %v501_v25, 7  ;;  %v510_v33 = vrot.slane %v502_v26, 7 }
  0xb5   :  { %v535_v37 = vld [vmem:[#allocation2 + $0x68] sm:$0xff]  ;;  %v537_v38 = vld [vmem:[#allocation2 + $0x78] sm:$0xff] }
  0xb6   :  { %v536_v39 = vld [vmem:[#allocation2 + $0x70] sm:$0xff]  ;;  %519 = vst [vmem:[#allocation2 + $0x98] sm:$0x1e] %v511_v31  ;;  %517 = vst [vmem:[#allocation2 + $0x88] sm:$0x1e] %v509_v32  ;;  %v3493_v40 = vpack.c.bf16 %v535_v37, %v531_v27  ;;  %v3501_v41 = vpack.c.bf16 %v537_v38, %v533_v34  ;;  %v1565_v31 = vld [vmem:[%s5659_s3 + $0x8] sm:$0xff] }
  0xb7   :  { %518 = vst [vmem:[#allocation2 + $0x90] sm:$0x1e] %v510_v33  ;;  %v3503_v43 = vpack.c.bf16 %v536_v39, %v532_v36 }
  0xb8   :  { %3494 = vmatprep.subr.bf16.mxu0 %v3493_v40  ;;  %3502 = vmatprep.subr.bf16.mxu1 %v3501_v41 }
  0xb9   :  { %3496 = vmatpush1.bf16.msra.mxu0 %v3495_v44  ;;  %3504 = vmatpush1.bf16.msra.mxu1 %v3503_v43  ;;  %v538_v49 = vld [vmem:[#allocation2 + $0x80] sm:$0x1f] }
  0xbd   :  { %v539_v46 = vld [vmem:[#allocation2 + $0x88] sm:$0x1f]  ;;  %v541_v47 = vld [vmem:[#allocation2 + $0x98] sm:$0x1f] }
  0xbe   :  { %v540_v48 = vld [vmem:[#allocation2 + $0x90] sm:$0x1f]  ;;  %3445 = vmatprep.subr.msk.mxu0 %vm549_vm9, %v539_v46  ;;  %3449 = vmatprep.subr.msk.mxu1 %vm549_vm9, %v541_v47 }
  0xbf   :  { %3446 = vmatpush1.msk.msra.mxu0 %vm549_vm9, %v538_v49  ;;  %3450 = vmatpush1.msk.msra.mxu1 %vm549_vm9, %v540_v48 }
  0xc0   :  { %3447 = vmatmul.mubr.msk.f32.vlgmr.msra.gmra.mrb[0].mxu0 %vm542_vm10, %v520_v45  ;;  %3451 = vmatmul.mubr.msk.f32.vlgmr.msra.gmra.mrb[0].mxu1 %vm542_vm10, %v520_v45 }
  0xc1   :  { %3506 = vmatprep.subr.bf16.mxu0 %v4008_v5  ;;  %3550 = vmatprep.subr.bf16.mxu1 %v4018_v29 }
  0xc2   :  { %3508 = vmatpush1.bf16.msra.mxu0 %v4016_v28  ;;  %3552 = vmatpush1.bf16.msra.mxu1 %v4020_v30 }
  0xc3   :  { %3510 = vmatprep.subr.bf16.mxu0 %v3493_v40  ;;  %3554 = vmatprep.subr.bf16.mxu1 %v3501_v41 }
  0xc4   :  { %632 = vmatprep.mubr.f32.mxu0 %v5663_v10  ;;  %709 = vmatprep.mubr.f32.mxu1 %v5663_v10 }
  0xc5   :  { %3448 = vmatmul.mubr.msk.f32.gmra.mrb[2].mxu0 %vm542_vm10, %v521_v50  ;;  %3452 = vmatmul.mubr.msk.f32.gmra.mrb[2].mxu1 %vm542_vm10, %v521_v50 }
  0xc6   :  { %3512 = vmatpush1.bf16.msra.mxu0 %v3495_v44  ;;  %3556 = vmatpush1.bf16.msra.mxu1 %v3503_v43 }
  0xc7   :  { %3462 = vmatprep.mubr.msk.f32.mxu0 %vm1660_vm11, %v1565_v31  ;;  %3466 = vmatprep.mubr.msk.f32.mxu1 %vm1660_vm11, %v1565_v31  ;;  %v3457_v31 = vld [vmem:[%s5657_s0 + $0x6] ss:$8 sm:$0xf] }
 0x193   :  { %v628_v5 = vpop.f32.mrb[0].mxu0  ;;  %v705_v28 = vpop.f32.mrb[0].mxu1 }
 0x194   :  { %v4083_v29 = vmax.f32 %v628_v5, 0.0  ;;  %v630_v30 = vpop.f32.mrb[1].mxu0  ;;  %v4085_v51 = vmax.f32 %v705_v28, 0.0  ;;  %v707_v52 = vpop.f32.mrb[1].mxu1 }
 0x195   :  { %v4087_v53 = vmax.f32 %v630_v30, 0.0  ;;  %v4089_v54 = vmax.f32 %v707_v52, 0.0  ;;  %v3453_v30 = vld [vmem:[%s5657_s0 + $0x1] ss:$8 sm:$0xf] }
 0x196   :  { %v732_v55 = vrot.slane %v4083_v29, 3  ;;  %v734_v56 = vrot.slane %v4085_v51, 3  ;;  %768 = vrot.lane.b32.xlu0 %v4083_v29, %s3803_s25  ;;  %v3454_v52 = vld [vmem:[%s5657_s0 + $0x2] ss:$8 sm:$0xf] }
 0x197   :  { %v733_v57 = vrot.slane %v4087_v53, 3  ;;  %v735_v58 = vrot.slane %v4089_v54, 3 }
 0x198   :  { %756 = vst [vmem:[#allocation3] sm:$0xe0] %v732_v55  ;;  %1160 = vst [vmem:[#allocation2 + $0x180] sm:$0xe0] %v732_v55  ;;  %v634_v59 = vpop.f32.mrb[2].mxu0  ;;  %v711_v60 = vpop.f32.mrb[2].mxu1 }
 0x199   :  { %758 = vst [vmem:[#allocation3 + $0x10] sm:$0xe0] %v734_v56  ;;  %1162 = vst [vmem:[#allocation2 + $0x190] sm:$0xe0] %v734_v56  ;;  %v720_v61 = vmax.f32 %v634_v59, 0.0  ;;  %v722_v62 = vmax.f32 %v711_v60, 0.0  ;;  %v4317_v59 = vrot.slane %v3453_v30, %v3919_v15  ;;  %v4320_v60 = vrot.slane %v3453_v30, %v3921_v16 }
 0x19a   :  { %757 = vst [vmem:[#allocation3 + $0x8] sm:$0xe0] %v733_v57  ;;  %1161 = vst [vmem:[#allocation2 + $0x188] sm:$0xe0] %v733_v57  ;;  %v636_v63 = vpop.f32.mrb[3].mxu0  ;;  %v713_v0 = vpop.f32.mrb[3].mxu1  ;;  %776 = vrot.lane.b32.xlu0 %v4085_v51, %s3803_s25 }
 0x19b   :  { %759 = vst [vmem:[#allocation3 + $0x18] sm:$0xe0] %v735_v58  ;;  %1163 = vst [vmem:[#allocation2 + $0x198] sm:$0xe0] %v735_v58  ;;  %v4097_v1 = vmax.f32 %v636_v63, 0.0  ;;  %v4099_v2 = vmax.f32 %v713_v0, 0.0  ;;  %770 = vrot.lane.b32.xlu1 %v720_v61, %s3803_s25  ;;  %v4329_v63 = vrot.slane %v3454_v52, %v3919_v15  ;;  %v4332_v0 = vrot.slane %v3454_v52, %v3921_v16 }
 0x19c   :  { %v736_v6 = vrot.slane %v720_v61, 3  ;;  %v740_v7 = vrot.slane %v722_v62, 3 }
 0x19d   :  { %v738_v8 = vrot.slane %v4097_v1, 3  ;;  %v742_v9 = vrot.slane %v4099_v2, 3 }
 0x19e   :  { %764 = vst [vmem:[#allocation3 + $0x40] sm:$0x1f] %v736_v6  ;;  %1168 = vst [vmem:[#allocation2 + $0x1c0] sm:$0x1f] %v736_v6  ;;  %v4107_v11 = vsel %vm549_vm9, %v732_v55, %v736_v6  ;;  %v4110_v17 = vsel %vm549_vm9, %v734_v56, %v740_v7  ;;  %866 = vrot.lane.b32.xlu0 %v4083_v29, %s3805_s26  ;;  %v4338_v6 = vrot.slane %v3454_v52, %v3915_v13 }
 0x19f   :  { %766 = vst [vmem:[#allocation3 + $0x50] sm:$0x1f] %v740_v7  ;;  %1170 = vst [vmem:[#allocation2 + $0x1d0] sm:$0x1f] %v740_v7  ;;  %v4115_v18 = vsel %vm549_vm9, %v733_v57, %v738_v8  ;;  %v4118_v19 = vsel %vm549_vm9, %v735_v58, %v742_v9  ;;  %778 = vrot.lane.b32.xlu1 %v722_v62, %s3803_s25  ;;  %v4341_v7 = vrot.slane %v3454_v52, %v3917_v14 }
 0x1a0   :  { %5717 = vst [vmem:[#allocation8_spill] sm:$0xff] %v4107_v11  ;;  %5718 = vst [vmem:[#allocation9_spill] sm:$0xff] %v4110_v17  ;;  %v3455_v56 = vld [vmem:[%s5657_s0 + $0x3] ss:$8 sm:$0xf] }
 0x1a1   :  { %765 = vst [vmem:[#allocation3 + $0x48] sm:$0x1f] %v738_v8  ;;  %1169 = vst [vmem:[#allocation2 + $0x1c8] sm:$0x1f] %v738_v8  ;;  %v4344_v8 = vrot.slane %v3455_v56, %v3919_v15  ;;  %v4361_v10 = vrot.slane %v3455_v56, %v3915_v13  ;;  %v4364_v3 = vrot.slane %v3455_v56, %v3917_v14 }
 0x1a2   :  { %767 = vst [vmem:[#allocation3 + $0x58] sm:$0x1f] %v742_v9  ;;  %1171 = vst [vmem:[#allocation2 + $0x1d8] sm:$0x1f] %v742_v9  ;;  %874 = vrot.lane.b32.xlu0 %v4085_v51, %s3805_s26  ;;  %v4347_v9 = vrot.slane %v3455_v56, %v3921_v16  ;;  %v4382_v56 = vrot.slane %v3457_v31, %v3915_v13 }
 0x1a3   :  { %5719 = vst [vmem:[#allocation10_spill] sm:$0xff] %v4115_v18  ;;  %5720 = vst [vmem:[#allocation11_spill] sm:$0xff] %v4118_v19  ;;  %868 = vrot.lane.b32.xlu1 %v720_v61, %s3805_s26 }
 0x1a4   :  { %760 = vst [vmem:[#allocation3 + $0x20] sm:$0xff] %v4107_v11  ;;  %762 = vst [vmem:[#allocation3 + $0x30] sm:$0xff] %v4110_v17  ;;  %v4388_v11 = vrot.slane %v3457_v31, %v3921_v16 }
 0x1a5   :  { %761 = vst [vmem:[#allocation3 + $0x28] sm:$0xff] %v4115_v18  ;;  %763 = vst [vmem:[#allocation3 + $0x38] sm:$0xff] %v4118_v19 }
 0x1a6   :  { %964 = vrot.lane.b32.xlu0 %v4083_v29, %s3806_s27  ;;  %5732 = vst [vmem:[#allocation23_spill] sm:$0xff] %v4382_v56  ;;  %5734 = vst [vmem:[#allocation25_spill] sm:$0xff] %v4388_v11 }
 0x1a7   :  { %876 = vrot.lane.b32.xlu1 %v722_v62, %s3805_s26 }
 0x1aa   :  { %972 = vrot.lane.b32.xlu0 %v4085_v51, %s3806_s27 }
 0x1ab   :  { %966 = vrot.lane.b32.xlu1 %v720_v61, %s3806_s27 }
 0x1ae   :  { %1062 = vrot.lane.b32.xlu0 %v4083_v29, %s3807_s28 }
 0x1af   :  { %974 = vrot.lane.b32.xlu1 %v722_v62, %s3806_s27 }
 0x1b2   :  { %1070 = vrot.lane.b32.xlu0 %v4085_v51, %s3807_s28 }
 0x1b3   :  { %1064 = vrot.lane.b32.xlu1 %v720_v61, %s3807_s28 }
 0x1b6   :  { %1172 = vrot.lane.b32.xlu0 %v4083_v29, %s3808_s29 }
 0x1b7   :  { %1072 = vrot.lane.b32.xlu1 %v722_v62, %s3807_s28 }
 0x1ba   :  { %1180 = vrot.lane.b32.xlu0 %v4085_v51, %s3808_s29 }
 0x1bb   :  { %1174 = vrot.lane.b32.xlu1 %v720_v61, %s3808_s29 }
 0x1be   :  { %1270 = vrot.lane.b32.xlu0 %v4083_v29, %s3809_s30 }
 0x1bf   :  { %1182 = vrot.lane.b32.xlu1 %v722_v62, %s3808_s29 }
 0x1c2   :  { %1278 = vrot.lane.b32.xlu0 %v4085_v51, %s3809_s30 }
 0x1c3   :  { %1272 = vrot.lane.b32.xlu1 %v720_v61, %s3809_s30 }
 0x1c6   :  { %1368 = vrot.lane.b32.xlu0 %v4083_v29, %s3810_s7 }
 0x1c7   :  { %1280 = vrot.lane.b32.xlu1 %v722_v62, %s3809_s30 }
 0x1ca   :  { %1376 = vrot.lane.b32.xlu0 %v4085_v51, %s3810_s7 }
 0x1cb   :  { %1370 = vrot.lane.b32.xlu1 %v720_v61, %s3810_s7 }
 0x1ce   :  { %1466 = vrot.lane.b32.xlu0 %v4083_v29, %s3811_s8  ;;  %v792_v29 = vld [vmem:[%s5657_s0] ss:$8 sm:$0xf] }
 0x1cf   :  { %1378 = vrot.lane.b32.xlu1 %v722_v62, %s3810_s7  ;;  %v805_v55 = vrot.slane %v792_v29, %v3921_v16  ;;  %v4311_v57 = vrot.slane %v792_v29, %v3915_v13  ;;  %v4314_v58 = vrot.slane %v792_v29, %v3917_v14 }
 0x1d2   :  { %1474 = vrot.lane.b32.xlu0 %v4085_v51, %s3811_s8 }
 0x1d3   :  { %1468 = vrot.lane.b32.xlu1 %v720_v61, %s3811_s8  ;;  %v4323_v61 = vrot.slane %v3453_v30, %v3915_v13 }
 0x1d6   :  { %772 = vrot.lane.b32.xlu0 %v4087_v53, %s3803_s25 }
 0x1d7   :  { %1476 = vrot.lane.b32.xlu1 %v722_v62, %s3811_s8  ;;  %v4326_v62 = vrot.slane %v3453_v30, %v3917_v14 }
 0x1da   :  { %780 = vrot.lane.b32.xlu0 %v4089_v54, %s3803_s25 }
 0x1db   :  { %774 = vrot.lane.b32.xlu1 %v4097_v1, %s3803_s25 }
 0x1de   :  { %870 = vrot.lane.b32.xlu0 %v4087_v53, %s3805_s26 }
 0x1df   :  { %782 = vrot.lane.b32.xlu1 %v4099_v2, %s3803_s25 }
 0x1e2   :  { %878 = vrot.lane.b32.xlu0 %v4089_v54, %s3805_s26 }
 0x1e3   :  { %872 = vrot.lane.b32.xlu1 %v4097_v1, %s3805_s26 }
 0x1e6   :  { %968 = vrot.lane.b32.xlu0 %v4087_v53, %s3806_s27 }
 0x1e7   :  { %880 = vrot.lane.b32.xlu1 %v4099_v2, %s3805_s26 }
 0x1ea   :  { %976 = vrot.lane.b32.xlu0 %v4089_v54, %s3806_s27 }
 0x1eb   :  { %970 = vrot.lane.b32.xlu1 %v4097_v1, %s3806_s27 }
 0x1ee   :  { %1066 = vrot.lane.b32.xlu0 %v4087_v53, %s3807_s28 }
 0x1ef   :  { %978 = vrot.lane.b32.xlu1 %v4099_v2, %s3806_s27 }
 0x1f2   :  { %1074 = vrot.lane.b32.xlu0 %v4089_v54, %s3807_s28 }
 0x1f3   :  { %1068 = vrot.lane.b32.xlu1 %v4097_v1, %s3807_s28 }
 0x1f6   :  { %1176 = vrot.lane.b32.xlu0 %v4087_v53, %s3808_s29 }
 0x1f7   :  { %1076 = vrot.lane.b32.xlu1 %v4099_v2, %s3807_s28 }
 0x1fa   :  { %1184 = vrot.lane.b32.xlu0 %v4089_v54, %s3808_s29 }
 0x1fb   :  { %1178 = vrot.lane.b32.xlu1 %v4097_v1, %s3808_s29 }
 0x1fe   :  { %1274 = vrot.lane.b32.xlu0 %v4087_v53, %s3809_s30 }
 0x1ff   :  { %1186 = vrot.lane.b32.xlu1 %v4099_v2, %s3808_s29 }
 0x202   :  { %1282 = vrot.lane.b32.xlu0 %v4089_v54, %s3809_s30 }
 0x203   :  { %1276 = vrot.lane.b32.xlu1 %v4097_v1, %s3809_s30 }
 0x206   :  { %1372 = vrot.lane.b32.xlu0 %v4087_v53, %s3810_s7 }
 0x207   :  { %1284 = vrot.lane.b32.xlu1 %v4099_v2, %s3809_s30 }
 0x208   :  { %v4215_v20 = vpop.permute.xlu0 %768 }
 0x20a   :  { %1380 = vrot.lane.b32.xlu0 %v4089_v54, %s3810_s7 }
 0x20b   :  { %1374 = vrot.lane.b32.xlu1 %v4097_v1, %s3810_s7 }
 0x20c   :  { %v4221_v21 = vpop.permute.xlu0 %776 }
 0x20d   :  { %v4223_v22 = vpop.permute.xlu1 %770 }
 0x20e   :  { %1470 = vrot.lane.b32.xlu0 %v4087_v53, %s3811_s8 }
 0x20f   :  { %1382 = vrot.lane.b32.xlu1 %v4099_v2, %s3810_s7 }
 0x210   :  { %v4229_v23 = vpop.permute.xlu0 %866 }
 0x211   :  { %v4231_v24 = vpop.permute.xlu1 %778 }
 0x212   :  { %1478 = vrot.lane.b32.xlu0 %v4089_v54, %s3811_s8  ;;  %v801_v54 = vrot.slane %v792_v29, %v3919_v15 }
 0x213   :  { %1472 = vrot.lane.b32.xlu1 %v4097_v1, %s3811_s8  ;;  %v3456_v1 = vld [vmem:[%s5657_s0 + $0x5] ss:$8 sm:$0xf] }
 0x214   :  { %v4237_v25 = vpop.permute.xlu0 %874  ;;  %v4379_v17 = vrot.slane %v3456_v1, %v3917_v14 }
 0x215   :  { %v4239_v26 = vpop.permute.xlu1 %868 }
 0x217   :  { %1480 = vrot.lane.b32.xlu1 %v4099_v2, %s3811_s8 }
 0x218   :  { %v4243_v27 = vpop.permute.xlu0 %964 }
 0x219   :  { %v4248_v32 = vpop.permute.xlu1 %876 }
 0x21c   :  { %v4252_v33 = vpop.permute.xlu0 %972 }
 0x21d   :  { %v4254_v34 = vpop.permute.xlu1 %966 }
 0x220   :  { %v4256_v35 = vpop.permute.xlu0 %1062 }
 0x221   :  { %v4258_v36 = vpop.permute.xlu1 %974 }
 0x224   :  { %v4260_v37 = vpop.permute.xlu0 %1070 }
 0x225   :  { %v4262_v38 = vpop.permute.xlu1 %1064 }
 0x228   :  { %v4264_v39 = vpop.permute.xlu0 %1172 }
 0x229   :  { %v4266_v40 = vpop.permute.xlu1 %1072 }
 0x22c   :  { %v4268_v41 = vpop.permute.xlu0 %1180 }
 0x22d   :  { %v4270_v42 = vpop.permute.xlu1 %1174 }
 0x230   :  { %v4272_v43 = vpop.permute.xlu0 %1270 }
 0x231   :  { %5721 = vst [vmem:[#allocation12_spill] sm:$0xff] %v4272_v43  ;;  %v4274_v44 = vpop.permute.xlu1 %1182 }
 0x234   :  { %v4276_v45 = vpop.permute.xlu0 %1278 }
 0x235   :  { %v4278_v46 = vpop.permute.xlu1 %1272 }
 0x236   :  { %5722 = vst [vmem:[#allocation13_spill] sm:$0xff] %v4278_v46 }
 0x238   :  { %v4280_v47 = vpop.permute.xlu0 %1368 }
 0x239   :  { %5723 = vst [vmem:[#allocation14_spill] sm:$0xff] %v4280_v47  ;;  %v4282_v48 = vpop.permute.xlu1 %1280  ;;  %v4391_v47 = vrot.slane %v3457_v31, %v3917_v14 }
 0x23a   :  { %5724 = vst [vmem:[#allocation15_spill] sm:$0xff] %v4282_v48 }
 0x23b   :  { %5735 = vst [vmem:[#allocation26_spill] sm:$0xff] %v4391_v47 }
 0x23c   :  { %v4284_v49 = vpop.permute.xlu0 %1376 }
 0x23d   :  { %5725 = vst [vmem:[#allocation16_spill] sm:$0xff] %v4284_v49  ;;  %v4286_v50 = vpop.permute.xlu1 %1370 }
 0x23e   :  { %5726 = vst [vmem:[#allocation17_spill] sm:$0xff] %v4286_v50 }
 0x240   :  { %v4288_v5 = vpop.permute.xlu0 %1466 }
 0x241   :  { %5727 = vst [vmem:[#allocation18_spill] sm:$0xff] %v4288_v5  ;;  %v4290_v28 = vpop.permute.xlu1 %1378  ;;  %v4367_v5 = vrot.slane %v3456_v1, %v3915_v13 }
 0x242   :  { %5728 = vst [vmem:[#allocation19_spill] sm:$0xff] %v4290_v28 }
 0x244   :  { %v4298_v51 = vpop.permute.xlu0 %1474 }
 0x245   :  { %5729 = vst [vmem:[#allocation20_spill] sm:$0xff] %v4298_v51  ;;  %v4303_v53 = vpop.permute.xlu1 %1468  ;;  %v4370_v51 = vrot.slane %v3456_v1, %v3919_v15 }
 0x246   :  { %5730 = vst [vmem:[#allocation21_spill] sm:$0xff] %v4303_v53 }
 0x248   :  { %v773_v2 = vpop.permute.xlu0 %772 }
 0x249   :  { %v786_v29 = vsel %vm61_vm1, %v773_v2, %v4221_v21  ;;  %v788_v30 = vsel %vm61_vm1, %v4215_v20, %v773_v2  ;;  %v4358_v52 = vpop.permute.xlu1 %1476  ;;  %v3458_v2 = vld [vmem:[%s5657_s0 + $0x7] ss:$8 sm:$0xf] }
 0x24a   :  { %5731 = vst [vmem:[#allocation22_spill] sm:$0xff] %v4358_v52  ;;  %v815_v4 = vmul.f32 %v801_v54, %v788_v30  ;;  %v816_v53 = vmul.f32 %v805_v55, %v786_v29  ;;  %v4376_v52 = vrot.slane %v3456_v1, %v3921_v16  ;;  %v4385_v29 = vrot.slane %v3457_v31, %v3919_v15 }
 0x24b   :  { %v4400_v18 = vrot.slane %v3458_v2, %v3915_v13  ;;  %v4417_v46 = vrot.slane %v3458_v2, %v3921_v16  ;;  %v4420_v48 = vrot.slane %v3458_v2, %v3917_v14 }
 0x24c   :  { %5733 = vst [vmem:[#allocation24_spill] sm:$0xff] %v4385_v29  ;;  %v831_v30 = vrot.slane %v815_v4, 3  ;;  %v832_v50 = vrot.slane %v816_v53, 3  ;;  %v781_v28 = vpop.permute.xlu0 %780  ;;  %v4403_v4 = vrot.slane %v3458_v2, %v3919_v15  ;;  %v3459_v53 = vld [vmem:[%s5657_s0 + $0x20] ss:$8 sm:$0xf] }
 0x24d   :  { %v784_v1 = vsel %vm61_vm1, %v4221_v21, %v781_v28  ;;  %v790_v49 = vsel %vm61_vm1, %v781_v28, %v4215_v20  ;;  %v775_v19 = vpop.permute.xlu1 %774  ;;  %5736 = vst [vmem:[#allocation27_spill] sm:$0xff] %v4400_v18  ;;  %v4426_v29 = vrot.slane %v3459_v53, %v3919_v15 }
 0x24e   :  { %5737 = vst [vmem:[#allocation28_spill] sm:$0xff] %v4403_v4  ;;  %855 = vst [vmem:[#allocation2 + $0x88] sm:$0xe0] %v831_v30  ;;  %v814_v31 = vmul.f32 %v4311_v57, %v790_v49  ;;  %v817_v21 = vmul.f32 %v4314_v58, %v784_v1  ;;  %v787_v20 = vsel %vm61_vm1, %v775_v19, %v4231_v24 }
 0x24f   :  { %856 = vst [vmem:[#allocation2 + $0x90] sm:$0xe0] %v832_v50  ;;  %v789_v28 = vsel %vm61_vm1, %v4223_v22, %v775_v19  ;;  %v820_v4 = vmul.f32 %v805_v55, %v787_v20  ;;  %v4423_v1 = vrot.slane %v3459_v53, %v3915_v13  ;;  %v4450_v13 = vrot.slane %v3459_v53, %v3921_v16 }
 0x250   :  { %v819_v18 = vmul.f32 %v801_v54, %v789_v28  ;;  %v830_v47 = vrot.slane %v814_v31, 3  ;;  %v833_v49 = vrot.slane %v817_v21, 3  ;;  %v871_v11 = vpop.permute.xlu0 %870 }
 0x251   :  { %v838_v43 = vrot.slane %v820_v4, 3  ;;  %v884_v19 = vsel %vm116_vm2, %v871_v11, %v4237_v25  ;;  %v886_v54 = vsel %vm116_vm2, %v4229_v23, %v871_v11  ;;  %v783_v55 = vpop.permute.xlu1 %782 }
 0x252   :  { %v836_v56 = vrot.slane %v819_v18, 3  ;;  %854 = vst [vmem:[#allocation2 + $0x80] sm:$0xe0] %v830_v47  ;;  %857 = vst [vmem:[#allocation2 + $0x98] sm:$0xe0] %v833_v49  ;;  %v913_v2 = vmul.f32 %v4317_v59, %v886_v54  ;;  %v914_v31 = vmul.f32 %v4320_v60, %v884_v19  ;;  %v785_v18 = vsel %vm61_vm1, %v4231_v24, %v783_v55 }
 0x253   :  { %v791_v4 = vsel %vm61_vm1, %v783_v55, %v4223_v22  ;;  %v4444_v20 = vsel %vm549_vm9, %v832_v50, %v838_v43  ;;  %864 = vst [vmem:[#allocation2 + $0xd0] sm:$0x1f] %v838_v43  ;;  %v821_v28 = vmul.f32 %v4314_v58, %v785_v18  ;;  %v4453_v22 = vrot.slane %v3459_v53, %v3917_v14 }
 0x254   :  { %v837_v21 = vsel %vm549_vm9, %v831_v30, %v836_v56  ;;  %863 = vst [vmem:[#allocation2 + $0xc8] sm:$0x1f] %v836_v56  ;;  %v818_v11 = vmul.f32 %v4311_v57, %v791_v4  ;;  %860 = vst [vmem:[#allocation2 + $0xb0] sm:$0xff] %v4444_v20  ;;  %v929_v19 = vrot.slane %v913_v2, 3  ;;  %v930_v24 = vrot.slane %v914_v31, 3  ;;  %v879_v54 = vpop.permute.xlu0 %878 }
 0x255   :  { %859 = vst [vmem:[#allocation2 + $0xa8] sm:$0xff] %v837_v21  ;;  %v840_v30 = vrot.slane %v821_v28, 3  ;;  %v882_v43 = vsel %vm116_vm2, %v4237_v25, %v879_v54  ;;  %v888_v57 = vsel %vm116_vm2, %v879_v54, %v4229_v23  ;;  %v873_v58 = vpop.permute.xlu1 %872  ;;  %v4461_v56 = vld [vmem:[#allocation2 + $0x88] sm:$0xff] }
 0x256   :  { %v834_v50 = vrot.slane %v818_v11, 3  ;;  %v4463_v55 = vld [vmem:[#allocation2 + $0x90] sm:$0xff]  ;;  %953 = vst [vmem:[#allocation2 + $0xc8] sm:$0xe0] %v929_v19  ;;  %954 = vst [vmem:[#allocation2 + $0xd0] sm:$0xe0] %v930_v24  ;;  %v912_v53 = vmul.f32 %v4323_v61, %v888_v57  ;;  %v915_v2 = vmul.f32 %v4326_v62, %v882_v43  ;;  %v885_v31 = vsel %vm116_vm2, %v873_v58, %v4248_v32 }
 0x257   :  { %v887_v25 = vsel %vm116_vm2, %v4239_v26, %v873_v58  ;;  %v841_v18 = vsel %vm549_vm9, %v833_v49, %v840_v30  ;;  %865 = vst [vmem:[#allocation2 + $0xd8] sm:$0x1f] %v840_v30  ;;  %v918_v11 = vmul.f32 %v4320_v60, %v885_v31  ;;  %v3513_v57 = vpack.c.bf16 %v837_v21, %v4461_v56 }
 0x258   :  { %v835_v23 = vsel %vm549_vm9, %v830_v47, %v834_v50  ;;  %862 = vst [vmem:[#allocation2 + $0xc0] sm:$0x1f] %v834_v50  ;;  %v917_v4 = vmul.f32 %v4317_v59, %v887_v25  ;;  %861 = vst [vmem:[#allocation2 + $0xb8] sm:$0xff] %v841_v18  ;;  %v928_v28 = vrot.slane %v912_v53, 3  ;;  %v931_v54 = vrot.slane %v915_v2, 3  ;;  %v969_v43 = vpop.permute.xlu0 %968 }
 0x259   :  { %858 = vst [vmem:[#allocation2 + $0xa0] sm:$0xff] %v835_v23  ;;  %v3559_v58 = vpack.c.bf16 %v4444_v20, %v4463_v55  ;;  %v936_v47 = vrot.slane %v918_v11, 3  ;;  %v982_v49 = vsel %vm176_vm3, %v969_v43, %v4252_v33  ;;  %v984_v59 = vsel %vm176_vm3, %v4243_v27, %v969_v43  ;;  %v881_v60 = vpop.permute.xlu1 %880  ;;  %v4486_v50 = vld [vmem:[#allocation2 + $0x80] sm:$0xff]  ;;  %v4488_v30 = vld [vmem:[#allocation2 + $0x98] sm:$0xff]  ;;  %3514 = vmatprep.subr.bf16.mxu0 %v3513_v57 }
 0x25a   :  { %v934_v14 = vrot.slane %v917_v4, 3  ;;  %952 = vst [vmem:[#allocation2 + $0xc0] sm:$0xe0] %v928_v28  ;;  %955 = vst [vmem:[#allocation2 + $0xd8] sm:$0xe0] %v931_v54  ;;  %v4491_v21 = vmul.f32 %v4329_v63, %v984_v59  ;;  %v4494_v20 = vmul.f32 %v4332_v0, %v982_v49  ;;  %v883_v53 = vsel %vm116_vm2, %v4248_v32, %v881_v60 }
 0x25b   :  { %v889_v2 = vsel %vm116_vm2, %v881_v60, %v4239_v26  ;;  %v4504_v25 = vsel %vm549_vm9, %v930_v24, %v936_v47  ;;  %962 = vst [vmem:[#allocation2 + $0x110] sm:$0x1f] %v936_v47  ;;  %v919_v11 = vmul.f32 %v4326_v62, %v883_v53  ;;  %v3515_v57 = vpack.c.bf16 %v835_v23, %v4486_v50 }
 0x25c   :  { %v935_v31 = vsel %vm549_vm9, %v929_v19, %v934_v14  ;;  %961 = vst [vmem:[#allocation2 + $0x108] sm:$0x1f] %v934_v14  ;;  %v916_v4 = vmul.f32 %v4323_v61, %v889_v2  ;;  %958 = vst [vmem:[#allocation2 + $0xf0] sm:$0xff] %v4504_v25  ;;  %v1027_v32 = vrot.slane %v4491_v21, 3  ;;  %v1028_v43 = vrot.slane %v4494_v20, 3  ;;  %v977_v26 = vpop.permute.xlu0 %976 }
 0x25d   :  { %957 = vst [vmem:[#allocation2 + $0xe8] sm:$0xff] %v935_v31  ;;  %v3557_v19 = vpack.c.bf16 %v841_v18, %v4488_v30  ;;  %v938_v49 = vrot.slane %v919_v11, 3  ;;  %v980_v14 = vsel %vm176_vm3, %v4252_v33, %v977_v26  ;;  %v986_v61 = vsel %vm176_vm3, %v977_v26, %v4243_v27  ;;  %v971_v62 = vpop.permute.xlu1 %970  ;;  %v4519_v47 = vld [vmem:[#allocation2 + $0xc8] sm:$0xff]  ;;  %v4521_v59 = vld [vmem:[#allocation2 + $0xd0] sm:$0xff]  ;;  %3516 = vmatpush1.bf16.msra.mxu0 %v3515_v57 }
 0x25e   :  { %v932_v24 = vrot.slane %v916_v4, 3  ;;  %1051 = vst [vmem:[#allocation2 + $0x108] sm:$0xe0] %v1027_v32  ;;  %1052 = vst [vmem:[#allocation2 + $0x110] sm:$0xe0] %v1028_v43  ;;  %v1010_v23 = vmul.f32 %v4338_v6, %v986_v61  ;;  %v1013_v18 = vmul.f32 %v4341_v7, %v980_v14  ;;  %v983_v60 = vsel %vm176_vm3, %v971_v62, %v4258_v36 }
 0x25f   :  { %v985_v33 = vsel %vm176_vm3, %v4254_v34, %v971_v62  ;;  %v939_v21 = vsel %vm549_vm9, %v931_v54, %v938_v49  ;;  %963 = vst [vmem:[#allocation2 + $0x118] sm:$0x1f] %v938_v49  ;;  %v1016_v53 = vmul.f32 %v4332_v0, %v983_v60  ;;  %3558 = vmatprep.subr.bf16.mxu1 %v3557_v19 }
 0x260   :  { %v933_v27 = vsel %vm549_vm9, %v928_v28, %v932_v24  ;;  %960 = vst [vmem:[#allocation2 + $0x100] sm:$0x1f] %v932_v24  ;;  %v1015_v20 = vmul.f32 %v4329_v63, %v985_v33  ;;  %959 = vst [vmem:[#allocation2 + $0xf8] sm:$0xff] %v939_v21  ;;  %v1026_v2 = vrot.slane %v1010_v23, 3  ;;  %v1029_v4 = vrot.slane %v1013_v18, 3  ;;  %v1067_v11 = vpop.permute.xlu0 %1066  ;;  %3560 = vmatpush1.bf16.msra.mxu1 %v3559_v58 }
 0x261   :  { %956 = vst [vmem:[#allocation2 + $0xe0] sm:$0xff] %v933_v27  ;;  %v3517_v26 = vpack.c.bf16 %v935_v31, %v4519_v47  ;;  %v3563_v28 = vpack.c.bf16 %v4504_v25, %v4521_v59  ;;  %v1034_v54 = vrot.slane %v1016_v53, 3  ;;  %v1080_v63 = vsel %vm232_vm4, %v1067_v11, %v4260_v37  ;;  %v979_v19 = vpop.permute.xlu1 %978  ;;  %v4544_v24 = vld [vmem:[#allocation2 + $0xc0] sm:$0xff]  ;;  %v4546_v49 = vld [vmem:[#allocation2 + $0xd8] sm:$0xff] }
 0x262   :  { %v1032_v57 = vrot.slane %v1015_v20, 3  ;;  %v1082_v0 = vsel %vm232_vm4, %v4256_v35, %v1067_v11  ;;  %1050 = vst [vmem:[#allocation2 + $0x100] sm:$0xe0] %v1026_v2  ;;  %1053 = vst [vmem:[#allocation2 + $0x118] sm:$0xe0] %v1029_v4  ;;  %v1110_v31 = vmul.f32 %v4347_v9, %v1080_v63  ;;  %v981_v25 = vsel %vm176_vm3, %v4258_v36, %v979_v19 }
 0x263   :  { %v1109_v58 = vmul.f32 %v4344_v8, %v1082_v0  ;;  %v987_v14 = vsel %vm176_vm3, %v979_v19, %v4254_v34  ;;  %3518 = vmatprep.subr.bf16.mxu0 %v3517_v26  ;;  %v4558_v62 = vsel %vm549_vm9, %v1028_v43, %v1034_v54  ;;  %1060 = vst [vmem:[#allocation2 + $0x150] sm:$0x1f] %v1034_v54 }
 0x264   :  { %v1033_v61 = vsel %vm549_vm9, %v1027_v32, %v1032_v57  ;;  %1059 = vst [vmem:[#allocation2 + $0x148] sm:$0x1f] %v1032_v57  ;;  %v1014_v23 = vmul.f32 %v4338_v6, %v987_v14  ;;  %v1017_v18 = vmul.f32 %v4341_v7, %v981_v25  ;;  %1056 = vst [vmem:[#allocation2 + $0x130] sm:$0xff] %v4558_v62  ;;  %v1126_v36 = vrot.slane %v1110_v31, 3  ;;  %v1075_v33 = vpop.permute.xlu0 %1074 }
 0x265   :  { %v1125_v60 = vrot.slane %v1109_v58, 3  ;;  %v3519_v20 = vpack.c.bf16 %v933_v27, %v4544_v24  ;;  %v3561_v34 = vpack.c.bf16 %v939_v21, %v4546_v49  ;;  %v1078_v43 = vsel %vm232_vm4, %v4260_v37, %v1075_v33  ;;  %v1069_v7 = vpop.permute.xlu1 %1068  ;;  %v1601_v11 = vld [vmem:[#allocation2 + $0x108] sm:$0xff]  ;;  %v4571_v26 = vld [vmem:[#allocation2 + $0x110] sm:$0xff] }
 0x266   :  { %v1030_v53 = vrot.slane %v1014_v23, 3  ;;  %v1036_v32 = vrot.slane %v1017_v18, 3  ;;  %v1084_v6 = vsel %vm232_vm4, %v1075_v33, %v4256_v35  ;;  %1150 = vst [vmem:[#allocation2 + $0x150] sm:$0xe0] %v1126_v36  ;;  %v1111_v21 = vmul.f32 %v4364_v3, %v1078_v43 }
 0x267   :  { %1149 = vst [vmem:[#allocation2 + $0x148] sm:$0xe0] %v1125_v60  ;;  %v1108_v27 = vmul.f32 %v4361_v10, %v1084_v6  ;;  %v1081_v57 = vsel %vm232_vm4, %v1069_v7, %v4266_v40  ;;  %v1083_v37 = vsel %vm232_vm4, %v4262_v38, %v1069_v7  ;;  %3520 = vmatpush1.bf16.msra.mxu0 %v3519_v20 }
 0x268   :  { %v1031_v35 = vsel %vm549_vm9, %v1026_v2, %v1030_v53  ;;  %v1037_v54 = vsel %vm549_vm9, %v1029_v4, %v1036_v32  ;;  %1058 = vst [vmem:[#allocation2 + $0x140] sm:$0x1f] %v1030_v53  ;;  %1061 = vst [vmem:[#allocation2 + $0x158] sm:$0x1f] %v1036_v32  ;;  %v1113_v63 = vmul.f32 %v4344_v8, %v1083_v37  ;;  %3562 = vmatprep.subr.bf16.mxu1 %v3561_v34  ;;  %v1177_v31 = vpop.permute.xlu0 %1176 }
 0x269   :  { %v1114_v0 = vmul.f32 %v4347_v9, %v1081_v57  ;;  %v1124_v19 = vrot.slane %v1108_v27, 3  ;;  %v1127_v58 = vrot.slane %v1111_v21, 3  ;;  %3564 = vmatpush1.bf16.msra.mxu1 %v3563_v28  ;;  %v4585_v25 = vpack.c.bf16 %v1033_v61, %v1601_v11  ;;  %v1077_v9 = vpop.permute.xlu1 %1076  ;;  %v1600_v18 = vld [vmem:[#allocation2 + $0x100] sm:$0xff]  ;;  %v1603_v33 = vld [vmem:[#allocation2 + $0x118] sm:$0xff] }
 0x26a   :  { %v3567_v14 = vpack.c.bf16 %v4558_v62, %v4571_v26  ;;  %v1130_v23 = vrot.slane %v1113_v63, 3  ;;  %v1190_v4 = vsel %vm296_vm5, %v1177_v31, %v4268_v41  ;;  %v1192_v8 = vsel %vm296_vm5, %v4264_v39, %v1177_v31 }
 0x26b   :  { %v1132_v2 = vrot.slane %v1114_v0, 3  ;;  %1148 = vst [vmem:[#allocation2 + $0x140] sm:$0xe0] %v1124_v19  ;;  %1151 = vst [vmem:[#allocation2 + $0x158] sm:$0xe0] %v1127_v58  ;;  %v1218_v28 = vmul.f32 %v4367_v5, %v1192_v8  ;;  %v1219_v61 = vmul.f32 %v4370_v51, %v1190_v4  ;;  %v1079_v62 = vsel %vm232_vm4, %v4266_v40, %v1077_v9 }
 0x26c   :  { %v1085_v20 = vsel %vm232_vm4, %v1077_v9, %v4262_v38  ;;  %3522 = vmatprep.subr.bf16.mxu0 %v4585_v25  ;;  %v1131_v34 = vsel %vm549_vm9, %v1125_v60, %v1130_v23  ;;  %1157 = vst [vmem:[#allocation2 + $0x188] sm:$0x1f] %v1130_v23  ;;  %v1115_v43 = vmul.f32 %v4364_v3, %v1079_v62  ;;  %v1185_v11 = vpop.permute.xlu0 %1184 }
 0x26d   :  { %v1133_v53 = vsel %vm549_vm9, %v1126_v36, %v1132_v2  ;;  %1158 = vst [vmem:[#allocation2 + $0x190] sm:$0x1f] %v1132_v2  ;;  %v1112_v32 = vmul.f32 %v4361_v10, %v1085_v20  ;;  %v1234_v6 = vrot.slane %v1218_v28, 3  ;;  %v1235_v7 = vrot.slane %v1219_v61, 3  ;;  %v1179_v10 = vpop.permute.xlu1 %1178  ;;  %v1610_v3 = vld [vmem:[#allocation2 + $0x150] sm:$0xff]  ;;  %v5740_v20 = vld [vmem:[#allocation24_spill] sm:$0xff] }
 0x26e   :  { %v4608_v40 = vpack.c.bf16 %v1031_v35, %v1600_v18  ;;  %v4610_v27 = vpack.c.bf16 %v1037_v54, %v1603_v33  ;;  %v1134_v21 = vrot.slane %v1115_v43, 3  ;;  %v1188_v60 = vsel %vm296_vm5, %v4268_v41, %v1185_v11  ;;  %v1609_v57 = vld [vmem:[#allocation2 + $0x148] sm:$0xff]  ;;  %v5738_v33 = vld [vmem:[#allocation12_spill] sm:$0xff] }
 0x26f   :  { %v1128_v38 = vrot.slane %v1112_v32, 3  ;;  %v1194_v36 = vsel %vm296_vm5, %v1185_v11, %v4264_v39  ;;  %1258 = vst [vmem:[#allocation2 + $0x1c0] sm:$0xe0] %v1234_v6  ;;  %1259 = vst [vmem:[#allocation2 + $0x1c8] sm:$0xe0] %v1235_v7  ;;  %v1220_v37 = vmul.f32 %v4376_v52, %v1188_v60  ;;  %v1191_v54 = vsel %vm296_vm5, %v1179_v10, %v4274_v44 }
 0x270   :  { %v1221_v35 = vmul.f32 %v4379_v17, %v1194_v36  ;;  %v1193_v41 = vsel %vm296_vm5, %v4270_v42, %v1179_v10  ;;  %3524 = vmatpush1.bf16.msra.mxu0 %v4608_v40  ;;  %v1135_v63 = vsel %vm549_vm9, %v1127_v58, %v1134_v21  ;;  %1159 = vst [vmem:[#allocation2 + $0x198] sm:$0x1f] %v1134_v21  ;;  %v1275_v4 = vpop.permute.xlu0 %1274 }
 0x271   :  { %v1129_v39 = vsel %vm549_vm9, %v1124_v19, %v1128_v38  ;;  %1156 = vst [vmem:[#allocation2 + $0x180] sm:$0x1f] %v1128_v38  ;;  %v1222_v0 = vmul.f32 %v4367_v5, %v1193_v41  ;;  %v1223_v31 = vmul.f32 %v4370_v51, %v1191_v54  ;;  %3566 = vmatprep.subr.bf16.mxu1 %v4610_v27  ;;  %v1236_v23 = vrot.slane %v1220_v37, 3  ;;  %v1187_v51 = vpop.permute.xlu1 %1186  ;;  %v5742_v54 = vld [vmem:[#allocation26_spill] sm:$0xff] }
 0x272   :  { %v1237_v2 = vrot.slane %v1221_v35, 3  ;;  %3568 = vmatpush1.bf16.msra.mxu1 %v3567_v14  ;;  %v4632_v8 = vpack.c.bf16 %v1131_v34, %v1609_v57  ;;  %v4634_v9 = vpack.c.bf16 %v1133_v53, %v1610_v3  ;;  %v1288_v58 = vsel %vm356_vm6, %v1275_v4, %v4276_v45  ;;  %v1608_v28 = vld [vmem:[#allocation2 + $0x140] sm:$0xff]  ;;  %v1611_v61 = vld [vmem:[#allocation2 + $0x158] sm:$0xff] }
 0x273   :  { %v1238_v18 = vrot.slane %v1222_v0, 3  ;;  %v1240_v19 = vrot.slane %v1223_v31, 3  ;;  %v1290_v5 = vsel %vm356_vm6, %v5738_v33, %v1275_v4  ;;  %1260 = vst [vmem:[#allocation2 + $0x1d0] sm:$0xe0] %v1236_v23  ;;  %v5739_v14 = vld [vmem:[#allocation23_spill] sm:$0xff]  ;;  %v1317_v34 = vmul.f32 %v5740_v20, %v1288_v58  ;;  %v1617_v37 = vld [vmem:[#allocation2 + $0x188] sm:$0xff] }
 0x274   :  { %1261 = vst [vmem:[#allocation2 + $0x1d8] sm:$0xe0] %v1237_v2  ;;  %v1316_v62 = vmul.f32 %v5739_v14, %v1290_v5  ;;  %v1189_v53 = vsel %vm296_vm5, %v4274_v44, %v1187_v51  ;;  %v1195_v32 = vsel %vm296_vm5, %v1187_v51, %v4270_v42  ;;  %3526 = vmatprep.subr.bf16.mxu0 %v4632_v8  ;;  %v1283_v44 = vpop.permute.xlu0 %1282  ;;  %v5744_v0 = vld [vmem:[#allocation13_spill] sm:$0xff] }
 0x275   :  { %v4652_v43 = vsel %vm549_vm9, %v1234_v6, %v1238_v18  ;;  %v1241_v11 = vsel %vm549_vm9, %v1235_v7, %v1240_v19  ;;  %1266 = vst [vmem:[#allocation2 + $0x200] sm:$0x1f] %v1238_v18  ;;  %1267 = vst [vmem:[#allocation2 + $0x208] sm:$0x1f] %v1240_v19  ;;  %v1224_v38 = vmul.f32 %v4376_v52, %v1189_v53  ;;  %v1333_v36 = vrot.slane %v1317_v34, 3  ;;  %v1277_v52 = vpop.permute.xlu1 %1276  ;;  %v5747_v53 = vld [vmem:[#allocation16_spill] sm:$0xff] }
 0x276   :  { %v1225_v21 = vmul.f32 %v4379_v17, %v1195_v32  ;;  %v1332_v60 = vrot.slane %v1316_v62, 3  ;;  %v4657_v10 = vpack.c.bf16 %v1129_v39, %v1608_v28  ;;  %v4659_v57 = vpack.c.bf16 %v1135_v63, %v1611_v61  ;;  %v5741_v17 = vld [vmem:[#allocation25_spill] sm:$0xff]  ;;  %v5743_v39 = vld [vmem:[#allocation15_spill] sm:$0xff]  ;;  %v5745_v28 = vld [vmem:[#allocation10_spill] sm:$0xff] }
 0x277   :  { %v1242_v42 = vrot.slane %v1224_v38, 3  ;;  %v1286_v6 = vsel %vm356_vm6, %v4276_v45, %v1283_v44  ;;  %v1292_v7 = vsel %vm356_vm6, %v1283_v44, %v5738_v33  ;;  %1357 = vst [vmem:[#allocation2 + $0x208] sm:$0xe0] %v1333_v36  ;;  %v1289_v63 = vsel %vm356_vm6, %v1277_v52, %v5743_v39  ;;  %v1619_v31 = vld [vmem:[#allocation2 + $0x198] sm:$0xff]  ;;  %v1625_v44 = vld [vmem:[#allocation2 + $0x1c8] sm:$0xff] }
 0x278   :  { %v1244_v3 = vrot.slane %v1225_v21, 3  ;;  %1356 = vst [vmem:[#allocation2 + $0x200] sm:$0xe0] %v1332_v60  ;;  %v1318_v35 = vmul.f32 %v5741_v17, %v1286_v6  ;;  %v1319_v41 = vmul.f32 %v5742_v54, %v1292_v7  ;;  %v1291_v45 = vsel %vm356_vm6, %v5744_v0, %v1277_v52  ;;  %3528 = vmatpush1.bf16.msra.mxu0 %v4657_v10  ;;  %v1373_v51 = vpop.permute.xlu0 %1372  ;;  %v1616_v21 = vld [vmem:[#allocation2 + $0x180] sm:$0xff] }
 0x279   :  { %v4677_v4 = vsel %vm549_vm9, %v1236_v23, %v1242_v42  ;;  %1268 = vst [vmem:[#allocation2 + $0x210] sm:$0x1f] %v1242_v42  ;;  %v1320_v19 = vmul.f32 %v5739_v14, %v1291_v45  ;;  %v1321_v58 = vmul.f32 %v5740_v20, %v1289_v63  ;;  %3570 = vmatprep.subr.bf16.mxu1 %v4659_v57  ;;  %v5746_v23 = vld [vmem:[#allocation11_spill] sm:$0xff]  ;;  %v5748_v20 = vld [vmem:[#allocation14_spill] sm:$0xff]  ;;  %v1285_v38 = vpop.permute.xlu1 %1284  ;;  %v5750_v6 = vld [vmem:[#allocation28_spill] sm:$0xff] }
 0x27a   :  { %v4680_v18 = vsel %vm549_vm9, %v1237_v2, %v1244_v3  ;;  %1269 = vst [vmem:[#allocation2 + $0x218] sm:$0x1f] %v1244_v3  ;;  %v1334_v33 = vrot.slane %v1318_v35, 3  ;;  %v1335_v5 = vrot.slane %v1319_v41, 3  ;;  %v4686_v61 = vpack.c.bf16 %v5745_v28, %v1617_v37  ;;  %3572 = vmatpush1.bf16.msra.mxu1 %v4634_v9  ;;  %v5749_v42 = vld [vmem:[#allocation27_spill] sm:$0xff] }
 0x27b   :  { %v4690_v62 = vpack.c.bf16 %v5746_v23, %v1619_v31  ;;  %v1336_v2 = vrot.slane %v1320_v19, 3  ;;  %v1338_v34 = vrot.slane %v1321_v58, 3  ;;  %v1386_v14 = vsel %vm412_vm7, %v1373_v51, %v5747_v53  ;;  %v1618_v23 = vld [vmem:[#allocation2 + $0x190] sm:$0xff] }
 0x27c   :  { %v1388_v32 = vsel %vm412_vm7, %v5748_v20, %v1373_v51  ;;  %1358 = vst [vmem:[#allocation2 + $0x210] sm:$0xe0] %v1334_v33  ;;  %1359 = vst [vmem:[#allocation2 + $0x218] sm:$0xe0] %v1335_v5  ;;  %v1415_v7 = vmul.f32 %v5750_v6, %v1386_v14  ;;  %v1287_v52 = vsel %vm356_vm6, %v5743_v39, %v1285_v38  ;;  %3530 = vmatprep.subr.bf16.mxu0 %v4686_v61  ;;  %v1381_v19 = vpop.permute.xlu0 %1380  ;;  %v5752_v14 = vld [vmem:[#allocation19_spill] sm:$0xff] }
 0x27d   :  { %v1414_v3 = vmul.f32 %v5749_v42, %v1388_v32  ;;  %v1293_v37 = vsel %vm356_vm6, %v1285_v38, %v5744_v0  ;;  %v4708_v35 = vsel %vm549_vm9, %v1332_v60, %v1336_v2  ;;  %v4711_v41 = vsel %vm549_vm9, %v1333_v36, %v1338_v34  ;;  %1364 = vst [vmem:[#allocation2 + $0x240] sm:$0x1f] %v1336_v2  ;;  %v5751_v0 = vld [vmem:[#allocation8_spill] sm:$0xff]  ;;  %v5753_v38 = vld [vmem:[#allocation17_spill] sm:$0xff] }
 0x27e   :  { %1365 = vst [vmem:[#allocation2 + $0x248] sm:$0x1f] %v1338_v34  ;;  %v1322_v63 = vmul.f32 %v5741_v17, %v1287_v52  ;;  %v1323_v45 = vmul.f32 %v5742_v54, %v1293_v37  ;;  %3574 = vmatprep.subr.bf16.mxu1 %v4690_v62  ;;  %v1431_v31 = vrot.slane %v1415_v7, 3  ;;  %v4717_v58 = vpack.c.bf16 %v5751_v0, %v1616_v21  ;;  %v1375_v54 = vpop.permute.xlu1 %1374  ;;  %v1624_v2 = vld [vmem:[#allocation2 + $0x1c0] sm:$0xff]  ;;  %v5754_v37 = vld [vmem:[#allocation9_spill] sm:$0xff] }
 0x27f   :  { %v1430_v39 = vrot.slane %v1414_v3, 3  ;;  %v4719_v51 = vpack.c.bf16 %v1241_v11, %v1625_v44  ;;  %v1384_v36 = vsel %vm412_vm7, %v5747_v53, %v1381_v19  ;;  %v1390_v17 = vsel %vm412_vm7, %v1381_v19, %v5748_v20  ;;  %v5755_v0 = vld [vmem:[#allocation20_spill] sm:$0xff] }
 0x280   :  { %v1340_v60 = vrot.slane %v1322_v63, 3  ;;  %v1342_v28 = vrot.slane %v1323_v45, 3  ;;  %1455 = vst [vmem:[#allocation2 + $0x248] sm:$0xe0] %v1431_v31  ;;  %v1416_v34 = vmul.f32 %v4417_v46, %v1384_v36  ;;  %v1417_v11 = vmul.f32 %v4420_v48, %v1390_v17  ;;  %3532 = vmatpush1.bf16.msra.mxu0 %v4717_v58  ;;  %v1471_v45 = vpop.permute.xlu0 %1470  ;;  %v1627_v36 = vld [vmem:[#allocation2 + $0x1d8] sm:$0xff]  ;;  %v1626_v17 = vld [vmem:[#allocation2 + $0x1d0] sm:$0xff] }
 0x281   :  { %1454 = vst [vmem:[#allocation2 + $0x240] sm:$0xe0] %v1430_v39  ;;  %v1387_v32 = vsel %vm412_vm7, %v1375_v54, %v5752_v14  ;;  %v1389_v53 = vsel %vm412_vm7, %v5753_v38, %v1375_v54  ;;  %3534 = vmatprep.subr.bf16.mxu0 %v4719_v51  ;;  %v4746_v63 = vpack.c.bf16 %v5754_v37, %v1618_v23 }
 0x282   :  { %v4737_v20 = vsel %vm549_vm9, %v1334_v33, %v1340_v60  ;;  %v4740_v21 = vsel %vm549_vm9, %v1335_v5, %v1342_v28  ;;  %1366 = vst [vmem:[#allocation2 + $0x250] sm:$0x1f] %v1340_v60  ;;  %1367 = vst [vmem:[#allocation2 + $0x258] sm:$0x1f] %v1342_v28  ;;  %v1418_v44 = vmul.f32 %v5749_v42, %v1389_v53  ;;  %v1432_v7 = vrot.slane %v1416_v34, 3  ;;  %v5756_v42 = vld [vmem:[#allocation18_spill] sm:$0xff]  ;;  %v1383_v28 = vpop.permute.xlu1 %1382 }
 0x283   :  { %v1419_v3 = vmul.f32 %v5750_v6, %v1387_v32  ;;  %v1433_v52 = vrot.slane %v1417_v11, 3  ;;  %v4749_v33 = vpack.c.bf16 %v4652_v43, %v1624_v2  ;;  %v1484_v60 = vsel %vm472_vm8, %v1471_v45, %v5755_v0  ;;  %3576 = vmatpush1.bf16.msra.mxu1 %v4746_v63 }
 0x284   :  { %v1434_v19 = vrot.slane %v1418_v44, 3  ;;  %v1486_v6 = vsel %vm472_vm8, %v5756_v42, %v1471_v45  ;;  %1456 = vst [vmem:[#allocation2 + $0x250] sm:$0xe0] %v1432_v7  ;;  %v1513_v54 = vmul.f32 %v4426_v29, %v1484_v60  ;;  %v1385_v23 = vsel %vm412_vm7, %v5752_v14, %v1383_v28  ;;  %v5757_v60 = vld [vmem:[#allocation22_spill] sm:$0xff] }
 0x285   :  { %v1436_v5 = vrot.slane %v1419_v3, 3  ;;  %1457 = vst [vmem:[#allocation2 + $0x258] sm:$0xe0] %v1433_v52  ;;  %v1512_v43 = vmul.f32 %v4423_v1, %v1486_v6  ;;  %v1391_v2 = vsel %vm412_vm7, %v1383_v28, %v5753_v38  ;;  %v1420_v32 = vmul.f32 %v4417_v46, %v1385_v23  ;;  %3536 = vmatpush1.bf16.msra.mxu0 %v4749_v33  ;;  %v1479_v38 = vpop.permute.xlu0 %1478 }
 0x286   :  { %v1435_v34 = vsel %vm549_vm9, %v1430_v39, %v1434_v19  ;;  %1462 = vst [vmem:[#allocation2 + $0x280] sm:$0x1f] %v1434_v19  ;;  %v1421_v53 = vmul.f32 %v4420_v48, %v1391_v2  ;;  %v1529_v3 = vrot.slane %v1513_v54, 3  ;;  %v4772_v14 = vpack.c.bf16 %v4680_v18, %v1627_v36  ;;  %v1473_v48 = vpop.permute.xlu1 %1472  ;;  %v1633_v19 = vld [vmem:[#allocation2 + $0x208] sm:$0xff]  ;;  %v1634_v36 = vld [vmem:[#allocation2 + $0x210] sm:$0xff] }
 0x287   :  { %v1437_v11 = vsel %vm549_vm9, %v1431_v31, %v1436_v5  ;;  %1463 = vst [vmem:[#allocation2 + $0x288] sm:$0x1f] %v1436_v5  ;;  %v1528_v44 = vrot.slane %v1512_v43, 3  ;;  %v4775_v37 = vpack.c.bf16 %v4677_v4, %v1626_v17  ;;  %v1438_v39 = vrot.slane %v1420_v32, 3  ;;  %v1632_v5 = vld [vmem:[#allocation2 + $0x200] sm:$0xff]  ;;  %v1641_v2 = vld [vmem:[#allocation2 + $0x248] sm:$0xff] }
 0x288   :  { %v1440_v45 = vrot.slane %v1421_v53, 3  ;;  %v1482_v31 = vsel %vm472_vm8, %v5755_v0, %v1479_v38  ;;  %v1488_v46 = vsel %vm472_vm8, %v1479_v38, %v5756_v42  ;;  %1553 = vst [vmem:[#allocation2 + $0x288] sm:$0xe0] %v1529_v3  ;;  %3578 = vmatprep.subr.bf16.mxu1 %v4772_v14  ;;  %v1485_v6 = vsel %vm472_vm8, %v1473_v48, %v5757_v60  ;;  %v5758_v0 = vld [vmem:[#allocation21_spill] sm:$0xff]  ;;  %v1635_v42 = vld [vmem:[#allocation2 + $0x218] sm:$0xff]  ;;  %v1640_v32 = vld [vmem:[#allocation2 + $0x240] sm:$0xff] }
 0x289   :  { %1552 = vst [vmem:[#allocation2 + $0x280] sm:$0xe0] %v1528_v44  ;;  %v1514_v4 = vmul.f32 %v4450_v13, %v1482_v31  ;;  %v1515_v18 = vmul.f32 %v4453_v22, %v1488_v46  ;;  %v1487_v28 = vsel %vm472_vm8, %v5758_v0, %v1473_v48  ;;  %v1439_v17 = vsel %vm549_vm9, %v1432_v7, %v1438_v39 }
 0x28a   :  { %v1441_v43 = vsel %vm549_vm9, %v1433_v52, %v1440_v45  ;;  %1464 = vst [vmem:[#allocation2 + $0x290] sm:$0x1f] %v1438_v39  ;;  %1465 = vst [vmem:[#allocation2 + $0x298] sm:$0x1f] %v1440_v45  ;;  %3580 = vmatpush1.bf16.msra.mxu1 %v4775_v37  ;;  %v1516_v54 = vmul.f32 %v4423_v1, %v1487_v28  ;;  %v1517_v23 = vmul.f32 %v4426_v29, %v1485_v6  ;;  %v1481_v39 = vpop.permute.xlu1 %1480 }
 0x28b   :  { %v1530_v53 = vrot.slane %v1514_v4, 3  ;;  %v1531_v38 = vrot.slane %v1515_v18, 3  ;;  %v4798_v31 = vpack.c.bf16 %v4711_v41, %v1633_v19  ;;  %v4801_v46 = vpack.c.bf16 %v4708_v35, %v1632_v5  ;;  %v1642_v19 = vld [vmem:[#allocation2 + $0x250] sm:$0xff] }
 0x28c   :  { %v1532_v7 = vrot.slane %v1516_v54, 3  ;;  %v1534_v52 = vrot.slane %v1517_v23, 3  ;;  %v4804_v45 = vpack.c.bf16 %v4740_v21, %v1635_v42  ;;  %v4807_v1 = vpack.c.bf16 %v4737_v20, %v1634_v36  ;;  %v1643_v29 = vld [vmem:[#allocation2 + $0x258] sm:$0xff]  ;;  %v2692_v23 = vld [vmem:[#allocation2 + $0x28] sm:$0xff] }
 0x28d   :  { %1554 = vst [vmem:[#allocation2 + $0x290] sm:$0xe0] %v1530_v53  ;;  %1555 = vst [vmem:[#allocation2 + $0x298] sm:$0xe0] %v1531_v38  ;;  %3538 = vmatprep.subr.bf16.mxu0 %v4798_v31  ;;  %v1483_v41 = vsel %vm472_vm8, %v5757_v60, %v1481_v39  ;;  %v1489_v35 = vsel %vm472_vm8, %v1481_v39, %v5758_v0  ;;  %v4816_v48 = vpack.c.bf16 %v1437_v11, %v1641_v2  ;;  %v2688_v2 = vld [vmem:[#allocation2 + $0x8] sm:$0xff] }
 0x28e   :  { %v4818_v21 = vpack.c.bf16 %v1435_v34, %v1640_v32  ;;  %v1533_v20 = vsel %vm549_vm9, %v1528_v44, %v1532_v7  ;;  %v1535_v5 = vsel %vm549_vm9, %v1529_v3, %v1534_v52  ;;  %1560 = vst [vmem:[#allocation2 + $0x2c0] sm:$0x1f] %v1532_v7  ;;  %1561 = vst [vmem:[#allocation2 + $0x2c8] sm:$0x1f] %v1534_v52  ;;  %3540 = vmatpush1.bf16.msra.mxu0 %v4801_v46  ;;  %v2687_v32 = vld [vmem:[#allocation2] sm:$0xff]  ;;  %v2700_v7 = vld [vmem:[#allocation2 + $0x68] sm:$0xff] }
 0x28f   :  { %v1518_v4 = vmul.f32 %v4450_v13, %v1483_v41  ;;  %v1519_v18 = vmul.f32 %v4453_v22, %v1489_v35  ;;  %3582 = vmatprep.subr.bf16.mxu1 %v4804_v45  ;;  %3542 = vmatprep.subr.bf16.mxu0 %v4816_v48  ;;  %v4827_v11 = vpack.c.bf16 %v1441_v43, %v1643_v29  ;;  %v1649_v3 = vld [vmem:[#allocation2 + $0x288] sm:$0xff]  ;;  %v2694_v52 = vld [vmem:[#allocation2 + $0x38] sm:$0xff] }
 0x290   :  { %3584 = vmatpush1.bf16.msra.mxu1 %v4807_v1  ;;  %v4830_v44 = vpack.c.bf16 %v1439_v17, %v1642_v19  ;;  %v1648_v6 = vld [vmem:[#allocation2 + $0x280] sm:$0xff]  ;;  %v4833_v0 = vpack.c.bf16 %v1535_v5, %v1649_v3  ;;  %v3593_v41 = vpack.c.bf16 %v2692_v23, %v2688_v2  ;;  %v1567_v35 = vld [vmem:[%s5659_s3 + $0x18] sm:$0xff] }
 0x291   :  { %v1536_v34 = vrot.slane %v1518_v4, 3  ;;  %v1538_v60 = vrot.slane %v1519_v18, 3  ;;  %3586 = vmatprep.subr.bf16.mxu1 %v4827_v11  ;;  %v4838_v28 = vpack.c.bf16 %v1533_v20, %v1648_v6  ;;  %v2696_v20 = vld [vmem:[#allocation2 + $0x48] sm:$0xff]  ;;  %v2690_v5 = vld [vmem:[#allocation2 + $0x18] sm:$0xff]  ;;  %v2693_v4 = vld [vmem:[#allocation2 + $0x30] sm:$0xff] }
 0x292   :  { %3544 = vmatpush1.bf16.msra.mxu0 %v4818_v21  ;;  %v3597_v18 = vpack.c.bf16 %v2700_v7, %v2696_v20  ;;  %v2702_v3 = vld [vmem:[#allocation2 + $0x78] sm:$0xff] }
 0x293   :  { %v1537_v13 = vsel %vm549_vm9, %v1530_v53, %v1536_v34  ;;  %v1539_v22 = vsel %vm549_vm9, %v1531_v38, %v1538_v60  ;;  %1562 = vst [vmem:[#allocation2 + $0x2d0] sm:$0x1f] %v1536_v34  ;;  %1563 = vst [vmem:[#allocation2 + $0x2d8] sm:$0x1f] %v1538_v60  ;;  %3546 = vmatprep.subr.bf16.mxu0 %v4833_v0  ;;  %v2691_v53 = vld [vmem:[#allocation2 + $0x20] sm:$0xff]  ;;  %v2689_v60 = vld [vmem:[#allocation2 + $0x10] sm:$0xff] }
 0x294   :  { %3588 = vmatpush1.bf16.msra.mxu1 %v4830_v44  ;;  %v1651_v42 = vld [vmem:[#allocation2 + $0x298] sm:$0xff]  ;;  %v1650_v36 = vld [vmem:[#allocation2 + $0x290] sm:$0xff]  ;;  %v1564_v38 = vld [vmem:[%s5659_s3] sm:$0xff]  ;;  %v3595_v19 = vpack.c.bf16 %v2691_v53, %v2687_v32 }
 0x295   :  { %v1657_v17 = vld [vmem:[#allocation2 + $0x2c8] sm:$0x1f]  ;;  %v4842_v43 = vpack.c.bf16 %v1539_v22, %v1651_v42  ;;  %v4844_v54 = vpack.c.bf16 %v1537_v13, %v1650_v36  ;;  %v1656_v39 = vld [vmem:[#allocation2 + $0x2c0] sm:$0x1f]  ;;  %v1566_v13 = vld [vmem:[%s5659_s3 + $0x10] sm:$0xff]  ;;  %v3673_v22 = vpack.c.bf16 %v2694_v52, %v2690_v5 }
 0x296   :  { %3548 = vmatpush1.bf16.msra.mxu0 %v4838_v28  ;;  %v2699_v34 = vld [vmem:[#allocation2 + $0x60] sm:$0xff]  ;;  %v2708_v42 = vld [vmem:[#allocation2 + $0xa8] sm:$0xff]  ;;  %v2698_v23 = vld [vmem:[#allocation2 + $0x58] sm:$0xff] }
 0x297   :  { %3460 = vmatprep.subr.msk.mxu0 %vm549_vm9, %v1657_v17  ;;  %3590 = vmatprep.subr.bf16.mxu1 %v4842_v43  ;;  %v2695_v36 = vld [vmem:[#allocation2 + $0x40] sm:$0xff]  ;;  %v3675_v17 = vpack.c.bf16 %v2693_v4, %v2689_v60  ;;  %v3677_v32 = vpack.c.bf16 %v2702_v3, %v2698_v23  ;;  %v2701_v53 = vld [vmem:[#allocation2 + $0x70] sm:$0xff]  ;;  %v3601_v7 = vpack.c.bf16 %v2708_v42, %v4461_v56 }
 0x298   :  { %3592 = vmatpush1.bf16.msra.mxu1 %v4844_v54  ;;  %v3599_v2 = vpack.c.bf16 %v2699_v34, %v2695_v36  ;;  %v2697_v52 = vld [vmem:[#allocation2 + $0x50] sm:$0xff]  ;;  %v2715_v56 = vld [vmem:[#allocation2 + $0xe0] sm:$0xff] }
 0x299   :  { %v2709_v5 = vld [vmem:[#allocation2 + $0xb0] sm:$0xff]  ;;  %v3607_v60 = vpack.c.bf16 %v2715_v56, %v4544_v24 }
 0x29a   :  { %v1659_v29 = vld [vmem:[#allocation2 + $0x2d8] sm:$0x1f]  ;;  %3461 = vmatpush1.msk.msra.mxu0 %vm549_vm9, %v1656_v39  ;;  %v1658_v6 = vld [vmem:[#allocation2 + $0x2d0] sm:$0x1f]  ;;  %v2707_v39 = vld [vmem:[#allocation2 + $0xa0] sm:$0xff]  ;;  %v3683_v34 = vpack.c.bf16 %v2709_v5, %v4463_v55 }
 0x29b   :  { %3464 = vmatprep.subr.msk.mxu1 %vm549_vm9, %v1659_v29  ;;  %1744 = vmatmul.mubr.f32.vlgmr.msra.gmra.mrb[4].mxu0 %v1564_v38  ;;  %v2710_v29 = vld [vmem:[#allocation2 + $0xb8] sm:$0xff]  ;;  %v2717_v3 = vld [vmem:[#allocation2 + $0xf0] sm:$0xff] }
 0x29c   :  { %3594 = vmatprep.subr.bf16.mxu0 %v3593_v41  ;;  %3463 = vmatprep.mubr.msk.f32.mxu0 %vm1660_vm11, %v1567_v35  ;;  %v2716_v41 = vld [vmem:[#allocation2 + $0xe8] sm:$0xff]  ;;  %v3681_v20 = vpack.c.bf16 %v2710_v29, %v4488_v30  ;;  %v2725_v30 = vld [vmem:[#allocation2 + $0x130] sm:$0xff] }
 0x29d   :  { %3596 = vmatpush1.bf16.msra.mxu0 %v3595_v19  ;;  %3465 = vmatpush1.msk.msra.mxu1 %vm549_vm9, %v1658_v6  ;;  %v3679_v19 = vpack.c.bf16 %v2701_v53, %v2697_v52  ;;  %v3605_v4 = vpack.c.bf16 %v2716_v41, %v4519_v47  ;;  %v3691_v55 = vpack.c.bf16 %v2725_v30, %v4571_v26  ;;  %v3468_v30 = vld [vmem:[%s5657_s0 + $0x1] ss:$8 sm:$0xf] }
 0x29e   :  { %3598 = vmatprep.subr.bf16.mxu0 %v3597_v18  ;;  %1821 = vmatmul.mubr.f32.vlgmr.msra.gmra.mrb[4].mxu1 %v1564_v38  ;;  %v3603_v38 = vpack.c.bf16 %v2707_v39, %v4486_v50  ;;  %v2718_v18 = vld [vmem:[#allocation2 + $0xf8] sm:$0xff]  ;;  %v3687_v50 = vpack.c.bf16 %v2717_v3, %v4521_v59 }
 0x29f   :  { %3674 = vmatprep.subr.bf16.mxu1 %v3673_v22  ;;  %1750 = vmatmul.mubr.f32.gmra.mrb[6].mxu0 %v1566_v13 }
 0x2a0   :  { %3676 = vmatpush1.bf16.msra.mxu1 %v3675_v17  ;;  %3467 = vmatprep.mubr.msk.f32.mxu1 %vm1660_vm11, %v1567_v35  ;;  %v3685_v35 = vpack.c.bf16 %v2718_v18, %v4546_v49 }
 0x2a1   :  { %3600 = vmatpush1.bf16.msra.mxu0 %v3599_v2  ;;  %3678 = vmatprep.subr.bf16.mxu1 %v3677_v32 }
 0x2a2   :  { %3602 = vmatprep.subr.bf16.mxu0 %v3601_v7  ;;  %1827 = vmatmul.mubr.f32.gmra.mrb[6].mxu1 %v1566_v13 }
 0x2a4   :  { %3680 = vmatpush1.bf16.msra.mxu1 %v3679_v19 }
 0x2a5   :  { %3604 = vmatpush1.bf16.msra.mxu0 %v3603_v38  ;;  %3682 = vmatprep.subr.bf16.mxu1 %v3681_v20 }
 0x2a6   :  { %3606 = vmatprep.subr.bf16.mxu0 %v3605_v4 }
 0x2a8   :  { %3684 = vmatpush1.bf16.msra.mxu1 %v3683_v34 }
 0x2a9   :  { %3608 = vmatpush1.bf16.msra.mxu0 %v3607_v60  ;;  %3686 = vmatprep.subr.bf16.mxu1 %v3685_v35 }
 0x2aa   :  { %3610 = vmatprep.subr.bf16.mxu0 %v4585_v25 }
 0x2ac   :  { %3688 = vmatpush1.bf16.msra.mxu1 %v3687_v50  ;;  %v1909_v50 = vld [vmem:[%s5657_s0] ss:$8 sm:$0xf] }
 0x2ad   :  { %3612 = vmatpush1.bf16.msra.mxu0 %v4608_v40  ;;  %3690 = vmatprep.subr.bf16.mxu1 %v4610_v27 }
 0x2ae   :  { %3614 = vmatprep.subr.bf16.mxu0 %v4632_v8 }
 0x2b0   :  { %3692 = vmatpush1.bf16.msra.mxu1 %v3691_v55 }
 0x2b1   :  { %3616 = vmatpush1.bf16.msra.mxu0 %v4657_v10  ;;  %3694 = vmatprep.subr.bf16.mxu1 %v4659_v57 }
 0x2b2   :  { %3618 = vmatprep.subr.bf16.mxu0 %v4686_v61 }
 0x2b4   :  { %3696 = vmatpush1.bf16.msra.mxu1 %v4634_v9 }
 0x2b5   :  { %3620 = vmatpush1.bf16.msra.mxu0 %v4717_v58  ;;  %3698 = vmatprep.subr.bf16.mxu1 %v4690_v62 }
 0x2b6   :  { %3622 = vmatprep.subr.bf16.mxu0 %v4719_v51 }
 0x2b8   :  { %3700 = vmatpush1.bf16.msra.mxu1 %v4746_v63 }
 0x2b9   :  { %3624 = vmatpush1.bf16.msra.mxu0 %v4749_v33  ;;  %3702 = vmatprep.subr.bf16.mxu1 %v4772_v14 }
 0x2ba   :  { %3626 = vmatprep.subr.bf16.mxu0 %v4798_v31 }
 0x2bc   :  { %3704 = vmatpush1.bf16.msra.mxu1 %v4775_v37 }
 0x2bd   :  { %3628 = vmatpush1.bf16.msra.mxu0 %v4801_v46  ;;  %3706 = vmatprep.subr.bf16.mxu1 %v4804_v45 }
 0x2be   :  { %3630 = vmatprep.subr.bf16.mxu0 %v4816_v48 }
 0x2c0   :  { %3708 = vmatpush1.bf16.msra.mxu1 %v4807_v1 }
 0x2c1   :  { %3632 = vmatpush1.bf16.msra.mxu0 %v4818_v21  ;;  %3710 = vmatprep.subr.bf16.mxu1 %v4827_v11 }
 0x2c2   :  { %3634 = vmatprep.subr.bf16.mxu0 %v4833_v0  ;;  %v2682_v0 = vld [vmem:[%s5660_s4 + $0x8] sm:$0xff] }
 0x2c3   :  { %2934 = vmatprep.mubr.f32.mxu0 %v2682_v0  ;;  %3088 = vmatprep.mubr.f32.mxu1 %v2682_v0 }
 0x2c4   :  { %3712 = vmatpush1.bf16.msra.mxu1 %v4830_v44 }
 0x2c5   :  { %3636 = vmatpush1.bf16.msra.mxu0 %v4838_v28  ;;  %3714 = vmatprep.subr.bf16.mxu1 %v4842_v43 }
 0x2c8   :  { %3716 = vmatpush1.bf16.msra.mxu1 %v4844_v54 }
 0x36e   :  { %v1745_v47 = vpop.f32.mrb[4].mxu0 }
 0x36f   :  { %v4900_v59 = vmax.f32 %v1745_v47, 0.0  ;;  %v1747_v24 = vpop.f32.mrb[5].mxu0 }
 0x370   :  { %v4902_v49 = vmax.f32 %v1747_v24, 0.0  ;;  %v1918_v24 = vrot.slane %v1909_v50, %v3919_v15 }
 0x371   :  { %v1849_v26 = vrot.slane %v4900_v59, 3  ;;  %1885 = vrot.lane.b32.xlu0 %v4900_v59, %s3803_s25  ;;  %v1822_v25 = vpop.f32.mrb[4].mxu1 }
 0x372   :  { %v1850_v40 = vrot.slane %v4902_v49, 3  ;;  %v1751_v27 = vpop.f32.mrb[6].mxu0  ;;  %v4908_v8 = vmax.f32 %v1822_v25, 0.0  ;;  %v1824_v9 = vpop.f32.mrb[5].mxu1  ;;  %v5772_v25 = vld [vmem:[#allocation6_spill] sm:$0xff] }
 0x373   :  { %1873 = vst [vmem:[#allocation3 + $0x40] sm:$0xe0] %v1849_v26  ;;  %2277 = vst [vmem:[#allocation2 + $0x3c0] sm:$0xe0] %v1849_v26  ;;  %v4910_v10 = vmax.f32 %v1751_v27, 0.0  ;;  %v1753_v57 = vpop.f32.mrb[7].mxu0 }
 0x374   :  { %v4912_v61 = vmax.f32 %v1824_v9, 0.0  ;;  %1874 = vst [vmem:[#allocation3 + $0x48] sm:$0xe0] %v1850_v40  ;;  %2278 = vst [vmem:[#allocation2 + $0x3c8] sm:$0xe0] %v1850_v40  ;;  %v1851_v62 = vrot.slane %v4908_v8, 3  ;;  %v5143_v9 = vrot.slane %v3468_v30, %v3919_v15 }
 0x375   :  { %v4915_v58 = vmax.f32 %v1753_v57, 0.0  ;;  %v1853_v51 = vrot.slane %v4910_v10, 3  ;;  %1893 = vrot.lane.b32.xlu0 %v4908_v8, %s3803_s25  ;;  %1887 = vrot.lane.b32.xlu1 %v4910_v10, %s3803_s25  ;;  %v1828_v33 = vpop.f32.mrb[6].mxu1  ;;  %v5773_v27 = vld [vmem:[#allocation7_spill] sm:$0xff]  ;;  %v5149_v57 = vrot.slane %v3468_v30, %v5772_v25 }
 0x376   :  { %v1852_v63 = vrot.slane %v4912_v61, 3  ;;  %1875 = vst [vmem:[#allocation3 + $0x50] sm:$0xe0] %v1851_v62  ;;  %2279 = vst [vmem:[#allocation2 + $0x3d0] sm:$0xe0] %v1851_v62  ;;  %v1839_v37 = vmax.f32 %v1828_v33, 0.0 }
 0x377   :  { %v1855_v14 = vrot.slane %v4915_v58, 3  ;;  %v1830_v31 = vpop.f32.mrb[7].mxu1  ;;  %1881 = vst [vmem:[#allocation3 + $0x80] sm:$0x1f] %v1853_v51  ;;  %2285 = vst [vmem:[#allocation2 + $0x400] sm:$0x1f] %v1853_v51  ;;  %v4927_v45 = vsel %vm549_vm9, %v1849_v26, %v1853_v51 }
 0x378   :  { %1876 = vst [vmem:[#allocation3 + $0x58] sm:$0xe0] %v1852_v63  ;;  %2280 = vst [vmem:[#allocation2 + $0x3d8] sm:$0xe0] %v1852_v63  ;;  %v4924_v46 = vmax.f32 %v1830_v31, 0.0  ;;  %v1857_v1 = vrot.slane %v1839_v37, 3 }
 0x379   :  { %5759 = vst [vmem:[#allocation12_spill] sm:$0xff] %v4927_v45  ;;  %1882 = vst [vmem:[#allocation3 + $0x88] sm:$0x1f] %v1855_v14  ;;  %v4930_v48 = vsel %vm549_vm9, %v1850_v40, %v1855_v14  ;;  %1983 = vrot.lane.b32.xlu0 %v4900_v59, %s3805_s26  ;;  %1895 = vrot.lane.b32.xlu1 %v1839_v37, %s3803_s25  ;;  %v3470_v26 = vld [vmem:[%s5657_s0 + $0x3] ss:$8 sm:$0xf]  ;;  %v5137_v40 = vrot.slane %v1909_v50, %v5772_v25 }
 0x37a   :  { %2286 = vst [vmem:[#allocation2 + $0x408] sm:$0x1f] %v1855_v14  ;;  %5760 = vst [vmem:[#allocation23_spill] sm:$0xff] %v4930_v48  ;;  %v1859_v21 = vrot.slane %v4924_v46, 3  ;;  %v4939_v11 = vsel %vm549_vm9, %v1851_v62, %v1857_v1  ;;  %v5172_v31 = vrot.slane %v3470_v26, %v3919_v15 }
 0x37b   :  { %2281 = vst [vmem:[#allocation2 + $0x3e0] sm:$0xff] %v4927_v45  ;;  %2282 = vst [vmem:[#allocation2 + $0x3e8] sm:$0xff] %v4930_v48  ;;  %v3471_v51 = vld [vmem:[%s5657_s0 + $0x5] ss:$8 sm:$0xf] }
 0x37c   :  { %1883 = vst [vmem:[#allocation3 + $0x90] sm:$0x1f] %v1857_v1  ;;  %2287 = vst [vmem:[#allocation2 + $0x410] sm:$0x1f] %v1857_v1  ;;  %v4942_v44 = vsel %vm549_vm9, %v1852_v63, %v1859_v21 }
 0x37d   :  { %5761 = vst [vmem:[#allocation24_spill] sm:$0xff] %v4939_v11  ;;  %1884 = vst [vmem:[#allocation3 + $0x98] sm:$0x1f] %v1859_v21  ;;  %1991 = vrot.lane.b32.xlu0 %v4908_v8, %s3805_s26  ;;  %1985 = vrot.lane.b32.xlu1 %v4910_v10, %s3805_s26  ;;  %v3472_v1 = vld [vmem:[%s5657_s0 + $0x6] ss:$8 sm:$0xf] }
 0x37e   :  { %2288 = vst [vmem:[#allocation2 + $0x418] sm:$0x1f] %v1859_v21  ;;  %5762 = vst [vmem:[#allocation25_spill] sm:$0xff] %v4942_v44  ;;  %v5211_v45 = vrot.slane %v3472_v1, %v3921_v16 }
 0x37f   :  { %2283 = vst [vmem:[#allocation2 + $0x3f0] sm:$0xff] %v4939_v11  ;;  %2284 = vst [vmem:[#allocation2 + $0x3f8] sm:$0xff] %v4942_v44  ;;  %v5202_v11 = vrot.slane %v3471_v51, %v5773_v27 }
 0x380   :  { %5775 = vst [vmem:[#allocation19_spill] sm:$0xff] %v5211_v45 }
 0x381   :  { %2081 = vrot.lane.b32.xlu0 %v4900_v59, %s3806_s27  ;;  %1993 = vrot.lane.b32.xlu1 %v1839_v37, %s3805_s26 }
 0x385   :  { %2089 = vrot.lane.b32.xlu0 %v4908_v8, %s3806_s27  ;;  %2083 = vrot.lane.b32.xlu1 %v4910_v10, %s3806_s27 }
 0x389   :  { %2179 = vrot.lane.b32.xlu0 %v4900_v59, %s3807_s28  ;;  %2091 = vrot.lane.b32.xlu1 %v1839_v37, %s3806_s27 }
 0x38d   :  { %2187 = vrot.lane.b32.xlu0 %v4908_v8, %s3807_s28  ;;  %2181 = vrot.lane.b32.xlu1 %v4910_v10, %s3807_s28 }
 0x391   :  { %2289 = vrot.lane.b32.xlu0 %v4900_v59, %s3808_s29  ;;  %2189 = vrot.lane.b32.xlu1 %v1839_v37, %s3807_s28 }
 0x395   :  { %2297 = vrot.lane.b32.xlu0 %v4908_v8, %s3808_s29  ;;  %2291 = vrot.lane.b32.xlu1 %v4910_v10, %s3808_s29 }
 0x399   :  { %2387 = vrot.lane.b32.xlu0 %v4900_v59, %s3809_s30  ;;  %2299 = vrot.lane.b32.xlu1 %v1839_v37, %s3808_s29 }
 0x39d   :  { %2395 = vrot.lane.b32.xlu0 %v4908_v8, %s3809_s30  ;;  %2389 = vrot.lane.b32.xlu1 %v4910_v10, %s3809_s30 }
 0x3a1   :  { %2485 = vrot.lane.b32.xlu0 %v4900_v59, %s3810_s7  ;;  %2397 = vrot.lane.b32.xlu1 %v1839_v37, %s3809_s30 }
 0x3a5   :  { %2493 = vrot.lane.b32.xlu0 %v4908_v8, %s3810_s7  ;;  %2487 = vrot.lane.b32.xlu1 %v4910_v10, %s3810_s7 }
 0x3a9   :  { %2583 = vrot.lane.b32.xlu0 %v4900_v59, %s3811_s8  ;;  %2495 = vrot.lane.b32.xlu1 %v1839_v37, %s3810_s7  ;;  %v3469_v59 = vld [vmem:[%s5657_s0 + $0x2] ss:$8 sm:$0xf] }
 0x3aa   :  { %v5155_v62 = vrot.slane %v3469_v59, %v3919_v15  ;;  %v5166_v14 = vrot.slane %v3469_v59, %v5772_v25 }
 0x3ad   :  { %2591 = vrot.lane.b32.xlu0 %v4908_v8, %s3811_s8  ;;  %2585 = vrot.lane.b32.xlu1 %v4910_v10, %s3811_s8  ;;  %v5140_v8 = vrot.slane %v1909_v50, %v5773_v27  ;;  %v5146_v10 = vrot.slane %v3468_v30, %v3921_v16 }
 0x3b1   :  { %1889 = vrot.lane.b32.xlu0 %v4902_v49, %s3803_s25  ;;  %2593 = vrot.lane.b32.xlu1 %v1839_v37, %s3811_s8  ;;  %v5169_v37 = vrot.slane %v3469_v59, %v5773_v27 }
 0x3b5   :  { %1897 = vrot.lane.b32.xlu0 %v4912_v61, %s3803_s25  ;;  %1891 = vrot.lane.b32.xlu1 %v4915_v58, %s3803_s25 }
 0x3b9   :  { %1987 = vrot.lane.b32.xlu0 %v4902_v49, %s3805_s26  ;;  %1899 = vrot.lane.b32.xlu1 %v4924_v46, %s3803_s25 }
 0x3bd   :  { %1995 = vrot.lane.b32.xlu0 %v4912_v61, %s3805_s26  ;;  %1989 = vrot.lane.b32.xlu1 %v4915_v58, %s3805_s26 }
 0x3c1   :  { %2085 = vrot.lane.b32.xlu0 %v4902_v49, %s3806_s27  ;;  %1997 = vrot.lane.b32.xlu1 %v4924_v46, %s3805_s26 }
 0x3c5   :  { %2093 = vrot.lane.b32.xlu0 %v4912_v61, %s3806_s27  ;;  %2087 = vrot.lane.b32.xlu1 %v4915_v58, %s3806_s27 }
 0x3c9   :  { %2183 = vrot.lane.b32.xlu0 %v4902_v49, %s3807_s28  ;;  %2095 = vrot.lane.b32.xlu1 %v4924_v46, %s3806_s27 }
 0x3cd   :  { %2191 = vrot.lane.b32.xlu0 %v4912_v61, %s3807_s28  ;;  %2185 = vrot.lane.b32.xlu1 %v4915_v58, %s3807_s28 }
 0x3d1   :  { %2293 = vrot.lane.b32.xlu0 %v4902_v49, %s3808_s29  ;;  %2193 = vrot.lane.b32.xlu1 %v4924_v46, %s3807_s28 }
 0x3d5   :  { %2301 = vrot.lane.b32.xlu0 %v4912_v61, %s3808_s29  ;;  %2295 = vrot.lane.b32.xlu1 %v4915_v58, %s3808_s29 }
 0x3d9   :  { %2391 = vrot.lane.b32.xlu0 %v4902_v49, %s3809_s30  ;;  %2303 = vrot.lane.b32.xlu1 %v4924_v46, %s3808_s29 }
 0x3dd   :  { %2399 = vrot.lane.b32.xlu0 %v4912_v61, %s3809_s30  ;;  %2393 = vrot.lane.b32.xlu1 %v4915_v58, %s3809_s30 }
 0x3e1   :  { %2489 = vrot.lane.b32.xlu0 %v4902_v49, %s3810_s7  ;;  %2401 = vrot.lane.b32.xlu1 %v4924_v46, %s3809_s30 }
 0x3e3   :  { %v5046_v28 = vpop.permute.xlu0 %1885 }
 0x3e5   :  { %2497 = vrot.lane.b32.xlu0 %v4912_v61, %s3810_s7  ;;  %2491 = vrot.lane.b32.xlu1 %v4915_v58, %s3810_s7 }
 0x3e7   :  { %v5052_v43 = vpop.permute.xlu0 %1893  ;;  %v5054_v54 = vpop.permute.xlu1 %1887 }
 0x3e9   :  { %2587 = vrot.lane.b32.xlu0 %v4902_v49, %s3811_s8  ;;  %2499 = vrot.lane.b32.xlu1 %v4924_v46, %s3810_s7  ;;  %v1922_v49 = vrot.slane %v1909_v50, %v3921_v16  ;;  %v5187_v50 = vrot.slane %v3470_v26, %v5772_v25 }
 0x3eb   :  { %v5060_v6 = vpop.permute.xlu0 %1983  ;;  %v5062_v13 = vpop.permute.xlu1 %1895 }
 0x3ed   :  { %2595 = vrot.lane.b32.xlu0 %v4912_v61, %s3811_s8  ;;  %2589 = vrot.lane.b32.xlu1 %v4915_v58, %s3811_s8  ;;  %v5152_v61 = vrot.slane %v3468_v30, %v5773_v27  ;;  %v5158_v58 = vrot.slane %v3469_v59, %v3921_v16  ;;  %v5190_v30 = vrot.slane %v3470_v26, %v5773_v27 }
 0x3ef   :  { %v5068_v22 = vpop.permute.xlu0 %1991  ;;  %v5070_v42 = vpop.permute.xlu1 %1985 }
 0x3f1   :  { %2597 = vrot.lane.b32.xlu1 %v4924_v46, %s3811_s8  ;;  %v5175_v46 = vrot.slane %v3470_v26, %v3921_v16  ;;  %v5208_v26 = vrot.slane %v3472_v1, %v3919_v15 }
 0x3f3   :  { %v5074_v36 = vpop.permute.xlu0 %2081  ;;  %v5076_v17 = vpop.permute.xlu1 %1993 }
 0x3f7   :  { %v5078_v23 = vpop.permute.xlu0 %2089  ;;  %v5080_v2 = vpop.permute.xlu1 %2083 }
 0x3fb   :  { %v5082_v32 = vpop.permute.xlu0 %2179  ;;  %v5084_v53 = vpop.permute.xlu1 %2091 }
 0x3ff   :  { %v5086_v7 = vpop.permute.xlu0 %2187  ;;  %v5088_v39 = vpop.permute.xlu1 %2181 }
 0x403   :  { %v5090_v29 = vpop.permute.xlu0 %2289  ;;  %v5092_v52 = vpop.permute.xlu1 %2189 }
 0x407   :  { %v5094_v41 = vpop.permute.xlu0 %2297  ;;  %v5096_v19 = vpop.permute.xlu1 %2291 }
 0x40b   :  { %v5098_v38 = vpop.permute.xlu0 %2387  ;;  %v5100_v20 = vpop.permute.xlu1 %2299 }
 0x40f   :  { %v5102_v5 = vpop.permute.xlu0 %2395  ;;  %v5104_v4 = vpop.permute.xlu1 %2389 }
 0x410   :  { %5763 = vst [vmem:[#allocation26_spill] sm:$0xff] %v5104_v4 }
 0x413   :  { %v5106_v56 = vpop.permute.xlu0 %2485  ;;  %v5108_v18 = vpop.permute.xlu1 %2397 }
 0x414   :  { %5764 = vst [vmem:[#allocation15_spill] sm:$0xff] %v5106_v56  ;;  %5765 = vst [vmem:[#allocation13_spill] sm:$0xff] %v5108_v18  ;;  %v5214_v56 = vrot.slane %v3472_v1, %v5773_v27 }
 0x416   :  { %5776 = vst [vmem:[#allocation17_spill] sm:$0xff] %v5214_v56 }
 0x417   :  { %v5110_v34 = vpop.permute.xlu0 %2493  ;;  %v5112_v60 = vpop.permute.xlu1 %2487 }
 0x418   :  { %5766 = vst [vmem:[#allocation10_spill] sm:$0xff] %v5110_v34  ;;  %5767 = vst [vmem:[#allocation11_spill] sm:$0xff] %v5112_v60 }
 0x41b   :  { %v5114_v35 = vpop.permute.xlu0 %2583  ;;  %v5116_v3 = vpop.permute.xlu1 %2495 }
 0x41c   :  { %5768 = vst [vmem:[#allocation16_spill] sm:$0xff] %v5114_v35  ;;  %5769 = vst [vmem:[#allocation14_spill] sm:$0xff] %v5116_v3  ;;  %v5196_v35 = vrot.slane %v3471_v51, %v3919_v15 }
 0x41f   :  { %v5124_v55 = vpop.permute.xlu0 %2591  ;;  %v5126_v47 = vpop.permute.xlu1 %2585 }
 0x420   :  { %5770 = vst [vmem:[#allocation27_spill] sm:$0xff] %v5124_v55  ;;  %5771 = vst [vmem:[#allocation28_spill] sm:$0xff] %v5126_v47  ;;  %v5199_v55 = vrot.slane %v3471_v51, %v3921_v16 }
 0x423   :  { %v1890_v63 = vpop.permute.xlu0 %1889  ;;  %v5163_v33 = vpop.permute.xlu1 %2593 }
 0x424   :  { %5774 = vst [vmem:[#allocation8_spill] sm:$0xff] %v5163_v33  ;;  %v1903_v21 = vsel %vm61_vm1, %v1890_v63, %v5052_v43  ;;  %v1905_v0 = vsel %vm61_vm1, %v5046_v28, %v1890_v63  ;;  %v5193_v33 = vrot.slane %v3471_v51, %v5772_v25  ;;  %v5205_v63 = vrot.slane %v3472_v1, %v5772_v25  ;;  %v3473_v51 = vld [vmem:[%s5657_s0 + $0x7] ss:$8 sm:$0xf] }
 0x425   :  { %v1932_v59 = vmul.f32 %v1918_v24, %v1905_v0  ;;  %v1933_v47 = vmul.f32 %v1922_v49, %v1903_v21  ;;  %v5234_v18 = vrot.slane %v3473_v51, %v5772_v25  ;;  %v5243_v56 = vrot.slane %v3473_v51, %v5773_v27 }
 0x427   :  { %v1948_v0 = vrot.slane %v1932_v59, 3  ;;  %v1949_v21 = vrot.slane %v1933_v47, 3  ;;  %v1898_v60 = vpop.permute.xlu0 %1897  ;;  %v1892_v3 = vpop.permute.xlu1 %1891  ;;  %5777 = vst [vmem:[#allocation9_spill] sm:$0xff] %v5234_v18  ;;  %5780 = vst [vmem:[#allocation22_spill] sm:$0xff] %v5243_v56 }
 0x428   :  { %v1901_v34 = vsel %vm61_vm1, %v5052_v43, %v1898_v60  ;;  %v1907_v47 = vsel %vm61_vm1, %v1898_v60, %v5046_v28  ;;  %v1904_v59 = vsel %vm61_vm1, %v1892_v3, %v5062_v13  ;;  %v1906_v1 = vsel %vm61_vm1, %v5054_v54, %v1892_v3  ;;  %v3474_v3 = vld [vmem:[%s5657_s0 + $0x20] ss:$8 sm:$0xf] }
 0x429   :  { %1972 = vst [vmem:[#allocation2 + $0x2c8] sm:$0xe0] %v1948_v0  ;;  %1973 = vst [vmem:[#allocation2 + $0x2d0] sm:$0xe0] %v1949_v21  ;;  %v1931_v44 = vmul.f32 %v5137_v40, %v1907_v47  ;;  %v1934_v48 = vmul.f32 %v5140_v8, %v1901_v34  ;;  %v1936_v4 = vmul.f32 %v1918_v24, %v1906_v1 }
 0x42a   :  { %v1937_v43 = vmul.f32 %v1922_v49, %v1904_v59  ;;  %v5237_v28 = vrot.slane %v3473_v51, %v3919_v15  ;;  %v5240_v60 = vrot.slane %v3473_v51, %v3921_v16  ;;  %v5269_v18 = vrot.slane %v3474_v3, %v5772_v25 }
 0x42b   :  { %v1947_v47 = vrot.slane %v1931_v44, 3  ;;  %v1950_v34 = vrot.slane %v1934_v48, 3  ;;  %v1953_v24 = vrot.slane %v1936_v4, 3  ;;  %v1988_v59 = vpop.permute.xlu0 %1987  ;;  %v1900_v1 = vpop.permute.xlu1 %1899 }
 0x42c   :  { %5778 = vst [vmem:[#allocation20_spill] sm:$0xff] %v5237_v28  ;;  %5779 = vst [vmem:[#allocation18_spill] sm:$0xff] %v5240_v60  ;;  %v1955_v49 = vrot.slane %v1937_v43, 3  ;;  %v2001_v28 = vsel %vm116_vm2, %v1988_v59, %v5068_v22  ;;  %v2003_v60 = vsel %vm116_vm2, %v5060_v6, %v1988_v59  ;;  %v1902_v51 = vsel %vm61_vm1, %v5062_v13, %v1900_v1 }
 0x42d   :  { %v1908_v48 = vsel %vm61_vm1, %v1900_v1, %v5054_v54  ;;  %1971 = vst [vmem:[#allocation2 + $0x2c0] sm:$0xe0] %v1947_v47  ;;  %1974 = vst [vmem:[#allocation2 + $0x2d8] sm:$0xe0] %v1950_v34  ;;  %v1954_v44 = vsel %vm549_vm9, %v1948_v0, %v1953_v24  ;;  %v2030_v43 = vmul.f32 %v5143_v9, %v2003_v60 }
 0x42e   :  { %v5262_v4 = vsel %vm549_vm9, %v1949_v21, %v1955_v49  ;;  %1980 = vst [vmem:[#allocation2 + $0x308] sm:$0x1f] %v1953_v24  ;;  %1981 = vst [vmem:[#allocation2 + $0x310] sm:$0x1f] %v1955_v49  ;;  %v2031_v59 = vmul.f32 %v5146_v10, %v2001_v28  ;;  %v1935_v56 = vmul.f32 %v5137_v40, %v1908_v48 }
 0x42f   :  { %v1938_v13 = vmul.f32 %v5140_v8, %v1902_v51  ;;  %v5272_v54 = vrot.slane %v3474_v3, %v3919_v15  ;;  %v2046_v0 = vrot.slane %v2030_v43, 3  ;;  %v1996_v21 = vpop.permute.xlu0 %1995  ;;  %v1990_v45 = vpop.permute.xlu1 %1989  ;;  %v5275_v24 = vrot.slane %v3474_v3, %v3921_v16 }
 0x430   :  { %v2047_v1 = vrot.slane %v2031_v59, 3  ;;  %v5278_v60 = vrot.slane %v3474_v3, %v5773_v27  ;;  %v1951_v28 = vrot.slane %v1935_v56, 3  ;;  %v1999_v25 = vsel %vm116_vm2, %v5068_v22, %v1996_v21  ;;  %v2776_v8 = vld [vmem:[#allocation2 + $0x2c8] sm:$0xff]  ;;  %v5286_v49 = vld [vmem:[#allocation2 + $0x2d0] sm:$0xff] }
 0x431   :  { %v1957_v40 = vrot.slane %v1938_v13, 3  ;;  %v2005_v15 = vsel %vm116_vm2, %v1996_v21, %v5060_v6  ;;  %2070 = vst [vmem:[#allocation2 + $0x308] sm:$0xe0] %v2046_v0  ;;  %v2032_v27 = vmul.f32 %v5152_v61, %v1999_v25  ;;  %v2002_v56 = vsel %vm116_vm2, %v1990_v45, %v5076_v17 }
 0x432   :  { %5781 = vst [vmem:[#allocation21_spill] sm:$0xff] %v5278_v60  ;;  %2071 = vst [vmem:[#allocation2 + $0x310] sm:$0xe0] %v2047_v1  ;;  %v2029_v16 = vmul.f32 %v5149_v57, %v2005_v15  ;;  %v2004_v22 = vsel %vm116_vm2, %v5070_v42, %v1990_v45  ;;  %v1952_v3 = vsel %vm549_vm9, %v1947_v47, %v1951_v28 }
 0x433   :  { %v1958_v6 = vsel %vm549_vm9, %v1950_v34, %v1957_v40  ;;  %1979 = vst [vmem:[#allocation2 + $0x300] sm:$0x1f] %v1951_v28  ;;  %1982 = vst [vmem:[#allocation2 + $0x318] sm:$0x1f] %v1957_v40  ;;  %v2034_v51 = vmul.f32 %v5143_v9, %v2004_v22  ;;  %v2035_v48 = vmul.f32 %v5146_v10, %v2002_v56  ;;  %v2048_v59 = vrot.slane %v2032_v27, 3  ;;  %v2086_v13 = vpop.permute.xlu0 %2085  ;;  %v1998_v21 = vpop.permute.xlu1 %1997 }
 0x434   :  { %v2045_v43 = vrot.slane %v2029_v16, 3  ;;  %v3637_v25 = vpack.c.bf16 %v1954_v44, %v2776_v8  ;;  %v3719_v15 = vpack.c.bf16 %v5262_v4, %v5286_v49  ;;  %v2099_v47 = vsel %vm176_vm3, %v2086_v13, %v5078_v23  ;;  %v2775_v34 = vld [vmem:[#allocation2 + $0x2c0] sm:$0xff]  ;;  %v2778_v10 = vld [vmem:[#allocation2 + $0x2d8] sm:$0xff] }
 0x435   :  { %v2051_v60 = vrot.slane %v2034_v51, 3  ;;  %v2053_v45 = vrot.slane %v2035_v48, 3  ;;  %v2101_v9 = vsel %vm176_vm3, %v5074_v36, %v2086_v13  ;;  %2072 = vst [vmem:[#allocation2 + $0x318] sm:$0xe0] %v2048_v59  ;;  %v2129_v44 = vmul.f32 %v5158_v58, %v2099_v47 }
 0x436   :  { %2069 = vst [vmem:[#allocation2 + $0x300] sm:$0xe0] %v2045_v43  ;;  %v2128_v28 = vmul.f32 %v5155_v62, %v2101_v9  ;;  %v2000_v4 = vsel %vm116_vm2, %v5076_v17, %v1998_v21  ;;  %v2006_v40 = vsel %vm116_vm2, %v1998_v21, %v5070_v42  ;;  %3638 = vmatprep.subr.bf16.mxu0 %v3637_v25 }
 0x437   :  { %v2052_v8 = vsel %vm549_vm9, %v2046_v0, %v2051_v60  ;;  %v5318_v49 = vsel %vm549_vm9, %v2047_v1, %v2053_v45  ;;  %2078 = vst [vmem:[#allocation2 + $0x348] sm:$0x1f] %v2051_v60  ;;  %2079 = vst [vmem:[#allocation2 + $0x350] sm:$0x1f] %v2053_v45  ;;  %v2033_v16 = vmul.f32 %v5149_v57, %v2006_v40  ;;  %v2145_v22 = vrot.slane %v2129_v44, 3  ;;  %v2094_v51 = vpop.permute.xlu0 %2093  ;;  %v2088_v17 = vpop.permute.xlu1 %2087 }
 0x438   :  { %v2036_v27 = vmul.f32 %v5152_v61, %v2000_v4  ;;  %v2144_v56 = vrot.slane %v2128_v28, 3  ;;  %v3639_v48 = vpack.c.bf16 %v1952_v3, %v2775_v34  ;;  %v3717_v13 = vpack.c.bf16 %v1958_v6, %v2778_v10  ;;  %v2784_v60 = vld [vmem:[#allocation2 + $0x308] sm:$0xff] }
 0x439   :  { %v2049_v47 = vrot.slane %v2033_v16, 3  ;;  %v2097_v0 = vsel %vm176_vm3, %v5078_v23, %v2094_v51  ;;  %v2103_v1 = vsel %vm176_vm3, %v2094_v51, %v5074_v36  ;;  %v5328_v57 = vld [vmem:[#allocation2 + $0x310] sm:$0xff]  ;;  %2169 = vst [vmem:[#allocation2 + $0x350] sm:$0xe0] %v2145_v22  ;;  %v2100_v6 = vsel %vm176_vm3, %v2088_v17, %v5084_v53 }
 0x43a   :  { %v2055_v42 = vrot.slane %v2036_v27, 3  ;;  %2168 = vst [vmem:[#allocation2 + $0x348] sm:$0xe0] %v2144_v56  ;;  %v2127_v61 = vmul.f32 %v5166_v14, %v2103_v1  ;;  %v2130_v3 = vmul.f32 %v5169_v37, %v2097_v0  ;;  %v2102_v23 = vsel %vm176_vm3, %v5080_v2, %v2088_v17  ;;  %3640 = vmatpush1.bf16.msra.mxu0 %v3639_v48 }
 0x43b   :  { %v2050_v36 = vsel %vm549_vm9, %v2045_v43, %v2049_v47  ;;  %2077 = vst [vmem:[#allocation2 + $0x340] sm:$0x1f] %v2049_v47  ;;  %v2132_v25 = vmul.f32 %v5155_v62, %v2102_v23  ;;  %v2133_v45 = vmul.f32 %v5158_v58, %v2100_v6  ;;  %3718 = vmatprep.subr.bf16.mxu1 %v3717_v13  ;;  %v2184_v10 = vpop.permute.xlu0 %2183  ;;  %v2096_v28 = vpop.permute.xlu1 %2095 }
 0x43c   :  { %v2056_v21 = vsel %vm549_vm9, %v2048_v59, %v2055_v42  ;;  %2080 = vst [vmem:[#allocation2 + $0x358] sm:$0x1f] %v2055_v42  ;;  %v2143_v9 = vrot.slane %v2127_v61, 3  ;;  %v2146_v34 = vrot.slane %v2130_v3, 3  ;;  %3720 = vmatpush1.bf16.msra.mxu1 %v3719_v15  ;;  %v3641_v44 = vpack.c.bf16 %v2052_v8, %v2784_v60  ;;  %v2786_v16 = vld [vmem:[#allocation2 + $0x318] sm:$0xff] }
 0x43d   :  { %v3723_v4 = vpack.c.bf16 %v5318_v49, %v5328_v57  ;;  %v2149_v40 = vrot.slane %v2132_v25, 3  ;;  %v2151_v43 = vrot.slane %v2133_v45, 3  ;;  %v2197_v59 = vsel %vm232_vm4, %v2184_v10, %v5086_v7  ;;  %v2783_v58 = vld [vmem:[#allocation2 + $0x300] sm:$0xff] }
 0x43e   :  { %v2199_v62 = vsel %vm232_vm4, %v5082_v32, %v2184_v10  ;;  %2167 = vst [vmem:[#allocation2 + $0x340] sm:$0xe0] %v2143_v9  ;;  %2170 = vst [vmem:[#allocation2 + $0x358] sm:$0xe0] %v2146_v34  ;;  %v2227_v8 = vmul.f32 %v5175_v46, %v2197_v59  ;;  %v2098_v49 = vsel %vm176_vm3, %v5084_v53, %v2096_v28  ;;  %3642 = vmatprep.subr.bf16.mxu0 %v3641_v44 }
 0x43f   :  { %v2226_v15 = vmul.f32 %v5172_v31, %v2199_v62  ;;  %v2104_v27 = vsel %vm176_vm3, %v2096_v28, %v5080_v2  ;;  %v2150_v51 = vsel %vm549_vm9, %v2144_v56, %v2149_v40  ;;  %v5360_v17 = vsel %vm549_vm9, %v2145_v22, %v2151_v43  ;;  %2176 = vst [vmem:[#allocation2 + $0x388] sm:$0x1f] %v2149_v40  ;;  %v2192_v0 = vpop.permute.xlu0 %2191  ;;  %v2186_v53 = vpop.permute.xlu1 %2185 }
 0x440   :  { %2177 = vst [vmem:[#allocation2 + $0x390] sm:$0x1f] %v2151_v43  ;;  %v2131_v48 = vmul.f32 %v5166_v14, %v2104_v27  ;;  %v2134_v13 = vmul.f32 %v5169_v37, %v2098_v49  ;;  %v2243_v42 = vrot.slane %v2227_v8, 3  ;;  %v3643_v1 = vpack.c.bf16 %v2050_v36, %v2783_v58  ;;  %v5370_v14 = vld [vmem:[#allocation2 + $0x350] sm:$0xff] }
 0x441   :  { %v2242_v47 = vrot.slane %v2226_v15, 3  ;;  %v3721_v60 = vpack.c.bf16 %v2056_v21, %v2786_v16  ;;  %v2195_v56 = vsel %vm232_vm4, %v5086_v7, %v2192_v0  ;;  %v2201_v22 = vsel %vm232_vm4, %v2192_v0, %v5082_v32  ;;  %v2792_v61 = vld [vmem:[#allocation2 + $0x348] sm:$0xff] }
 0x442   :  { %v2147_v57 = vrot.slane %v2131_v48, 3  ;;  %v2153_v2 = vrot.slane %v2134_v13, 3  ;;  %2267 = vst [vmem:[#allocation2 + $0x390] sm:$0xe0] %v2243_v42  ;;  %v2225_v37 = vmul.f32 %v5187_v50, %v2201_v22  ;;  %v2228_v3 = vmul.f32 %v5190_v30, %v2195_v56  ;;  %3644 = vmatpush1.bf16.msra.mxu0 %v3643_v1 }
 0x443   :  { %2266 = vst [vmem:[#allocation2 + $0x388] sm:$0xe0] %v2242_v47  ;;  %v2198_v6 = vsel %vm232_vm4, %v2186_v53, %v5092_v52  ;;  %v2200_v7 = vsel %vm232_vm4, %v5088_v39, %v2186_v53  ;;  %3722 = vmatprep.subr.bf16.mxu1 %v3721_v60  ;;  %v2294_v10 = vpop.permute.xlu0 %2293  ;;  %v2194_v28 = vpop.permute.xlu1 %2193  ;;  %v3645_v44 = vpack.c.bf16 %v2150_v51, %v2792_v61 }
 0x444   :  { %v2148_v32 = vsel %vm549_vm9, %v2143_v9, %v2147_v57  ;;  %v2154_v23 = vsel %vm549_vm9, %v2146_v34, %v2153_v2  ;;  %2175 = vst [vmem:[#allocation2 + $0x380] sm:$0x1f] %v2147_v57  ;;  %2178 = vst [vmem:[#allocation2 + $0x398] sm:$0x1f] %v2153_v2  ;;  %v2230_v36 = vmul.f32 %v5172_v31, %v2200_v7  ;;  %v2241_v25 = vrot.slane %v2225_v37, 3 }
 0x445   :  { %v2231_v21 = vmul.f32 %v5175_v46, %v2198_v6  ;;  %v2244_v45 = vrot.slane %v2228_v3, 3  ;;  %3724 = vmatpush1.bf16.msra.mxu1 %v3723_v4  ;;  %v3727_v40 = vpack.c.bf16 %v5360_v17, %v5370_v14  ;;  %v2307_v34 = vsel %vm296_vm5, %v2294_v10, %v5094_v41  ;;  %v2791_v46 = vld [vmem:[#allocation2 + $0x340] sm:$0xff]  ;;  %v2794_v59 = vld [vmem:[#allocation2 + $0x358] sm:$0xff]  ;;  %3646 = vmatprep.subr.bf16.mxu0 %v3645_v44 }
 0x446   :  { %v2247_v43 = vrot.slane %v2230_v36, 3  ;;  %v2309_v31 = vsel %vm296_vm5, %v5090_v29, %v2294_v10  ;;  %2265 = vst [vmem:[#allocation2 + $0x380] sm:$0xe0] %v2241_v25  ;;  %v2336_v62 = vmul.f32 %v5196_v35, %v2307_v34  ;;  %v2196_v58 = vsel %vm232_vm4, %v5092_v52, %v2194_v28 }
 0x447   :  { %v2249_v9 = vrot.slane %v2231_v21, 3  ;;  %2268 = vst [vmem:[#allocation2 + $0x398] sm:$0xe0] %v2244_v45  ;;  %v2335_v4 = vmul.f32 %v5193_v33, %v2309_v31  ;;  %v2202_v16 = vsel %vm232_vm4, %v2194_v28, %v5088_v39  ;;  %v2232_v27 = vmul.f32 %v5190_v30, %v2196_v58  ;;  %v2302_v48 = vpop.permute.xlu0 %2301  ;;  %v2296_v52 = vpop.permute.xlu1 %2295 }
 0x448   :  { %v2248_v15 = vsel %vm549_vm9, %v2242_v47, %v2247_v43  ;;  %2274 = vst [vmem:[#allocation2 + $0x3c8] sm:$0x1f] %v2247_v43  ;;  %v2229_v49 = vmul.f32 %v5187_v50, %v2202_v16  ;;  %v2352_v17 = vrot.slane %v2336_v62, 3  ;;  %v3647_v13 = vpack.c.bf16 %v2148_v32, %v2791_v46 }
 0x449   :  { %v5402_v8 = vsel %vm549_vm9, %v2243_v42, %v2249_v9  ;;  %2275 = vst [vmem:[#allocation2 + $0x3d0] sm:$0x1f] %v2249_v9  ;;  %v2351_v51 = vrot.slane %v2335_v4, 3  ;;  %v3725_v0 = vpack.c.bf16 %v2154_v23, %v2794_v59  ;;  %v2251_v39 = vrot.slane %v2232_v27, 3  ;;  %v5412_v50 = vld [vmem:[#allocation2 + $0x390] sm:$0xff]  ;;  %v5784_v27 = vld [vmem:[#allocation13_spill] sm:$0xff] }
 0x44a   :  { %v2245_v53 = vrot.slane %v2229_v49, 3  ;;  %v2305_v47 = vsel %vm296_vm5, %v5094_v41, %v2302_v48  ;;  %v2311_v42 = vsel %vm296_vm5, %v2302_v48, %v5090_v29  ;;  %v2800_v1 = vld [vmem:[#allocation2 + $0x388] sm:$0xff]  ;;  %2376 = vst [vmem:[#allocation2 + $0x408] sm:$0xe0] %v2352_v17  ;;  %v2308_v57 = vsel %vm296_vm5, %v2296_v52, %v5100_v20  ;;  %3648 = vmatpush1.bf16.msra.mxu0 %v3647_v13 }
 0x44b   :  { %2375 = vst [vmem:[#allocation2 + $0x400] sm:$0xe0] %v2351_v51  ;;  %v2337_v30 = vmul.f32 %v5199_v55, %v2305_v47  ;;  %v2338_v60 = vmul.f32 %v5202_v11, %v2311_v42  ;;  %v2310_v41 = vsel %vm296_vm5, %v5096_v19, %v2296_v52  ;;  %v2252_v2 = vsel %vm549_vm9, %v2244_v45, %v2251_v39  ;;  %v2392_v37 = vpop.permute.xlu0 %2391  ;;  %v2304_v3 = vpop.permute.xlu1 %2303 }
 0x44c   :  { %v2246_v29 = vsel %vm549_vm9, %v2241_v25, %v2245_v53  ;;  %2273 = vst [vmem:[#allocation2 + $0x3c0] sm:$0x1f] %v2245_v53  ;;  %2276 = vst [vmem:[#allocation2 + $0x3d8] sm:$0x1f] %v2251_v39  ;;  %v2339_v56 = vmul.f32 %v5193_v33, %v2310_v41  ;;  %v2340_v22 = vmul.f32 %v5196_v35, %v2308_v57  ;;  %3726 = vmatprep.subr.bf16.mxu1 %v3725_v0 }
 0x44d   :  { %v2353_v61 = vrot.slane %v2337_v30, 3  ;;  %v2354_v14 = vrot.slane %v2338_v60, 3  ;;  %3728 = vmatpush1.bf16.msra.mxu1 %v3727_v40  ;;  %v3649_v6 = vpack.c.bf16 %v2248_v15, %v2800_v1  ;;  %v3731_v7 = vpack.c.bf16 %v5402_v8, %v5412_v50  ;;  %v2799_v33 = vld [vmem:[#allocation2 + $0x380] sm:$0xff]  ;;  %v5783_v8 = vld [vmem:[#allocation17_spill] sm:$0xff]  ;;  %v5786_v1 = vld [vmem:[#allocation23_spill] sm:$0xff] }
 0x44e   :  { %v2355_v32 = vrot.slane %v2339_v56, 3  ;;  %v2357_v23 = vrot.slane %v2340_v22, 3  ;;  %v2405_v36 = vsel %vm356_vm6, %v2392_v37, %v5102_v5  ;;  %v2407_v35 = vsel %vm356_vm6, %v5098_v38, %v2392_v37  ;;  %v2802_v21 = vld [vmem:[#allocation2 + $0x398] sm:$0xff]  ;;  %v5787_v30 = vld [vmem:[#allocation25_spill] sm:$0xff]  ;;  %v5791_v37 = vld [vmem:[#allocation20_spill] sm:$0xff] }
 0x44f   :  { %2377 = vst [vmem:[#allocation2 + $0x410] sm:$0xe0] %v2353_v61  ;;  %2378 = vst [vmem:[#allocation2 + $0x418] sm:$0xe0] %v2354_v14  ;;  %v2433_v25 = vmul.f32 %v5205_v63, %v2407_v35  ;;  %v2434_v45 = vmul.f32 %v5208_v26, %v2405_v36  ;;  %v2306_v10 = vsel %vm296_vm5, %v5100_v20, %v2304_v3  ;;  %3650 = vmatprep.subr.bf16.mxu0 %v3649_v6  ;;  %v2400_v20 = vpop.permute.xlu0 %2399  ;;  %v2394_v46 = vpop.permute.xlu1 %2393  ;;  %v2808_v15 = vld [vmem:[#allocation2 + $0x3c8] sm:$0xff]  ;;  %v5789_v56 = vld [vmem:[#allocation15_spill] sm:$0xff] }
 0x450   :  { %v2312_v28 = vsel %vm296_vm5, %v2304_v3, %v5096_v19  ;;  %v5443_v44 = vsel %vm549_vm9, %v2351_v51, %v2355_v32  ;;  %v5446_v40 = vsel %vm549_vm9, %v2352_v17, %v2357_v23  ;;  %2383 = vst [vmem:[#allocation2 + $0x440] sm:$0x1f] %v2355_v32  ;;  %2384 = vst [vmem:[#allocation2 + $0x448] sm:$0x1f] %v2357_v23  ;;  %v5785_v17 = vld [vmem:[#allocation26_spill] sm:$0xff] }
 0x451   :  { %v2341_v43 = vmul.f32 %v5199_v55, %v2306_v10  ;;  %v2342_v9 = vmul.f32 %v5202_v11, %v2312_v28  ;;  %v2449_v34 = vrot.slane %v2433_v25, 3  ;;  %v2450_v31 = vrot.slane %v2434_v45, 3  ;;  %v5782_v11 = vld [vmem:[#allocation19_spill] sm:$0xff]  ;;  %v2816_v22 = vld [vmem:[#allocation2 + $0x408] sm:$0xff]  ;;  %v5792_v10 = vld [vmem:[#allocation12_spill] sm:$0xff] }
 0x452   :  { %v3651_v59 = vpack.c.bf16 %v2246_v29, %v2799_v33  ;;  %v3729_v4 = vpack.c.bf16 %v2252_v2, %v2802_v21  ;;  %v2403_v58 = vsel %vm356_vm6, %v5102_v5, %v2400_v20  ;;  %v2409_v16 = vsel %vm356_vm6, %v2400_v20, %v5098_v38  ;;  %v5788_v29 = vld [vmem:[#allocation10_spill] sm:$0xff] }
 0x453   :  { %v2359_v19 = vrot.slane %v2341_v43, 3  ;;  %v2361_v62 = vrot.slane %v2342_v9, 3  ;;  %2473 = vst [vmem:[#allocation2 + $0x440] sm:$0xe0] %v2449_v34  ;;  %2474 = vst [vmem:[#allocation2 + $0x448] sm:$0xe0] %v2450_v31  ;;  %v2435_v55 = vmul.f32 %v5782_v11, %v2403_v58  ;;  %v2436_v49 = vmul.f32 %v5783_v8, %v2409_v16  ;;  %v2490_v47 = vpop.permute.xlu0 %2489  ;;  %v2402_v42 = vpop.permute.xlu1 %2401 }
 0x454   :  { %v2406_v51 = vsel %vm356_vm6, %v2394_v46, %v5784_v27  ;;  %v2408_v48 = vsel %vm356_vm6, %v5785_v17, %v2394_v46  ;;  %3652 = vmatpush1.bf16.msra.mxu0 %v3651_v59  ;;  %v2810_v5 = vld [vmem:[#allocation2 + $0x3d8] sm:$0xff]  ;;  %3730 = vmatprep.subr.bf16.mxu1 %v3729_v4  ;;  %v3653_v50 = vpack.c.bf16 %v5786_v1, %v2808_v15  ;;  %v2809_v46 = vld [vmem:[#allocation2 + $0x3d0] sm:$0xff]  ;;  %v2815_v59 = vld [vmem:[#allocation2 + $0x400] sm:$0xff] }
 0x455   :  { %v5465_v52 = vsel %vm549_vm9, %v2353_v61, %v2359_v19  ;;  %v5468_v38 = vsel %vm549_vm9, %v2354_v14, %v2361_v62  ;;  %2385 = vst [vmem:[#allocation2 + $0x450] sm:$0x1f] %v2359_v19  ;;  %2386 = vst [vmem:[#allocation2 + $0x458] sm:$0x1f] %v2361_v62  ;;  %v2437_v13 = vmul.f32 %v5205_v63, %v2408_v48  ;;  %v2451_v53 = vrot.slane %v2435_v55, 3  ;;  %v5790_v61 = vld [vmem:[#allocation9_spill] sm:$0xff] }
 0x456   :  { %v2438_v0 = vmul.f32 %v5208_v26, %v2406_v51  ;;  %v2452_v39 = vrot.slane %v2436_v49, 3  ;;  %3732 = vmatpush1.bf16.msra.mxu1 %v3731_v7  ;;  %v3733_v60 = vpack.c.bf16 %v5787_v30, %v2810_v5  ;;  %v2503_v2 = vsel %vm412_vm7, %v2490_v47, %v5788_v29  ;;  %v2807_v26 = vld [vmem:[#allocation2 + $0x3c0] sm:$0xff]  ;;  %3654 = vmatprep.subr.bf16.mxu0 %v3653_v50  ;;  %v5793_v4 = vld [vmem:[#allocation18_spill] sm:$0xff]  ;;  %v5796_v15 = vld [vmem:[#allocation11_spill] sm:$0xff] }
 0x457   :  { %v2453_v57 = vrot.slane %v2437_v13, 3  ;;  %v2505_v63 = vsel %vm412_vm7, %v5789_v56, %v2490_v47  ;;  %2475 = vst [vmem:[#allocation2 + $0x450] sm:$0xe0] %v2451_v53  ;;  %v5484_v3 = vmul.f32 %v5791_v37, %v2503_v2  ;;  %v2404_v6 = vsel %vm356_vm6, %v5784_v27, %v2402_v42  ;;  %v2498_v25 = vpop.permute.xlu0 %2497  ;;  %v2492_v45 = vpop.permute.xlu1 %2491  ;;  %v5794_v62 = vld [vmem:[#allocation22_spill] sm:$0xff]  ;;  %v2681_v55 = vld [vmem:[%s5660_s4] sm:$0xff]  ;;  %v5798_v1 = vld [vmem:[#allocation27_spill] sm:$0xff] }
 0x458   :  { %v2455_v41 = vrot.slane %v2438_v0, 3  ;;  %2476 = vst [vmem:[#allocation2 + $0x458] sm:$0xe0] %v2452_v39  ;;  %v5481_v14 = vmul.f32 %v5790_v61, %v2505_v63  ;;  %v2410_v7 = vsel %vm356_vm6, %v2402_v42, %v5785_v17  ;;  %v2439_v36 = vmul.f32 %v5782_v11, %v2404_v6  ;;  %3734 = vmatprep.subr.bf16.mxu1 %v3733_v60  ;;  %v5797_v5 = vld [vmem:[#allocation24_spill] sm:$0xff] }
 0x459   :  { %v5493_v32 = vsel %vm549_vm9, %v2449_v34, %v2453_v57  ;;  %2481 = vst [vmem:[#allocation2 + $0x480] sm:$0x1f] %v2453_v57  ;;  %v2440_v35 = vmul.f32 %v5783_v8, %v2410_v7  ;;  %v2548_v21 = vrot.slane %v5484_v3, 3  ;;  %v3655_v28 = vpack.c.bf16 %v5792_v10, %v2807_v26  ;;  %v5799_v30 = vld [vmem:[#allocation16_spill] sm:$0xff]  ;;  %v2818_v57 = vld [vmem:[#allocation2 + $0x418] sm:$0xff] }
 0x45a   :  { %v5496_v23 = vsel %vm549_vm9, %v2450_v31, %v2455_v41  ;;  %2482 = vst [vmem:[#allocation2 + $0x488] sm:$0x1f] %v2455_v41  ;;  %v2547_v33 = vrot.slane %v5481_v14, 3  ;;  %v3657_v43 = vpack.c.bf16 %v5446_v40, %v2816_v22  ;;  %v2457_v9 = vrot.slane %v2439_v36, 3  ;;  %v5795_v40 = vld [vmem:[#allocation14_spill] sm:$0xff]  ;;  %v2684_v26 = vld [vmem:[%s5660_s4 + $0x18] sm:$0xff] }
 0x45b   :  { %v2459_v34 = vrot.slane %v2440_v35, 3  ;;  %v2501_v31 = vsel %vm412_vm7, %v5788_v29, %v2498_v25  ;;  %v2507_v20 = vsel %vm412_vm7, %v2498_v25, %v5789_v56  ;;  %2572 = vst [vmem:[#allocation2 + $0x488] sm:$0xe0] %v2548_v21  ;;  %v2504_v16 = vsel %vm412_vm7, %v2492_v45, %v5795_v40  ;;  %3656 = vmatpush1.bf16.msra.mxu0 %v3655_v28  ;;  %v2588_v0 = vpop.permute.xlu0 %2587  ;;  %v2500_v47 = vpop.permute.xlu1 %2499  ;;  %v2817_v41 = vld [vmem:[#allocation2 + $0x410] sm:$0xff]  ;;  %v2685_v29 = vld [vmem:[%s5660_s4 + $0x20] sm:$0xff]  ;;  %v2824_v28 = vld [vmem:[#allocation2 + $0x448] sm:$0xff] }
 0x45c   :  { %2571 = vst [vmem:[#allocation2 + $0x480] sm:$0xe0] %v2547_v33  ;;  %v5511_v19 = vmul.f32 %v5793_v4, %v2501_v31  ;;  %v5514_v58 = vmul.f32 %v5794_v62, %v2507_v20  ;;  %v2506_v11 = vsel %vm412_vm7, %v5796_v15, %v2492_v45  ;;  %v5526_v8 = vsel %vm549_vm9, %v2451_v53, %v2457_v9  ;;  %v5802_v20 = vld [vmem:[#allocation28_spill] sm:$0xff] }
 0x45d   :  { %v5529_v49 = vsel %vm549_vm9, %v2452_v39, %v2459_v34  ;;  %2483 = vst [vmem:[#allocation2 + $0x490] sm:$0x1f] %v2457_v9  ;;  %2484 = vst [vmem:[#allocation2 + $0x498] sm:$0x1f] %v2459_v34  ;;  %v2535_v27 = vmul.f32 %v5790_v61, %v2506_v11  ;;  %v2536_v51 = vmul.f32 %v5791_v37, %v2504_v16  ;;  %3658 = vmatprep.subr.bf16.mxu0 %v3657_v43  ;;  %v2823_v43 = vld [vmem:[#allocation2 + $0x440] sm:$0xff] }
 0x45e   :  { %v2549_v17 = vrot.slane %v5511_v19, 3  ;;  %v2550_v48 = vrot.slane %v5514_v58, 3  ;;  %v3735_v13 = vpack.c.bf16 %v5797_v5, %v2809_v46  ;;  %v3659_v53 = vpack.c.bf16 %v5443_v44, %v2815_v59  ;;  %2935 = vmatmul.mubr.f32.vlgmr.msra.gmra.mrb[8].mxu0 %v2681_v55  ;;  %v5801_v34 = vld [vmem:[#allocation8_spill] sm:$0xff] }
 0x45f   :  { %v2551_v42 = vrot.slane %v2535_v27, 3  ;;  %v2553_v39 = vrot.slane %v2536_v51, 3  ;;  %v2601_v50 = vsel %vm472_vm8, %v2588_v0, %v5798_v1  ;;  %v2603_v60 = vsel %vm472_vm8, %v5799_v30, %v2588_v0  ;;  %v2596_v35 = vpop.permute.xlu0 %2595  ;;  %2940 = vmatprep.mubr.f32.mxu0 %v2685_v29  ;;  %v2826_v58 = vld [vmem:[#allocation2 + $0x458] sm:$0xff] }
 0x460   :  { %2573 = vst [vmem:[#allocation2 + $0x490] sm:$0xe0] %v2549_v17  ;;  %2574 = vst [vmem:[#allocation2 + $0x498] sm:$0xe0] %v2550_v48  ;;  %3736 = vmatpush1.bf16.msra.mxu1 %v3735_v13  ;;  %v5547_v44 = vmul.f32 %v5269_v18, %v2603_v60  ;;  %v5550_v2 = vmul.f32 %v5272_v54, %v2601_v50  ;;  %v2502_v56 = vsel %vm412_vm7, %v5795_v40, %v2500_v47  ;;  %v2825_v40 = vld [vmem:[#allocation2 + $0x450] sm:$0xff]  ;;  %v5803_v5 = vmov 0.0  }
 0x461   :  { %v2508_v63 = vsel %vm412_vm7, %v2500_v47, %v5796_v15  ;;  %v5562_v22 = vsel %vm549_vm9, %v2547_v33, %v2551_v42  ;;  %v5565_v61 = vsel %vm549_vm9, %v2548_v21, %v2553_v39  ;;  %2579 = vst [vmem:[#allocation2 + $0x4c0] sm:$0x1f] %v2551_v42  ;;  %2580 = vst [vmem:[#allocation2 + $0x4c8] sm:$0x1f] %v2553_v39  ;;  %3660 = vmatpush1.bf16.msra.mxu0 %v3659_v53  ;;  %v2590_v33 = vpop.permute.xlu1 %2589 }
 0x462   :  { %v2537_v14 = vmul.f32 %v5793_v4, %v2502_v56  ;;  %v2538_v37 = vmul.f32 %v5794_v62, %v2508_v63  ;;  %v2645_v3 = vrot.slane %v5547_v44, 3  ;;  %v2646_v6 = vrot.slane %v5550_v2, 3  ;;  %2941 = vmatmul.mubr.f32.gmra.mrb[10].mxu0 %v2684_v26  ;;  %v2832_v51 = vld [vmem:[#allocation2 + $0x488] sm:$0xff] }
 0x463   :  { %v3737_v7 = vpack.c.bf16 %v5468_v38, %v2818_v57  ;;  %v3739_v36 = vpack.c.bf16 %v5465_v52, %v2817_v41  ;;  %3089 = vmatmul.mubr.f32.vlgmr.msra.gmra.mrb[8].mxu1 %v2681_v55  ;;  %v2599_v45 = vsel %vm472_vm8, %v5798_v1, %v2596_v35  ;;  %v2605_v10 = vsel %vm472_vm8, %v2596_v35, %v5799_v30  ;;  %v5800_v38 = vld [vmem:[#allocation21_spill] sm:$0xff] }
 0x464   :  { %v2555_v21 = vrot.slane %v2537_v14, 3  ;;  %v2557_v25 = vrot.slane %v2538_v37, 3  ;;  %2669 = vst [vmem:[#allocation2 + $0x4c0] sm:$0xe0] %v2645_v3  ;;  %2670 = vst [vmem:[#allocation2 + $0x4c8] sm:$0xe0] %v2646_v6  ;;  %v2631_v52 = vmul.f32 %v5275_v24, %v2599_v45  ;;  %v2632_v9 = vmul.f32 %v5800_v38, %v2605_v10  ;;  %3011 = vmatprep.mubr.f32.mxu0 %v5803_v5 }
 0x465   :  { %3738 = vmatprep.subr.bf16.mxu1 %v3737_v7  ;;  %v2602_v31 = vsel %vm472_vm8, %v2590_v33, %v5801_v34  ;;  %v2604_v46 = vsel %vm472_vm8, %v5802_v20, %v2590_v33  ;;  %v3661_v11 = vpack.c.bf16 %v5496_v23, %v2824_v28  ;;  %v3663_v55 = vpack.c.bf16 %v5493_v32, %v2823_v43  ;;  %v2598_v27 = vpop.permute.xlu1 %2597  ;;  %v3236_v14 = vld [vmem:[#allocation3 + $0x28] sm:$0xff]  ;;  %v3233_v10 = vld [vmem:[#allocation3 + $0x10] sm:$0xff] }
 0x466   :  { %v2556_v59 = vsel %vm549_vm9, %v2549_v17, %v2555_v21  ;;  %v2558_v4 = vsel %vm549_vm9, %v2550_v48, %v2557_v25  ;;  %2581 = vst [vmem:[#allocation2 + $0x4d0] sm:$0x1f] %v2555_v21  ;;  %2582 = vst [vmem:[#allocation2 + $0x4d8] sm:$0x1f] %v2557_v25  ;;  %3740 = vmatpush1.bf16.msra.mxu1 %v3739_v36  ;;  %v2633_v19 = vmul.f32 %v5269_v18, %v2604_v46  ;;  %v2831_v17 = vld [vmem:[#allocation2 + $0x480] sm:$0xff]  ;;  %v3232_v37 = vld [vmem:[#allocation3 + $0x8] sm:$0xff] }
 0x467   :  { %v2634_v62 = vmul.f32 %v5272_v54, %v2602_v31  ;;  %v2647_v16 = vrot.slane %v2631_v52, 3  ;;  %v2648_v15 = vrot.slane %v2632_v9, 3  ;;  %3094 = vmatprep.mubr.f32.mxu1 %v2685_v29  ;;  %v2600_v18 = vsel %vm472_vm8, %v5801_v34, %v2598_v27  ;;  %v2834_v0 = vld [vmem:[#allocation2 + $0x498] sm:$0xff]  ;;  %3662 = vmatprep.subr.bf16.mxu0 %v3661_v11  ;;  %v2833_v42 = vld [vmem:[#allocation2 + $0x490] sm:$0xff]  ;;  %v3240_v36 = vld [vmem:[#allocation3 + $0x48] sm:$0xff] }
 0x468   :  { %v2649_v48 = vrot.slane %v2633_v19, 3  ;;  %v2606_v54 = vsel %vm472_vm8, %v2598_v27, %v5802_v20  ;;  %3095 = vmatmul.mubr.f32.gmra.mrb[10].mxu1 %v2684_v26  ;;  %v2635_v32 = vmul.f32 %v5275_v24, %v2600_v18  ;;  %v3741_v47 = vpack.c.bf16 %v5529_v49, %v2826_v58  ;;  %3664 = vmatpush1.bf16.msra.mxu0 %v3663_v55  ;;  %v3231_v21 = vld [vmem:[#allocation3] sm:$0xff]  ;;  %v3238_v25 = vld [vmem:[#allocation3 + $0x38] sm:$0xff]  ;;  %v3237_v28 = vld [vmem:[#allocation3 + $0x30] sm:$0xff] }
 0x469   :  { %v2651_v13 = vrot.slane %v2634_v62, 3  ;;  %2671 = vst [vmem:[#allocation2 + $0x4d0] sm:$0xe0] %v2647_v16  ;;  %2672 = vst [vmem:[#allocation2 + $0x4d8] sm:$0xe0] %v2648_v15  ;;  %v2636_v23 = vmul.f32 %v5800_v38, %v2606_v54  ;;  %v3743_v53 = vpack.c.bf16 %v5526_v8, %v2825_v40  ;;  %v3665_v12 = vpack.c.bf16 %v5565_v61, %v2832_v51  ;;  %v3797_v43 = vld [vmem:[#allocation2 + $0x3e8] sm:$0xff] }
 0x46a   :  { %v2650_v39 = vsel %vm549_vm9, %v2645_v3, %v2649_v48  ;;  %2677 = vst [vmem:[#allocation2 + $0x500] sm:$0x1f] %v2649_v48  ;;  %v3667_v50 = vpack.c.bf16 %v5562_v22, %v2831_v17  ;;  %v2653_v30 = vrot.slane %v2635_v32, 3  ;;  %3742 = vmatprep.subr.bf16.mxu1 %v3741_v47  ;;  %v3745_v60 = vpack.c.bf16 %v2558_v4, %v2834_v0  ;;  %v3235_v3 = vld [vmem:[#allocation3 + $0x20] sm:$0xff]  ;;  %v3234_v38 = vld [vmem:[#allocation3 + $0x18] sm:$0xff]  ;;  %v2686_v20 = vld [vmem:[%s5660_s4 + $0x28] sm:$0xff] }
 0x46b   :  { %v2652_v1 = vsel %vm549_vm9, %v2646_v6, %v2651_v13  ;;  %2678 = vst [vmem:[#allocation2 + $0x508] sm:$0x1f] %v2651_v13  ;;  %v2655_v24 = vrot.slane %v2636_v23, 3  ;;  %3165 = vmatprep.mubr.f32.mxu1 %v5803_v5  ;;  %3744 = vmatpush1.bf16.msra.mxu1 %v3743_v53  ;;  %v3747_v8 = vpack.c.bf16 %v2556_v59, %v2833_v42  ;;  %v2840_v49 = vld [vmem:[#allocation2 + $0x4c8] sm:$0xff]  ;;  %v2839_v57 = vld [vmem:[#allocation2 + $0x4c0] sm:$0xff]  ;;  %v2683_v6 = vld [vmem:[%s5660_s4 + $0x10] sm:$0xff] }
 0x46c   :  { %3666 = vmatprep.subr.bf16.mxu0 %v3665_v12  ;;  %v2654_v41 = vsel %vm549_vm9, %v2647_v16, %v2653_v30  ;;  %2679 = vst [vmem:[#allocation2 + $0x510] sm:$0x1f] %v2653_v30  ;;  %3746 = vmatprep.subr.bf16.mxu1 %v3745_v60  ;;  %v3669_v44 = vpack.c.bf16 %v2652_v1, %v2840_v49  ;;  %v3239_v9 = vld [vmem:[#allocation3 + $0x40] sm:$0xff]  ;;  %v3242_v34 = vld [vmem:[#allocation3 + $0x58] sm:$0xff]  ;;  %v3241_v40 = vld [vmem:[#allocation3 + $0x50] sm:$0xff] }
 0x46d   :  { %v2656_v29 = vsel %vm549_vm9, %v2648_v15, %v2655_v24  ;;  %2680 = vst [vmem:[#allocation2 + $0x518] sm:$0x1f] %v2655_v24  ;;  %3668 = vmatpush1.bf16.msra.mxu0 %v3667_v50  ;;  %v3671_v2 = vpack.c.bf16 %v2650_v39, %v2839_v57  ;;  %v3753_v33 = vpack.c.bf16 %v3236_v14, %v3232_v37  ;;  %v3798_v4 = vld [vmem:[#allocation2 + $0x3e0] sm:$0xff]  ;;  %v3799_v62 = vld [vmem:[#allocation2 + $0x3f8] sm:$0xff]  ;;  %v3800_v16 = vld [vmem:[#allocation2 + $0x3f0] sm:$0xff] }
 0x46e   :  { %3670 = vmatprep.subr.bf16.mxu0 %v3669_v44  ;;  %v3755_v45 = vpack.c.bf16 %v3235_v3, %v3231_v21  ;;  %v3757_v52 = vpack.c.bf16 %v3797_v43, %v3240_v36  ;;  %v3765_v46 = vpack.c.bf16 %v3238_v25, %v3234_v38  ;;  %v3767_v59 = vpack.c.bf16 %v3237_v28, %v3233_v10  ;;  %v3230_v3 = vld [vmem:[%s5661_s5] sm:$0xf] }
 0x46f   :  { %3748 = vmatpush1.bf16.msra.mxu1 %v3747_v8  ;;  %v3759_v19 = vpack.c.bf16 %v3798_v4, %v3239_v9  ;;  %v3769_v58 = vpack.c.bf16 %v3799_v62, %v3242_v34  ;;  %v3771_v15 = vpack.c.bf16 %v3800_v16, %v3241_v40 }
 0x470   :  { %v2842_v56 = vld [vmem:[#allocation2 + $0x4d8] sm:$0xff]  ;;  %v2841_v63 = vld [vmem:[#allocation2 + $0x4d0] sm:$0xff] }
 0x471   :  { %v3749_v22 = vpack.c.bf16 %v2656_v29, %v2842_v56  ;;  %v3751_v61 = vpack.c.bf16 %v2654_v41, %v2841_v63  ;;  %3672 = vmatpush1.bf16.msra.mxu0 %v3671_v2  ;;  %v2847_v35 = vld [vmem:[#allocation2 + $0x500] sm:$0x1f] }
 0x472   :  { %v2848_v26 = vld [vmem:[#allocation2 + $0x508] sm:$0x1f] }
 0x473   :  { %3475 = vmatprep.subr.msk.mxu0 %vm549_vm9, %v2848_v26  ;;  %3750 = vmatprep.subr.bf16.mxu1 %v3749_v22  ;;  %v2849_v31 = vld [vmem:[#allocation2 + $0x510] sm:$0x1f] }
 0x474   :  { %3752 = vmatpush1.bf16.msra.mxu1 %v3751_v61  ;;  %v2850_v7 = vld [vmem:[#allocation2 + $0x518] sm:$0x1f] }
 0x475   :  { %3479 = vmatprep.subr.msk.mxu1 %vm549_vm9, %v2850_v7  ;;  %3476 = vmatpush1.msk.msra.mxu0 %vm549_vm9, %v2847_v35 }
 0x476   :  { %3477 = vmatmul.mubr.msk.f32.vlgmr.msra.gmra.mrb[8].mxu0 %vm2851_vm12, %v2683_v6  ;;  %3754 = vmatprep.subr.bf16.mxu0 %v3753_v33 }
 0x477   :  { %3756 = vmatpush1.bf16.msra.mxu0 %v3755_v45  ;;  %3017 = vmatprep.mubr.f32.mxu0 %v5803_v5  ;;  %v3801_v45 = vld [vmem:[%s5656_s1] sm:$0xff] }
 0x478   :  { %3758 = vmatprep.subr.bf16.mxu0 %v3757_v52  ;;  %3480 = vmatpush1.msk.msra.mxu1 %vm549_vm9, %v2849_v31  ;;  %v5804_v52 = vld [vmem:[#allocation5_spill] sm:$0xff] }
 0x479   :  { %3481 = vmatmul.mubr.msk.f32.vlgmr.msra.gmra.mrb[8].mxu1 %vm2851_vm12, %v2683_v6  ;;  %3766 = vmatprep.subr.bf16.mxu1 %v3765_v46  ;;  %v3802_v31 = vld [vmem:[%s5656_s1 + $0x8] sm:$0xff] }
 0x47a   :  { %3478 = vmatmul.mubr.msk.f32.gmra.mrb[10].mxu0 %vm2851_vm12, %v2686_v20  ;;  %3768 = vmatpush1.bf16.msra.mxu1 %v3767_v59  ;;  %v5805_v59 = vld [vmem:[#allocation4_spill] sm:$0xff] }
 0x47b   :  { %3760 = vmatpush1.bf16.msra.mxu0 %v3759_v19  ;;  %3770 = vmatprep.subr.bf16.mxu1 %v3769_v58 }
 0x47c   :  { %3171 = vmatprep.mubr.f32.mxu1 %v5803_v5  ;;  %3338 = vmatprep.mubr.f32.mxu0 %v5803_v5 }
 0x47d   :  { %3482 = vmatmul.mubr.msk.f32.gmra.mrb[10].mxu1 %vm2851_vm12, %v2686_v20 }
 0x47e   :  { %3772 = vmatpush1.bf16.msra.mxu1 %v3771_v15  ;;  %3409 = vmatprep.mubr.f32.mxu1 %v5803_v5 }
 0x549   :  { %v3013_v11 = vpop.f32.mrb[8].mxu0 }
 0x54a   :  { %v3178_v55 = vmax.f32 %v3013_v11, 0.0  ;;  %v3015_v27 = vpop.f32.mrb[9].mxu0 }
 0x54b   :  { %v3179_v51 = vmax.f32 %v3015_v27, 0.0 }
 0x54c   :  { %v3194_v17 = vrot.slane %v3178_v55, 3  ;;  %v3167_v48 = vpop.f32.mrb[8].mxu1 }
 0x54d   :  { %v3195_v13 = vrot.slane %v3179_v51, 3  ;;  %v3019_v18 = vpop.f32.mrb[10].mxu0  ;;  %v3180_v54 = vmax.f32 %v3167_v48, 0.0  ;;  %v3169_v0 = vpop.f32.mrb[9].mxu1 }
 0x54e   :  { %3218 = vst [vmem:[#allocation3 + $0x80] sm:$0xe0] %v3194_v17  ;;  %v3182_v32 = vmax.f32 %v3019_v18, 0.0  ;;  %v3021_v23 = vpop.f32.mrb[11].mxu0  ;;  %v3181_v47 = vmax.f32 %v3169_v0, 0.0 }
 0x54f   :  { %3219 = vst [vmem:[#allocation3 + $0x88] sm:$0xe0] %v3195_v13  ;;  %v3196_v53 = vrot.slane %v3180_v54, 3  ;;  %v3183_v42 = vmax.f32 %v3021_v23, 0.0 }
 0x550   :  { %v3198_v39 = vrot.slane %v3182_v32, 3  ;;  %v3197_v1 = vrot.slane %v3181_v47, 3  ;;  %v3173_v5 = vpop.f32.mrb[10].mxu1 }
 0x551   :  { %3220 = vst [vmem:[#allocation3 + $0x90] sm:$0xe0] %v3196_v53  ;;  %v3200_v12 = vrot.slane %v3183_v42, 3  ;;  %v3184_v50 = vmax.f32 %v3173_v5, 0.0  ;;  %v3175_v30 = vpop.f32.mrb[11].mxu1 }
 0x552   :  { %v3199_v24 = vsel %vm549_vm9, %v3194_v17, %v3198_v39  ;;  %3226 = vst [vmem:[#allocation3 + $0xc0] sm:$0x1f] %v3198_v39  ;;  %3221 = vst [vmem:[#allocation3 + $0x98] sm:$0xe0] %v3197_v1  ;;  %v3185_v60 = vmax.f32 %v3175_v30, 0.0 }
 0x553   :  { %v3201_v8 = vsel %vm549_vm9, %v3195_v13, %v3200_v12  ;;  %3227 = vst [vmem:[#allocation3 + $0xc8] sm:$0x1f] %v3200_v12  ;;  %v3202_v49 = vrot.slane %v3184_v50, 3 }
 0x554   :  { %v3204_v57 = vrot.slane %v3185_v60, 3 }
 0x555   :  { %v3203_v41 = vsel %vm549_vm9, %v3196_v53, %v3202_v49  ;;  %3228 = vst [vmem:[#allocation3 + $0xd0] sm:$0x1f] %v3202_v49  ;;  %v3247_v29 = vld [vmem:[#allocation3 + $0x80] sm:$0xff] }
 0x556   :  { %v3205_v44 = vsel %vm549_vm9, %v3197_v1, %v3204_v57  ;;  %3229 = vst [vmem:[#allocation3 + $0xd8] sm:$0x1f] %v3204_v57  ;;  %v3248_v2 = vld [vmem:[#allocation3 + $0x88] sm:$0xff]  ;;  %v3763_v63 = vpack.c.bf16 %v3199_v24, %v3247_v29 }
 0x557   :  { %v3761_v56 = vpack.c.bf16 %v3201_v8, %v3248_v2 }
 0x558   :  { %v3249_v26 = vld [vmem:[#allocation3 + $0x90] sm:$0xff] }
 0x559   :  { %3762 = vmatprep.subr.bf16.mxu0 %v3761_v56  ;;  %v3250_v22 = vld [vmem:[#allocation3 + $0x98] sm:$0xff]  ;;  %v3775_v37 = vpack.c.bf16 %v3203_v41, %v3249_v26  ;;  %v3255_v6 = vld [vmem:[#allocation3 + $0xc0] sm:$0x1f] }
 0x55a   :  { %3764 = vmatpush1.bf16.msra.mxu0 %v3763_v63  ;;  %v3256_v61 = vld [vmem:[#allocation3 + $0xc8] sm:$0x1f]  ;;  %v3773_v14 = vpack.c.bf16 %v3205_v44, %v3250_v22 }
 0x55b   :  { %3483 = vmatprep.subr.msk.mxu0 %vm549_vm9, %v3256_v61 }
 0x55c   :  { %3774 = vmatprep.subr.bf16.mxu1 %v3773_v14  ;;  %v3257_v36 = vld [vmem:[#allocation3 + $0xd0] sm:$0x1f] }
 0x55d   :  { %3776 = vmatpush1.bf16.msra.mxu1 %v3775_v37  ;;  %v3258_v7 = vld [vmem:[#allocation3 + $0xd8] sm:$0x1f] }
 0x55e   :  { %3484 = vmatpush1.msk.msra.mxu0 %vm549_vm9, %v3255_v6  ;;  %3486 = vmatprep.subr.msk.mxu1 %vm549_vm9, %v3258_v7 }
 0x55f   :  { %3485 = vmatmul.mubr.msk.f32.vlgmr.msra.gmra.mrb[12].mxu0 %vm1660_vm11, %v3230_v3 }
 0x561   :  { %3487 = vmatpush1.msk.msra.mxu1 %vm549_vm9, %v3257_v36 }
 0x562   :  { %3488 = vmatmul.mubr.msk.f32.vlgmr.msra.gmra.mrb[12].mxu1 %vm1660_vm11, %v3230_v3 }
 0x632   :  { %v3340_v35 = vpop.f32.mrb[12].mxu0 }
 0x633   :  { %v3416_v33 = vmax.f32 %v3340_v35, 0.0  ;;  %v3342_v21 = vpop.f32.mrb[13].mxu0 }
 0x634   :  { %v3417_v25 = vmax.f32 %v3342_v21, 0.0 }
 0x635   :  { %v3420_v10 = vadd.f32 %v3801_v45, %v3416_v33  ;;  %v3411_v28 = vpop.f32.mrb[12].mxu1 }
 0x636   :  { %v3418_v43 = vmax.f32 %v3411_v28, 0.0  ;;  %v3421_v38 = vadd.f32 %v3417_v25, %v5804_v52  ;;  %v3413_v9 = vpop.f32.mrb[13].mxu1 }
 0x637   :  { %v3419_v34 = vmax.f32 %v3413_v9, 0.0 }
 0x638   :  { %v3422_v20 = vadd.f32 %v3802_v31, %v3418_v43  ;;  %v3428_v46 = vcombine.low %v3420_v10, %v3421_v38 }
 0x639   :  { %v3423_v4 = vadd.f32 %v3419_v34, %v5805_v59 }
 0x63a   :  { %3432 = vst [vmem:[%s5662_s6] sm:$0xff] %v3428_v46 }
 0x63b   :  { %v3429_v19 = vcombine.low %v3422_v20, %v3423_v4 }
 0x63d   :  { %3433 = vst [vmem:[%s5662_s6 + $0x8] sm:$0xff] %v3429_v19 }

</bundles_post_ra>
